<compile_context>
chip_gen: v5e
topology: v5e:2x2
jax: 0.10.0
libtpu: 0.0.40
codegen_flags: <defaults>
</compile_context>

<pallas_src>
import functools
import math

import jax
import jax.numpy as jnp
from jax import lax
from jax.experimental import pallas as pl
from jax.experimental.pallas import tpu as pltpu


# ----------------------------- in-kernel helpers ------------------------------

def _pow(v, p):
    """v ** p with p a trace-time Python float (constant-folded).

    The LAF 'mean' init uses only exponents 0 and 1, so no transcendental is emitted
    for the pows at all.  The general fallback is one log + one exp on the EUP instead
    of jnp.power's runtime-exponent lowering."""
    p = float(p)
    if p == 0.0:
        return jnp.ones_like(v)
    if p == 1.0:
        return v
    if p == 2.0:
        return v * v
    return jnp.exp(p * jnp.log(jnp.maximum(v, 1e-6)))


def _laf_aggregate(x, get_adj, deg, inv_deg, laf, eps=1e-6):
    """LAF aggregation over incoming neighbours.

    Degree-like terms (inner exponent == 0 -> sum_j base^0 = in-degree) are hoisted out
    of the adjacency matmul entirely; only the remaining terms are fused into ONE
    lane-wide bf16 adj matmul with f32 accumulation.  For the 'mean'-style denominator
    (den == degree) the division is an exact multiply by the precomputed 1/degree."""
    a_, b_, c_, d_, e_, f_, g_, h_, alpha, beta, gamma, delta = (float(v) for v in laf)
    if gamma == 0.0 and delta == 0.0:
        raise ValueError("LAF denominator has all-zero coefficients (gamma == delta == 0)")

    s = jnp.clip(jax.nn.sigmoid(x), eps, 1.0 - eps)
    sm = 1.0 - s
    dp = x.shape[-1]
    # (coefficient, base, inner exponent, outer exponent); terms 0,1 -> num, 2,3 -> den
    defs = ((alpha, s, b_, a_), (beta, sm, d_, c_),
            (gamma, s, f_, e_), (delta, sm, h_, g_))

    mm_idx, mm_pieces, deg_idx = [], [], []
    for i, (coef, base, p_in, _) in enumerate(defs):
        if coef == 0.0:                 # trace-time constant folding
            continue
        if p_in == 0.0:                 # sum_j base^0 = in-degree: hoisted, no matmul
            deg_idx.append(i)
        else:                           # build the matmul operand directly in bf16
            mm_idx.append(i)
            mm_pieces.append(_pow(base, p_in).astype(jnp.bfloat16))

    red = None
    if mm_pieces:
        big = mm_pieces[0] if len(mm_pieces) == 1 else jnp.concatenate(mm_pieces, axis=-1)
        adj = get_adj()                 # waits on the adj DMA only when first needed
        red = jnp.dot(adj, big, preferred_element_type=jnp.float32)

    num, den = None, None

    def _add(acc, t):
        return t if acc is None else acc + t

    for k, i in enumerate(mm_idx):
        coef, _, _, p_out = defs[i]
        t = _pow(red[:, k * dp:(k + 1) * dp], p_out)
        if coef != 1.0:
            t = coef * t
        if i < 2:
            num = _add(num, t)
        else:
            den = _add(den, t)
    for i in deg_idx:
        coef, _, _, p_out = defs[i]
        t = _pow(deg, p_out)            # [N, 1] per-node scalar, broadcast over lanes
        if coef != 1.0:
            t = coef * t
        if i < 2:
            num = _add(num, t)
        else:
            den = _add(den, t)

    if num is None:                     # degenerate config: numerator identically zero
        return jnp.zeros_like(x)

    if gamma == 1.0 and e_ == 1.0 and f_ == 0.0 and delta == 0.0:
        # 'mean'-style denominator == in-degree: exact precomputed reciprocal.
        agg = num * inv_deg
    else:
        # general fallback (not hit by the mean init); '+eps' keeps it finite.
        agg = num * pl.reciprocal(den + eps, approx=True)

    if agg.shape != x.shape:
        agg = jnp.broadcast_to(agg, x.shape)
    return agg


# ----------------------------- fused Pallas kernel -----------------------------

def _fused_forward_kernel(x_ref, deg_ref, invdeg_ref, wcomb_ref, brel_ref,
                          w2_ref, b2_ref, adj_hbm_ref, o_ref,
                          adj_vmem, adj_sem, *, laf_params, num_classes, fuse_root):
    """Whole GraphSAGE forward in a single kernel.

    adj is DMA'd HBM->VMEM once (overlapped with the layer-1 elementwise work) and then
    stays resident across every layer; all feature dims are padded to 128 lanes and the
    node dim to a multiple of 128, so every matmul and the final store are lane-dense."""
    adj_copy = pltpu.make_async_copy(adj_hbm_ref, adj_vmem, adj_sem)
    adj_copy.start()                    # overlaps with the sigmoid/piece compute below
    state = {"adj": None}

    def get_adj():
        if state["adj"] is None:
            adj_copy.wait()
            state["adj"] = adj_vmem[...]        # [Np, Np] bf16, loaded once, reused
        return state["adj"]

    x = x_ref[...]                      # [Np, Dp] f32 (carried in f32 between layers)
    deg = deg_ref[...]                  # [Np, 1]  f32 in-degree
    inv_deg = invdeg_ref[...]           # [Np, 1]  f32 exact 1/in-degree

    for l, laf in enumerate(laf_params):        # L is tiny; unrolled at trace time
        agg = _laf_aggregate(x, get_adj, deg, inv_deg, laf)
        agg16 = agg.astype(jnp.bfloat16)
        x16 = x.astype(jnp.bfloat16)
        if fuse_root:
            # fused (agg @ W_rel + x @ W_root): one bf16 MXU matmul with K = 2*Dp
            xz = jnp.concatenate([agg16, x16], axis=-1)          # [Np, 2*Dp] bf16
            y = jnp.dot(xz, wcomb_ref[l], preferred_element_type=jnp.float32)
        else:
            # v5e (128-deep MXU): skip the concat copy, two K = Dp matmuls instead
            y = (jnp.dot(agg16, wcomb_ref[l, 0], preferred_element_type=jnp.float32)
                 + jnp.dot(x16, wcomb_ref[l, 1], preferred_element_type=jnp.float32))
        x = y + brel_ref[l]
        # TODO(synk): F.dropout(p=0.5) after conv1 is identity in eval mode;
        # training-mode dropout is not implemented.

    if state["adj"] is None:            # safety: never leave the adj DMA un-awaited
        adj_copy.wait()

    logits = (jnp.dot(x.astype(jnp.bfloat16), w2_ref[...],
                      preferred_element_type=jnp.float32) + b2_ref[...])   # [Np, Cp]
    # mask padded class lanes so the lane-dense log_softmax matches the unpadded one
    col = lax.broadcasted_iota(jnp.int32, logits.shape, 1)
    logits = jnp.where(col < num_classes, logits, -1e30)
    m = jnp.max(logits, axis=-1, keepdims=True)
    z = logits - m
    lse = jnp.log(jnp.sum(jnp.exp(z), axis=-1, keepdims=True))
    o_ref[...] = z - lse


# ----------------------------- wrapper -----------------------------------------

_VMEM = pl.BlockSpec(memory_space=pltpu.MemorySpace.VMEM)


def _round_up(v, m):
    return ((v + m - 1) // m) * m


def _pad2(a, rows, cols):
    r, c = a.shape
    return jnp.pad(a, ((0, rows - r), (0, cols - c)))


def _prefer_fused_root():
    """v6e/v7x have 256-deep MXUs -> fuse [agg, x] into one K=2*Dp matmul.
    v5e's MXU is 128-deep -> the concat buys nothing; do two K=Dp matmuls."""
    try:
        kind = jax.devices()[0].device_kind.lower()
    except Exception:
        return True
    return "v5" not in kind


def graphsage_forward(x, adj, params, training=False):
    """Pads the node dim and all feature dims to 128-lane multiples, stacks per-layer
    weights (bf16), precomputes the exact in-degree / 1/in-degree vectors, and runs the
    whole forward (conv1, middle convs, convn, lin2 + log_softmax) as ONE fused Pallas
    call.  Zero padding is exact: padded weight rows/cols and adjacency rows/cols are
    zero, so padded lanes/rows never contribute to real outputs."""
    n, f = x.shape
    layers = [params["conv1"]] + list(params["convs"]) + [params["convn"]]
    hidden = layers[0][1].shape[1]
    w2, b2 = params["lin2"]
    num_classes = w2.shape[1]

    dp = _round_up(max(f, hidden), 128)      # lane-dense working width
    cp = _round_up(num_classes, 128)         # lane-dense head/output width
    n_p = _round_up(n, 128)                  # lane/tile-dense node dim (adj K dim)

    x_p = _pad2(x.astype(jnp.float32), n_p, dp)
    adj_f32 = adj.astype(jnp.float32)
    adj_p = _pad2(adj_f32, n_p, n_p).astype(jnp.bfloat16)     # exact for a 0/1 adjacency
    # in-degree hoisted out of the per-layer LAF matmul; exact reciprocal (ring => deg>=1).
    deg = jnp.sum(adj_f32, axis=1, keepdims=True)             # [n, 1]
    deg_p = jnp.pad(deg, ((0, n_p - n), (0, 0)), constant_values=1.0)
    inv_deg_p = jnp.where(deg_p > 0, 1.0 / deg_p, 1.0)        # isolated nodes -> agg = 0

    fuse_root = _prefer_fused_root()
    wparts, brels, laf_list = [], [], []
    for laf, w_rel, b_rel, w_root in layers:
        wr = _pad2(w_rel, dp, dp)
        wo = _pad2(w_root, dp, dp)
        if fuse_root:
            wparts.append(jnp.concatenate([wr, wo], axis=0))   # [2*Dp, Dp]
        else:
            wparts.append(jnp.stack([wr, wo], axis=0))         # [2, Dp, Dp]
        brels.append(_pad2(b_rel, 1, dp))
        laf_list.append(tuple(float(v) for v in laf))
    wcomb = jnp.stack(wparts).astype(jnp.bfloat16)             # bf16 weights, f32 acc
    brels = jnp.stack(brels)                                   # [L, 1, Dp] f32
    w2_p = _pad2(w2, dp, cp).astype(jnp.bfloat16)              # [Dp, Cp] bf16
    b2_p = _pad2(b2, 1, cp)                                    # [1, Cp] f32

    # advisory cost hint for XLA's scheduler (only nonzero, non-degree LAF terms hit MXU)
    k_mm = []
    for laf in laf_list:
        a_, b_, c_, d_, e_, f_, g_, h_, al, be, ga, de = laf
        k_mm.append(sum(1 for coef, p_in in ((al, b_), (be, d_), (ga, f_), (de, h_))
                        if coef != 0.0 and p_in != 0.0))
    flops = sum(2 * n_p * n_p * (k * dp) + 2 * n_p * (2 * dp) * dp for k in k_mm) \
        + 2 * n_p * dp * cp
    transcend = len(laf_list) * n_p * dp + n_p * cp            # sigmoid + softmax exp
    bytes_accessed = int(x_p.size * 4 + adj_p.size * 2 + deg_p.size * 4
                         + inv_deg_p.size * 4 + wcomb.size * 2 + brels.size * 4
                         + w2_p.size * 2 + b2_p.size * 4 + n_p * cp * 4)

    # VMEM budget: resident adj scratch + (double-buffered) VMEM inputs/outputs +
    # headroom for the live per-layer f32/bf16 intermediates.
    resident = (adj_p.size * 2
                + 2 * (x_p.size * 4 + deg_p.size * 4 + inv_deg_p.size * 4
                       + wcomb.size * 2 + brels.size * 4 + w2_p.size * 2
                       + b2_p.size * 4 + n_p * cp * 4)
                + 8 * n_p * dp * 4)
    vmem_limit = int(min(64 * 1024 * 1024, max(resident, 16 * 1024 * 1024)))

    kernel = functools.partial(_fused_forward_kernel,
                               laf_params=tuple(laf_list),
                               num_classes=num_classes,
                               fuse_root=fuse_root)
    out_padded = pl.pallas_call(
        kernel,
        out_shape=jax.ShapeDtypeStruct((n_p, cp), jnp.float32),
        in_specs=[_VMEM] * 7 + [pl.BlockSpec(memory_space=pl.ANY)],   # adj stays in HBM
        out_specs=_VMEM,
        scratch_shapes=[pltpu.VMEM((n_p, n_p), jnp.bfloat16),         # resident adj
                        pltpu.SemaphoreType.DMA],
        compiler_params=pltpu.CompilerParams(vmem_limit_bytes=vmem_limit),
        cost_estimate=pl.CostEstimate(flops=int(flops),
                                      transcendentals=int(transcend),
                                      bytes_accessed=bytes_accessed),
    )(x_p, deg_p, inv_deg_p, wcomb, brels, w2_p, b2_p, adj_p)
    # TODO(synk): beyond ~4.5-5k nodes on v7x (64 MiB VMEM) / ~7-8k on v5e/v6e the
    # resident bf16 adj no longer fits: switch to a (tm, Np) row-block grid over nodes
    # (rows "parallel" -> also engages v7x's second TensorCore) with the layer loop as
    # separate calls, or stream adj manually from pl.ANY with double buffering.
    return out_padded[:n, :num_classes]


# ----------------------------- parameter init ---------------------------------

# LAF 'mean' init: num = (sum s)^1, den = (sum s^0)^1 = degree  =>  mean of sigmoid(x).
# Order: [a, b, c, d, e, f, g, h, alpha, beta, gamma, delta].  Kept as Python floats so
# the in-kernel pows constant-fold away and the degree term is hoisted at trace time.
_LAF_MEAN = (1., 1., 1., 1., 1., 0., 1., 1., 1., 0., 1., 0.)


def _init_linear(key, fan_in, fan_out, bias=True):
    wkey, bkey = jax.random.split(key)
    bound = 1.0 / math.sqrt(fan_in)
    w = jax.random.uniform(wkey, (fan_in, fan_out), jnp.float32, -bound, bound)
    if bias:
        b = jax.random.uniform(bkey, (1, fan_out), jnp.float32, -bound, bound)
        return w, b
    return w, None


def _init_sage_laf(key, fan_in, fan_out):
    k1, k2 = jax.random.split(key)
    w_rel, b_rel = _init_linear(k1, fan_in, fan_out, bias=True)
    w_root, _ = _init_linear(k2, fan_in, fan_out, bias=False)
    return (_LAF_MEAN, w_rel, b_rel, w_root)


def init_graphsage(key, num_features, hidden, num_classes, num_layers):
    keys = jax.random.split(key, num_layers + 1)
    params = {
        "conv1": _init_sage_laf(keys[0], num_features, hidden),
        "convs": [_init_sage_laf(keys[1 + i], hidden, hidden)
                  for i in range(num_layers - 2)],
        "convn": _init_sage_laf(keys[num_layers - 1], hidden, hidden),
    }
    w2, b2 = _init_linear(keys[num_layers], hidden, num_classes, bias=True)
    params["lin2"] = (w2, b2)
    return params


# ----------------------------- main --------------------------------------------

if __name__ == "__main__":
    # NOTE: these are correctness-check sizes only; per the perf review, benchmarking and
    # tuning decisions should be made at Cora scale (N padded to 2816), not at N=32.
    N_NODES = 32
    NUM_FEATURES = 16
    HIDDEN = 32
    NUM_CLASSES = 8
    NUM_LAYERS = 3  # conv1 + 1 middle conv + convn

    key = jax.random.PRNGKey(0)
    k_adj, k_x, k_params = jax.random.split(key, 3)

    # Deterministic small random graph as a dense adjacency (edge j -> i at adj[i, j]).
    rand = jax.random.uniform(k_adj, (N_NODES, N_NODES))
    adj = (rand < 0.15).astype(jnp.float32)
    adj = adj * (1.0 - jnp.eye(N_NODES, dtype=jnp.float32))          # no random self loops
    ring = jnp.roll(jnp.eye(N_NODES, dtype=jnp.float32), 1, axis=1)  # guarantee in-degree >= 1
    adj = jnp.maximum(adj, ring)

    x = jax.random.normal(k_x, (N_NODES, NUM_FEATURES), jnp.float32)

    params = init_graphsage(k_params, NUM_FEATURES, HIDDEN, NUM_CLASSES, NUM_LAYERS)

    out = graphsage_forward(x, adj, params, training=False)
    out = jax.block_until_ready(out)

    assert out.shape == (N_NODES, NUM_CLASSES), out.shape
    assert bool(jnp.all(jnp.isfinite(out))), "non-finite output"
    # log_softmax rows must (approximately) exponentiate-sum to 1
    row_sums = jnp.sum(jnp.exp(out), axis=-1)
    assert bool(jnp.all(jnp.abs(row_sums - 1.0) < 1e-4)), row_sums

    print("KERNEL_OK")
</pallas_src>

<mosaic_0001>
module attributes {stable_mosaic.version = 11 : i64} {
  func.func @_fused_forward_kernel(%arg0: memref<128x128xf32, #tpu.memory_space<vmem>>, %arg1: memref<128x1xf32, #tpu.memory_space<vmem>>, %arg2: memref<128x1xf32, #tpu.memory_space<vmem>>, %arg3: memref<3x256x128xbf16, #tpu.memory_space<vmem>>, %arg4: memref<3x1x128xf32, #tpu.memory_space<vmem>>, %arg5: memref<128x128xbf16, #tpu.memory_space<vmem>>, %arg6: memref<1x128xf32, #tpu.memory_space<vmem>>, %arg7: memref<128x128xbf16, #tpu.memory_space<any>>, %arg8: memref<128x128xf32, #tpu.memory_space<vmem>>, %arg9: memref<128x128xbf16, #tpu.memory_space<vmem>>, %arg10: memref<!tpu.dma_semaphore, #tpu.memory_space<semaphore_mem>>) attributes {dimension_semantics = [], scalar_prefetch = 0 : i64, scratch_operands = 2 : i64, tpu.core_type = #tpu.core_type<tc>} {
    tpu.enqueue_dma source(%arg7 : memref<128x128xbf16, #tpu.memory_space<any>>) target(%arg9 : memref<128x128xbf16, #tpu.memory_space<vmem>>) target_semaphore(%arg10 : memref<!tpu.dma_semaphore, #tpu.memory_space<semaphore_mem>>)
    %c0 = arith.constant 0 : index
    %c0_0 = arith.constant 0 : index
    %0 = vector.load %arg0[%c0, %c0_0] : memref<128x128xf32, #tpu.memory_space<vmem>>, vector<128x128xf32>
    %c0_1 = arith.constant 0 : index
    %c0_2 = arith.constant 0 : index
    %1 = vector.load %arg2[%c0_1, %c0_2] : memref<128x1xf32, #tpu.memory_space<vmem>>, vector<128x1xf32>
    %2 = arith.negf %0 : vector<128x128xf32>
    %3 = math.exp %2 : vector<128x128xf32>
    %cst = arith.constant 1.000000e+00 : f32
    %4 = vector.broadcast %cst : f32 to vector<128x128xf32>
    %5 = arith.addf %4, %3 : vector<128x128xf32>
    %6 = arith.divf %4, %5 : vector<128x128xf32>
    %cst_3 = arith.constant 9.99999997E-7 : f32
    %cst_4 = arith.constant 0.999998986 : f32
    %7 = vector.broadcast %cst_3 : f32 to vector<128x128xf32>
    %8 = arith.maximumf %7, %6 : vector<128x128xf32>
    %9 = vector.broadcast %cst_4 : f32 to vector<128x128xf32>
    %10 = arith.minimumf %9, %8 : vector<128x128xf32>
    %11 = arith.truncf %10 : vector<128x128xf32> to vector<128x128xbf16>
    tpu.wait_dma2 semaphore(%arg10 : memref<!tpu.dma_semaphore, #tpu.memory_space<semaphore_mem>>) src(%arg7 : memref<128x128xbf16, #tpu.memory_space<any>>) dst(%arg9 : memref<128x128xbf16, #tpu.memory_space<vmem>>)
    %c0_5 = arith.constant 0 : index
    %c0_6 = arith.constant 0 : index
    %12 = vector.load %arg9[%c0_5, %c0_6] : memref<128x128xbf16, #tpu.memory_space<vmem>>, vector<128x128xbf16>
    %cst_7 = arith.constant dense<0.000000e+00> : vector<128x128xf32>
    %13 = tpu.matmul %12, %11, %cst_7 {dimension_numbers = #tpu.dot_dimension_numbers<[1], [0], [0], [1], [0, 0, 1, 1], [], []>} : vector<128x128xbf16>, vector<128x128xbf16>, vector<128x128xf32> -> vector<128x128xf32>
    %14 = vector.broadcast %1 : vector<128x1xf32> to vector<128x128xf32>
    %15 = arith.mulf %13, %14 : vector<128x128xf32>
    %16 = arith.truncf %15 : vector<128x128xf32> to vector<128x128xbf16>
    %17 = arith.truncf %0 : vector<128x128xf32> to vector<128x128xbf16>
    %18 = tpu.concatenate %16, %17 in 1 : vector<128x128xbf16>, vector<128x128xbf16> -> vector<128x256xbf16>
    %c0_8 = arith.constant 0 : index
    %c0_9 = arith.constant 0 : index
    %c0_10 = arith.constant 0 : index
    %19 = vector.load %arg3[%c0_8, %c0_9, %c0_10] : memref<3x256x128xbf16, #tpu.memory_space<vmem>>, vector<1x256x128xbf16>
    %20 = vector.shape_cast %19 : vector<1x256x128xbf16> to vector<256x128xbf16>
    %cst_11 = arith.constant dense<0.000000e+00> : vector<128x128xf32>
    %21 = tpu.matmul %18, %20, %cst_11 {dimension_numbers = #tpu.dot_dimension_numbers<[1], [0], [0], [1], [0, 0, 1, 1], [], []>} : vector<128x256xbf16>, vector<256x128xbf16>, vector<128x128xf32> -> vector<128x128xf32>
    %c0_12 = arith.constant 0 : index
    %c0_13 = arith.constant 0 : index
    %c0_14 = arith.constant 0 : index
    %22 = vector.load %arg4[%c0_12, %c0_13, %c0_14] : memref<3x1x128xf32, #tpu.memory_space<vmem>>, vector<1x1x128xf32>
    %23 = vector.shape_cast %22 : vector<1x1x128xf32> to vector<1x128xf32>
    %24 = vector.broadcast %23 : vector<1x128xf32> to vector<128x128xf32>
    %25 = arith.addf %21, %24 : vector<128x128xf32>
    %26 = arith.negf %25 : vector<128x128xf32>
    %27 = math.exp %26 : vector<128x128xf32>
    %cst_15 = arith.constant 1.000000e+00 : f32
    %28 = vector.broadcast %cst_15 : f32 to vector<128x128xf32>
    %29 = arith.addf %28, %27 : vector<128x128xf32>
    %30 = arith.divf %28, %29 : vector<128x128xf32>
    %cst_16 = arith.constant 9.99999997E-7 : f32
    %cst_17 = arith.constant 0.999998986 : f32
    %31 = vector.broadcast %cst_16 : f32 to vector<128x128xf32>
    %32 = arith.maximumf %31, %30 : vector<128x128xf32>
    %33 = vector.broadcast %cst_17 : f32 to vector<128x128xf32>
    %34 = arith.minimumf %33, %32 : vector<128x128xf32>
    %35 = arith.truncf %34 : vector<128x128xf32> to vector<128x128xbf16>
    %cst_18 = arith.constant dense<0.000000e+00> : vector<128x128xf32>
    %36 = tpu.matmul %12, %35, %cst_18 {dimension_numbers = #tpu.dot_dimension_numbers<[1], [0], [0], [1], [0, 0, 1, 1], [], []>} : vector<128x128xbf16>, vector<128x128xbf16>, vector<128x128xf32> -> vector<128x128xf32>
    %37 = vector.broadcast %1 : vector<128x1xf32> to vector<128x128xf32>
    %38 = arith.mulf %36, %37 : vector<128x128xf32>
    %39 = arith.truncf %38 : vector<128x128xf32> to vector<128x128xbf16>
    %40 = arith.truncf %25 : vector<128x128xf32> to vector<128x128xbf16>
    %41 = tpu.concatenate %39, %40 in 1 : vector<128x128xbf16>, vector<128x128xbf16> -> vector<128x256xbf16>
    %c1 = arith.constant 1 : index
    %c0_19 = arith.constant 0 : index
    %c0_20 = arith.constant 0 : index
    %42 = vector.load %arg3[%c1, %c0_19, %c0_20] : memref<3x256x128xbf16, #tpu.memory_space<vmem>>, vector<1x256x128xbf16>
    %43 = vector.shape_cast %42 : vector<1x256x128xbf16> to vector<256x128xbf16>
    %cst_21 = arith.constant dense<0.000000e+00> : vector<128x128xf32>
    %44 = tpu.matmul %41, %43, %cst_21 {dimension_numbers = #tpu.dot_dimension_numbers<[1], [0], [0], [1], [0, 0, 1, 1], [], []>} : vector<128x256xbf16>, vector<256x128xbf16>, vector<128x128xf32> -> vector<128x128xf32>
    %c1_22 = arith.constant 1 : index
    %c0_23 = arith.constant 0 : index
    %c0_24 = arith.constant 0 : index
    %45 = vector.load %arg4[%c1_22, %c0_23, %c0_24] : memref<3x1x128xf32, #tpu.memory_space<vmem>>, vector<1x1x128xf32>
    %46 = vector.shape_cast %45 : vector<1x1x128xf32> to vector<1x128xf32>
    %47 = vector.broadcast %46 : vector<1x128xf32> to vector<128x128xf32>
    %48 = arith.addf %44, %47 : vector<128x128xf32>
    %49 = arith.negf %48 : vector<128x128xf32>
    %50 = math.exp %49 : vector<128x128xf32>
    %cst_25 = arith.constant 1.000000e+00 : f32
    %51 = vector.broadcast %cst_25 : f32 to vector<128x128xf32>
    %52 = arith.addf %51, %50 : vector<128x128xf32>
    %53 = arith.divf %51, %52 : vector<128x128xf32>
    %cst_26 = arith.constant 9.99999997E-7 : f32
    %cst_27 = arith.constant 0.999998986 : f32
    %54 = vector.broadcast %cst_26 : f32 to vector<128x128xf32>
    %55 = arith.maximumf %54, %53 : vector<128x128xf32>
    %56 = vector.broadcast %cst_27 : f32 to vector<128x128xf32>
    %57 = arith.minimumf %56, %55 : vector<128x128xf32>
    %58 = arith.truncf %57 : vector<128x128xf32> to vector<128x128xbf16>
    %cst_28 = arith.constant dense<0.000000e+00> : vector<128x128xf32>
    %59 = tpu.matmul %12, %58, %cst_28 {dimension_numbers = #tpu.dot_dimension_numbers<[1], [0], [0], [1], [0, 0, 1, 1], [], []>} : vector<128x128xbf16>, vector<128x128xbf16>, vector<128x128xf32> -> vector<128x128xf32>
    %60 = vector.broadcast %1 : vector<128x1xf32> to vector<128x128xf32>
    %61 = arith.mulf %59, %60 : vector<128x128xf32>
    %62 = arith.truncf %61 : vector<128x128xf32> to vector<128x128xbf16>
    %63 = arith.truncf %48 : vector<128x128xf32> to vector<128x128xbf16>
    %64 = tpu.concatenate %62, %63 in 1 : vector<128x128xbf16>, vector<128x128xbf16> -> vector<128x256xbf16>
    %c2 = arith.constant 2 : index
    %c0_29 = arith.constant 0 : index
    %c0_30 = arith.constant 0 : index
    %65 = vector.load %arg3[%c2, %c0_29, %c0_30] : memref<3x256x128xbf16, #tpu.memory_space<vmem>>, vector<1x256x128xbf16>
    %66 = vector.shape_cast %65 : vector<1x256x128xbf16> to vector<256x128xbf16>
    %cst_31 = arith.constant dense<0.000000e+00> : vector<128x128xf32>
    %67 = tpu.matmul %64, %66, %cst_31 {dimension_numbers = #tpu.dot_dimension_numbers<[1], [0], [0], [1], [0, 0, 1, 1], [], []>} : vector<128x256xbf16>, vector<256x128xbf16>, vector<128x128xf32> -> vector<128x128xf32>
    %c2_32 = arith.constant 2 : index
    %c0_33 = arith.constant 0 : index
    %c0_34 = arith.constant 0 : index
    %68 = vector.load %arg4[%c2_32, %c0_33, %c0_34] : memref<3x1x128xf32, #tpu.memory_space<vmem>>, vector<1x1x128xf32>
    %69 = vector.shape_cast %68 : vector<1x1x128xf32> to vector<1x128xf32>
    %70 = vector.broadcast %69 : vector<1x128xf32> to vector<128x128xf32>
    %71 = arith.addf %67, %70 : vector<128x128xf32>
    %72 = arith.truncf %71 : vector<128x128xf32> to vector<128x128xbf16>
    %c0_35 = arith.constant 0 : index
    %c0_36 = arith.constant 0 : index
    %73 = vector.load %arg5[%c0_35, %c0_36] : memref<128x128xbf16, #tpu.memory_space<vmem>>, vector<128x128xbf16>
    %cst_37 = arith.constant dense<0.000000e+00> : vector<128x128xf32>
    %74 = tpu.matmul %72, %73, %cst_37 {dimension_numbers = #tpu.dot_dimension_numbers<[1], [0], [0], [1], [0, 0, 1, 1], [], []>} : vector<128x128xbf16>, vector<128x128xbf16>, vector<128x128xf32> -> vector<128x128xf32>
    %c0_38 = arith.constant 0 : index
    %c0_39 = arith.constant 0 : index
    %75 = vector.load %arg6[%c0_38, %c0_39] : memref<1x128xf32, #tpu.memory_space<vmem>>, vector<1x128xf32>
    %76 = vector.broadcast %75 : vector<1x128xf32> to vector<128x128xf32>
    %77 = arith.addf %74, %76 : vector<128x128xf32>
    %78 = tpu.iota {dimensions = array<i32: 1>} : vector<128x128xi32>
    %c8_i32 = arith.constant 8 : i32
    %79 = vector.broadcast %c8_i32 : i32 to vector<128x128xi32>
    %80 = arith.cmpi slt, %78, %79 : vector<128x128xi32>
    %cst_40 = arith.constant -1.000000e+30 : f32
    %81 = vector.broadcast %cst_40 : f32 to vector<128x128xf32>
    %82 = arith.select %80, %77, %81 : vector<128x128xi1>, vector<128x128xf32>
    %cst_41 = arith.constant dense<0xFF800000> : vector<128xf32>
    %83 = vector.multi_reduction <maximumf>, %82, %cst_41 [1] : vector<128x128xf32> to vector<128xf32>
    %84 = vector.shape_cast %83 : vector<128xf32> to vector<128x1xf32>
    %85 = vector.broadcast %84 : vector<128x1xf32> to vector<128x128xf32>
    %86 = arith.subf %82, %85 : vector<128x128xf32>
    %87 = math.exp %86 : vector<128x128xf32>
    %cst_42 = arith.constant dense<0.000000e+00> : vector<128xf32>
    %88 = vector.multi_reduction <add>, %87, %cst_42 [1] : vector<128x128xf32> to vector<128xf32>
    %89 = vector.shape_cast %88 : vector<128xf32> to vector<128x1xf32>
    %90 = math.log %89 : vector<128x1xf32>
    %91 = vector.broadcast %90 : vector<128x1xf32> to vector<128x128xf32>
    %92 = arith.subf %86, %91 : vector<128x128xf32>
    %c0_43 = arith.constant 0 : index
    %c0_44 = arith.constant 0 : index
    %93 = vector.load %arg8[%c0_43, %c0_44] : memref<128x128xf32, #tpu.memory_space<vmem>>, vector<128x128xf32>
    tpu.vector_store %arg8[%c0_43, %c0_44], %92 {strides = array<i32>} : memref<128x128xf32, #tpu.memory_space<vmem>>, vector<128x128xf32>,
    return
  }
}

</mosaic_0001>

<bundles_post_ra>
// kernel: tpu_custom_call.1
= control target key start
LH: loop header
LB: loop body
LE: loop exit
PB: predicated region body
PF: predicated region fallthrough
CT: control target
= control target key end

     0   :  { %13 = vsyncpa [#allocation5], 0  ;;  %s5636_s0 = inlined_call_operand.vmem [shape: f32[128,128], index: 0, kind: input, shape index: {}]   ;;  %s5637_s1 = inlined_call_operand.vmem [shape: f32[128,1], index: 1, kind: input, shape index: {}]   ;;  %s5638_s2 = inlined_call_operand.vmem [shape: f32[128,1], index: 2, kind: input, shape index: {}]   ;;  %s5639_s3 = inlined_call_operand.hbm [shape: bf16[3,256,128], index: 3, kind: input, shape index: {}]   ;;  %s5640_s4 = inlined_call_operand.vmem [shape: f32[3,1,128], index: 4, kind: input, shape index: {}]   ;;  %s5641_s5 = inlined_call_operand.vmem [shape: bf16[128,128], index: 5, kind: input, shape index: {}]   ;;  %s5642_s6 = inlined_call_operand.vmem [shape: f32[1,128], index: 6, kind: input, shape index: {}]   ;;  %s5643_s7 = inlined_call_operand.vmem [shape: bf16[128,128], index: 7, kind: input, shape index: {}]   ;;  %s5644_s8 = inlined_call_operand.hbm [shape: f32[128,128], index: 8, kind: output, shape index: {}]  }
   0x1   :  { %14 = vsyncpa [#allocation6], 0  ;;  %s25_s28 = sshll.u32 %s5639_s3, 4  ;;  %s3637_s29 = smov [#allocation4]   ;;  %s26_s28 = int_to_ptr.hbm [resolvable:$true] %s25_s28 }
   0x2   :  { %s27_s30 = sshll.u32 %s3637_s29, 4  ;;  %s3638_s9 = smov 64   ;;  %s28_s30 = int_to_ptr.vmem [resolvable:$true] %s27_s30 }
   0x3   :  { %s3639_s10 = smov 4  }
   0x4   :  { %33 = dma.hbm_to_vmem [thread:$0]  %s26_s28, 6144, %s28_s30, [#allocation5], %s3638_s9, %s3638_s9, %s3639_s10  }
   0x5   :  { %3631 = dma.done.wait [#allocation5], 6144  }
   0x6   :  { %3632 = vsyncadd [#allocation5], 4294961152  ;;  %v54_v0 = vld [vmem:[%s5643_s7] sm:$0xff]  ;;  %v56_v1 = vld [vmem:[%s5643_s7 + $0x8] sm:$0xff] }
   0x7   :  { %v58_v2 = vld [vmem:[%s5643_s7 + $0x10] sm:$0xff]  ;;  %55 = vst [vmem:[#allocation2 + $0x30] sm:$0xff] %v54_v0  ;;  %v60_v3 = vld [vmem:[%s5643_s7 + $0x18] sm:$0xff]  ;;  %v62_v4 = vld [vmem:[%s5643_s7 + $0x20] sm:$0xff] }
   0x8   :  { %57 = vst [vmem:[#allocation2] sm:$0xff] %v56_v1  ;;  %v64_v5 = vld [vmem:[%s5643_s7 + $0x28] sm:$0xff]  ;;  %v66_v6 = vld [vmem:[%s5643_s7 + $0x30] sm:$0xff]  ;;  %v68_v7 = vld [vmem:[%s5643_s7 + $0x38] sm:$0xff] }
   0x9   :  { %59 = vst [vmem:[#allocation2 + $0x18] sm:$0xff] %v58_v2 }
   0xa   :  { %61 = vst [vmem:[#allocation2 + $0x10] sm:$0xff] %v60_v3 }
   0xb   :  { %63 = vst [vmem:[#allocation2 + $0x8] sm:$0xff] %v62_v4 }
   0xc   :  { %65 = vst [vmem:[#allocation2 + $0x20] sm:$0xff] %v64_v5 }
   0xd   :  { %67 = vst [vmem:[#allocation2 + $0x28] sm:$0xff] %v66_v6 }
   0xe   :  { %69 = vst [vmem:[#allocation2 + $0x38] sm:$0xff] %v68_v7 }
   0xf   :  { %75 = vsyncadd [#allocation3], 1024  ;;  %v3719_v8 = vld [vmem:[%s5636_s0] sm:$0xff]  ;;  %v3724_v9 = vld [vmem:[%s5636_s0 + $0x8] sm:$0xff] }
  0x10   :  { %5669 = vst [vmem:[#allocation12_spill] sm:$0xff] %v3719_v8  ;;  %v3729_v10 = vld [vmem:[%s5636_s0 + $0x10] sm:$0xff]  ;;  %v3734_v11 = vld [vmem:[%s5636_s0 + $0x18] sm:$0xff]  ;;  %v2910_v12 = vmul.f32 -1.442695, %v3719_v8  ;;  %v3740_v13 = vld [vmem:[%s5636_s0 + $0x20] sm:$0xff] }
  0x11   :  { %5670 = vst [vmem:[#allocation13_spill] sm:$0xff] %v3724_v9  ;;  %v2911_v14 = vmul.f32 -1.442695, %v3724_v9  ;;  %v3746_v15 = vld [vmem:[%s5636_s0 + $0x28] sm:$0xff]  ;;  %v2912_v16 = vmul.f32 -1.442695, %v3729_v10 }
  0x12   :  { %5671 = vst [vmem:[#allocation14_spill] sm:$0xff] %v3729_v10  ;;  %3304 = vpow2.f32 %v2910_v12  ;;  %v3752_v17 = vld [vmem:[%s5636_s0 + $0x30] sm:$0xff]  ;;  %v3757_v18 = vld [vmem:[%s5636_s0 + $0x38] sm:$0xff]  ;;  %v2913_v19 = vmul.f32 -1.442695, %v3734_v11  ;;  %v3763_v20 = vld [vmem:[%s5636_s0 + $0x40] sm:$0xff] }
  0x13   :  { %5672 = vst [vmem:[#allocation15_spill] sm:$0xff] %v3734_v11  ;;  %3306 = vpow2.f32 %v2911_v14  ;;  %v3768_v21 = vld [vmem:[%s5636_s0 + $0x48] sm:$0xff]  ;;  %v3773_v22 = vld [vmem:[%s5638_s2] sm:$0xff]  ;;  %v2914_v23 = vmul.f32 -1.442695, %v3740_v13  ;;  %v3779_v24 = vld [vmem:[%s5636_s0 + $0x50] sm:$0xff] }
  0x14   :  { %5673 = vst [vmem:[#allocation16_spill] sm:$0xff] %v3740_v13  ;;  %3308 = vpow2.f32 %v2912_v16  ;;  %v3784_v25 = vld [vmem:[%s5636_s0 + $0x58] sm:$0xff]  ;;  %v3789_v26 = vld [vmem:[%s5636_s0 + $0x60] sm:$0xff]  ;;  %v3794_v27 = vld [vmem:[%s5638_s2 + $0x8] sm:$0xff]  ;;  %v2915_v30 = vmul.f32 -1.442695, %v3746_v15 }
  0x15   :  { %5674 = vst [vmem:[#allocation17_spill] sm:$0xff] %v3746_v15  ;;  %v3799_v28 = vld [vmem:[%s5638_s2 + $0x10] sm:$0xff]  ;;  %v3804_v29 = vld [vmem:[%s5638_s2 + $0x18] sm:$0xff]  ;;  %3310 = vpow2.f32 %v2913_v19  ;;  %v3810_v31 = vld [vmem:[%s5636_s0 + $0x68] sm:$0xff]  ;;  %v2916_v35 = vmul.f32 -1.442695, %v3752_v17 }
  0x16   :  { %5675 = vst [vmem:[#allocation18_spill] sm:$0xff] %v3752_v17  ;;  %v3815_v32 = vld [vmem:[%s5638_s2 + $0x20] sm:$0xff]  ;;  %v3820_v33 = vld [vmem:[%s5638_s2 + $0x28] sm:$0xff]  ;;  %v3825_v34 = vld [vmem:[%s5638_s2 + $0x30] sm:$0xff]  ;;  %3312 = vpow2.f32 %v2914_v23  ;;  %v2917_v40 = vmul.f32 -1.442695, %v3757_v18 }
  0x17   :  { %5676 = vst [vmem:[#allocation19_spill] sm:$0xff] %v3757_v18  ;;  %v3831_v36 = vld [vmem:[%s5636_s0 + $0x70] sm:$0xff]  ;;  %v3836_v37 = vld [vmem:[%s5638_s2 + $0x38] sm:$0xff]  ;;  %v3841_v38 = vld [vmem:[%s5638_s2 + $0x40] sm:$0xff]  ;;  %3314 = vpow2.f32 %v2915_v30  ;;  %v2918_v46 = vmul.f32 -1.442695, %v3763_v20 }
  0x18   :  { %5677 = vst [vmem:[#allocation20_spill] sm:$0xff] %v3763_v20  ;;  %v3846_v39 = vld [vmem:[%s5638_s2 + $0x48] sm:$0xff]  ;;  %v3305_v41 = vpop.eup %3304  ;;  %v3852_v42 = vld [vmem:[%s5636_s0 + $0x78] sm:$0xff]  ;;  %v3857_v43 = vld [vmem:[%s5638_s2 + $0x50] sm:$0xff]  ;;  %3316 = vpow2.f32 %v2916_v35  ;;  %v2919_v51 = vmul.f32 -1.442695, %v3768_v21 }
  0x19   :  { %5678 = vst [vmem:[#allocation21_spill] sm:$0xff] %v3768_v21  ;;  %v3862_v44 = vld [vmem:[%s5638_s2 + $0x58] sm:$0xff]  ;;  %v3867_v45 = vld [vmem:[%s5638_s2 + $0x60] sm:$0xff]  ;;  %v3307_v47 = vpop.eup %3306  ;;  %v3873_v48 = vld [vmem:[%s5638_s2 + $0x68] sm:$0xff]  ;;  %3318 = vpow2.f32 %v2917_v40  ;;  %v2920_v53 = vmul.f32 -1.442695, %v3779_v24 }
  0x1a   :  { %5679 = vst [vmem:[#allocation22_spill] sm:$0xff] %v3779_v24  ;;  %v3878_v49 = vld [vmem:[%s5638_s2 + $0x70] sm:$0xff]  ;;  %v3883_v50 = vld [vmem:[%s5638_s2 + $0x78] sm:$0xff]  ;;  %v3309_v52 = vpop.eup %3308  ;;  %3320 = vpow2.f32 %v2918_v46  ;;  %v2921_v54 = vmul.f32 -1.442695, %v3784_v25  ;;  %v3892_v63 = vadd.f32 1.0, %v3305_v41 }
  0x1b   :  { %5680 = vst [vmem:[#allocation23_spill] sm:$0xff] %v3784_v25  ;;  %v2922_v55 = vmul.f32 -1.442695, %v3789_v26  ;;  %v3311_v56 = vpop.eup %3310  ;;  %3322 = vpow2.f32 %v2919_v51  ;;  %v2923_v57 = vmul.f32 -1.442695, %v3810_v31  ;;  %v3894_v1 = vadd.f32 1.0, %v3307_v47 }
  0x1c   :  { %5681 = vst [vmem:[#allocation24_spill] sm:$0xff] %v3789_v26  ;;  %v3313_v58 = vpop.eup %3312  ;;  %3324 = vpow2.f32 %v2920_v53  ;;  %v2924_v59 = vmul.f32 -1.442695, %v3831_v36  ;;  %v2925_v61 = vmul.f32 -1.442695, %v3852_v42  ;;  %v3896_v3 = vadd.f32 1.0, %v3309_v52 }
  0x1d   :  { %5682 = vst [vmem:[#allocation25_spill] sm:$0xff] %v3810_v31  ;;  %v3315_v60 = vpop.eup %3314  ;;  %3326 = vpow2.f32 %v2921_v54  ;;  %v3898_v5 = vadd.f32 1.0, %v3311_v56  ;;  %v3900_v7 = vadd.f32 1.0, %v3313_v58  ;;  %v183_v12 = vand.u32 2147483648, %v3892_v63 }
  0x1e   :  { %5683 = vst [vmem:[#allocation26_spill] sm:$0xff] %v3831_v36  ;;  %v3317_v62 = vpop.eup %3316  ;;  %3328 = vpow2.f32 %v2922_v55  ;;  %v198_v16 = vand.u32 2147483648, %v3894_v1  ;;  %v3906_v23 = vadd.f32 1.0, %v3315_v60  ;;  %v181_v35 = vand.u32 2147483647, %v3892_v63 }
  0x1f   :  { %5684 = vst [vmem:[#allocation27_spill] sm:$0xff] %v3852_v42  ;;  %v3319_v0 = vpop.eup %3318  ;;  %3330 = vpow2.f32 %v2923_v57  ;;  %v3908_v30 = vadd.f32 1.0, %v3317_v62  ;;  %vm177_vm0 = vweird.f32 %v3892_v63  ;;  %v196_v46 = vand.u32 2147483647, %v3894_v1 }
  0x20   :  { %v3321_v2 = vpop.eup %3320  ;;  %3332 = vpow2.f32 %v2924_v59  ;;  %v3912_v41 = vadd.f32 1.0, %v3319_v0  ;;  %v213_v47 = vand.u32 2147483648, %v3896_v3  ;;  %v3920_v53 = vor.u32 1.1754944e-38, %v183_v12 }
  0x21   :  { %v3323_v4 = vpop.eup %3322  ;;  %3334 = vpow2.f32 %v2925_v61  ;;  %v3918_v52 = vadd.f32 1.0, %v3321_v2  ;;  %vm192_vm1 = vweird.f32 %v3894_v1  ;;  %v228_v54 = vand.u32 2147483648, %v3898_v5 }
  0x22   :  { %v3325_v6 = vpop.eup %3324  ;;  %3336 = vrcp.f32 %v3892_v63  ;;  %v3925_v56 = vadd.f32 1.0, %v3323_v4  ;;  %v3929_v58 = vor.u32 1.1754944e-38, %v198_v16  ;;  %vm207_vm2 = vweird.f32 %v3896_v3 }
  0x23   :  { %v3327_v14 = vpop.eup %3326  ;;  %3338 = vrcp.f32 %v3894_v1  ;;  %v3927_v57 = vadd.f32 1.0, %v3325_v6  ;;  %v211_v59 = vand.u32 2147483647, %v3896_v3  ;;  %vm222_vm3 = vweird.f32 %v3898_v5 }
  0x24   :  { %v3329_v19 = vpop.eup %3328  ;;  %3340 = vrcp.f32 %v3896_v3  ;;  %v3935_v61 = vadd.f32 1.0, %v3327_v14  ;;  %v226_v0 = vand.u32 2147483647, %v3898_v5  ;;  %v3948_v12 = vor.u32 1.1754944e-38, %v213_v47 }
  0x25   :  { %v3331_v40 = vpop.eup %3330  ;;  %3342 = vrcp.f32 %v3898_v5  ;;  %v3937_v62 = vadd.f32 1.0, %v3329_v19  ;;  %vm237_vm4 = vweird.f32 %v3900_v7  ;;  %v3957_v42 = vor.u32 1.1754944e-38, %v228_v54 }
  0x26   :  { %v3333_v51 = vpop.eup %3332  ;;  %3344 = vrcp.f32 %v3900_v7  ;;  %v3944_v4 = vadd.f32 1.0, %v3331_v40  ;;  %v241_v36 = vand.u32 2147483647, %v3900_v7  ;;  %v243_v26 = vand.u32 2147483648, %v3900_v7 }
  0x27   :  { %v3335_v55 = vpop.eup %3334  ;;  %3346 = vrcp.f32 %v3906_v23  ;;  %v3953_v16 = vadd.f32 1.0, %v3333_v51  ;;  %vm3970_vm5 = vcmp.eq.f32.partialorder %v181_v35, 8.507059e+37  ;;  %vm3985_vm9 = vcmp.eq.f32.partialorder %v196_v46, 8.507059e+37 }
  0x28   :  { %v3933_v60 = vpop.eup %3336  ;;  %3348 = vrcp.f32 %v3908_v30  ;;  %v3968_v51 = vadd.f32 1.0, %v3335_v55  ;;  %vm3989_vm10 = vcmp.eq.f32.partialorder %v211_v59, 8.507059e+37  ;;  %vm3993_vm11 = vcmp.eq.f32.partialorder %v226_v0, 8.507059e+37 }
  0x29   :  { %v3942_v2 = vpop.eup %3338  ;;  %v173_v6 = vmul.f32 %v3933_v60, %v3892_v63  ;;  %vm178_vm7 = vweird.f32 %v3933_v60  ;;  %v256_v15 = vand.u32 2147483647, %v3906_v23  ;;  %vm4000_vm13 = vcmp.eq.f32.partialorder %v241_v36, 8.507059e+37 }
  0x2a   :  { %v3951_v14 = vpop.eup %3340  ;;  %v188_v19 = vmul.f32 %v3942_v2, %v3894_v1  ;;  %vm193_vm8 = vweird.f32 %v3942_v2  ;;  %v5693_v46 = vmov 0  ;;  %vm4011_vm14 = vmor %vm177_vm0, %vm178_vm7  ;;  %v271_v9 = vand.u32 2147483647, %v3908_v30 }
  0x2b   :  { %v3960_v40 = vpop.eup %3342  ;;  %v174_v31 = vsub.f32 1.0, %v173_v6  ;;  %v203_v47 = vmul.f32 %v3951_v14, %v3896_v3  ;;  %vm208_vm12 = vweird.f32 %v3951_v14  ;;  %v5694_v46 = vsel %vm4000_vm13, 4294967295, %v5693_v46  ;;  %vm4022_vm6 = vmor %vm192_vm1, %vm193_vm8 }
  0x2c   :  { %v3966_v25 = vpop.eup %3344  ;;  %v189_v54 = vsub.f32 1.0, %v188_v19  ;;  %v218_v21 = vmul.f32 %v3960_v40, %v3898_v5  ;;  %vm223_vm15 = vweird.f32 %v3960_v40  ;;  %vm4033_vm7 = vmor %vm207_vm2, %vm208_vm12  ;;  %3350 = vrcp.f32 %v3912_v41 }
  0x2d   :  { %v175_v6 = vmul.f32 %v3933_v60, %v174_v31  ;;  %v204_v20 = vsub.f32 1.0, %v203_v47  ;;  %v233_v18 = vmul.f32 %v3966_v25, %v3900_v7  ;;  %v3981_v55 = vpop.eup %3346  ;;  %vm238_vm0 = vweird.f32 %v3966_v25  ;;  %vm4042_vm8 = vmor %vm222_vm3, %vm223_vm15 }
  0x2e   :  { %v190_v35 = vmul.f32 %v3942_v2, %v189_v54  ;;  %v219_v31 = vsub.f32 1.0, %v218_v21  ;;  %v248_v59 = vmul.f32 %v3981_v55, %v3906_v23  ;;  %v3349_v36 = vpop.eup %3348  ;;  %vm253_vm1 = vweird.f32 %v3981_v55  ;;  %vm4055_vm2 = vmor %vm237_vm4, %vm238_vm0 }
  0x2f   :  { %v205_v13 = vmul.f32 %v3951_v14, %v204_v20  ;;  %v234_v54 = vsub.f32 1.0, %v233_v18  ;;  %v176_v21 = vadd.f32 %v3933_v60, %v175_v6  ;;  %v244_v18 = vor.u32 1.1754944e-38, %v243_v26 }
  0x30   :  { %v220_v20 = vmul.f32 %v3960_v40, %v219_v31  ;;  %v191_v11 = vadd.f32 %v3942_v2, %v190_v35  ;;  %v249_v10 = vsub.f32 1.0, %v248_v59  ;;  %v263_v35 = vmul.f32 %v3349_v36, %v3908_v30 }
  0x31   :  { %v235_v63 = vmul.f32 %v3966_v25, %v234_v54  ;;  %v206_v31 = vadd.f32 %v3951_v14, %v205_v13  ;;  %v258_v59 = vand.u32 2147483648, %v3906_v23  ;;  %vm267_vm3 = vweird.f32 %v3908_v30 }
  0x32   :  { %v221_v1 = vadd.f32 %v3960_v40, %v220_v20  ;;  %v250_v3 = vmul.f32 %v3981_v55, %v249_v10  ;;  %v180_v20 = vsel %vm4011_vm14, %v3933_v60, %v176_v21  ;;  %v264_v8 = vsub.f32 1.0, %v263_v35  ;;  %v4133_v47 = vpop.eup %3350 }
  0x33   :  { %v236_v13 = vadd.f32 %v3966_v25, %v235_v63  ;;  %vm268_vm12 = vweird.f32 %v3349_v36  ;;  %v195_v10 = vsel %vm4022_vm6, %v3942_v2, %v191_v11  ;;  %vm5705_vm15 = vweird.f32 %v3906_v23 }
  0x34   :  { %v251_v63 = vadd.f32 %v3981_v55, %v250_v3  ;;  %vm4066_vm13 = vmor %vm5705_vm15, %vm253_vm1  ;;  %vm4070_vm4 = vcmp.eq.f32.partialorder %v256_v15, 8.507059e+37  ;;  %v273_v21 = vand.u32 2147483648, %v3908_v30  ;;  %v210_v0 = vsel %vm4033_vm7, %v3951_v14, %v206_v31 }
  0x35   :  { %v225_v11 = vsel %vm4042_vm8, %v3960_v40, %v221_v1  ;;  %v265_v2 = vmul.f32 %v3349_v36, %v264_v8  ;;  %v4085_v15 = vsel %vm3970_vm5, %v3920_v53, %v180_v20  ;;  %v240_v23 = vsel %vm4055_vm2, %v3966_v25, %v236_v13  ;;  %vm4090_vm6 = vmor %vm267_vm3, %vm268_vm12 }
  0x36   :  { %v259_v30 = vor.u32 1.1754944e-38, %v258_v59  ;;  %vm4094_vm14 = vcmp.eq.f32.partialorder %v271_v9, 8.507059e+37  ;;  %v255_v8 = vsel %vm4066_vm13, %v3981_v55, %v251_v63  ;;  %v288_v53 = vand.u32 2147483648, %v3912_v41 }
  0x37   :  { %v266_v24 = vadd.f32 %v3349_v36, %v265_v2  ;;  %3352 = vrcp.f32 %v3918_v52  ;;  %v4106_v25 = vsel %vm3985_vm9, %v3929_v58, %v195_v10  ;;  %v4111_v9 = vsel %vm3989_vm10, %v3948_v12, %v210_v0 }
  0x38   :  { %v4116_v40 = vsel %vm3993_vm11, %v3957_v42, %v225_v11  ;;  %v274_v55 = vor.u32 1.1754944e-38, %v273_v21  ;;  %vm5714_vm5 = vnez %v5694_v46  ;;  %v303_v58 = vand.u32 2147483648, %v3918_v52 }
  0x39   :  { %v4120_v31 = vsel %vm5714_vm5, %v244_v18, %v240_v23  ;;  %v270_v19 = vsel %vm4090_vm6, %v3349_v36, %v266_v24  ;;  %3354 = vrcp.f32 %v3925_v56  ;;  %v4128_v17 = vsel %vm4070_vm4, %v259_v30, %v255_v8 }
  0x3a   :  { %vm282_vm9 = vweird.f32 %v3912_v41  ;;  %v286_v42 = vand.u32 2147483647, %v3912_v41  ;;  %v318_v12 = vand.u32 2147483648, %v3925_v56  ;;  %v4135_v46 = vor.u32 1.1754944e-38, %v288_v53 }
  0x3b   :  { %vm297_vm10 = vweird.f32 %v3918_v52  ;;  %v301_v18 = vand.u32 2147483647, %v3918_v52  ;;  %3356 = vrcp.f32 %v3927_v57  ;;  %v4142_v36 = vsel %vm4094_vm14, %v274_v55, %v270_v19 }
  0x3c   :  { %v278_v26 = vmul.f32 %v4133_v47, %v3912_v41  ;;  %vm312_vm11 = vweird.f32 %v3925_v56  ;;  %v316_v1 = vand.u32 2147483647, %v3925_v56  ;;  %v4150_v54 = vor.u32 1.1754944e-38, %v303_v58 }
  0x3d   :  { %v4148_v35 = vpop.eup %3352  ;;  %vm327_vm13 = vweird.f32 %v3927_v57  ;;  %v331_v13 = vand.u32 2147483647, %v3927_v57  ;;  %3358 = vrcp.f32 %v3935_v61  ;;  %vm283_vm0 = vweird.f32 %v4133_v47 }
  0x3e   :  { %v279_v3 = vsub.f32 1.0, %v278_v26  ;;  %v293_v59 = vmul.f32 %v4148_v35, %v3918_v52  ;;  %v4158_v20 = vor.u32 1.1754944e-38, %v318_v12  ;;  %v333_v10 = vand.u32 2147483648, %v3927_v57  ;;  %vm4200_vm15 = vmor %vm282_vm9, %vm283_vm0 }
  0x3f   :  { %v4160_v5 = vpop.eup %3354  ;;  %vm342_vm7 = vweird.f32 %v3935_v61  ;;  %v348_v63 = vand.u32 2147483648, %v3935_v61  ;;  %3360 = vrcp.f32 %v3937_v62  ;;  %vm4167_vm1 = vcmp.eq.f32.partialorder %v286_v42, 8.507059e+37 }
  0x40   :  { %v280_v60 = vmul.f32 %v4133_v47, %v279_v3  ;;  %v294_v21 = vsub.f32 1.0, %v293_v59  ;;  %vm4171_vm8 = vcmp.eq.f32.partialorder %v301_v18, 8.507059e+37  ;;  %v308_v11 = vmul.f32 %v4160_v5, %v3925_v56 }
  0x41   :  { %v346_v2 = vand.u32 2147483647, %v3935_v61  ;;  %v4178_v23 = vpop.eup %3356  ;;  %vm298_vm2 = vweird.f32 %v4148_v35  ;;  %v361_v30 = vand.u32 2147483647, %v3937_v62  ;;  %v363_v6 = vand.u32 2147483648, %v3937_v62 }
  0x42   :  { %3362 = vrcp.f32 %v3944_v4  ;;  %v281_v14 = vadd.f32 %v4133_v47, %v280_v60  ;;  %v295_v8 = vmul.f32 %v4148_v35, %v294_v21  ;;  %v309_v24 = vsub.f32 1.0, %v308_v11  ;;  %vm4211_vm14 = vmor %vm297_vm10, %vm298_vm2 }
  0x43   :  { %vm4186_vm3 = vcmp.eq.f32.partialorder %v316_v1, 8.507059e+37  ;;  %v323_v55 = vmul.f32 %v4178_v23, %v3927_v57  ;;  %vm4192_vm12 = vcmp.eq.f32.partialorder %v331_v13, 8.507059e+37  ;;  %v3359_v58 = vpop.eup %3358  ;;  %vm313_vm4 = vweird.f32 %v4160_v5 }
  0x44   :  { %v334_v12 = vor.u32 1.1754944e-38, %v333_v10  ;;  %v349_v18 = vor.u32 1.1754944e-38, %v348_v63  ;;  %vm357_vm6 = vweird.f32 %v3937_v62  ;;  %v296_v26 = vadd.f32 %v4148_v35, %v295_v8  ;;  %vm4235_vm2 = vmor %vm312_vm11, %vm313_vm4 }
  0x45   :  { %v310_v41 = vmul.f32 %v4160_v5, %v309_v24  ;;  %v324_v13 = vsub.f32 1.0, %v323_v55  ;;  %vm328_vm5 = vweird.f32 %v4178_v23  ;;  %vm4217_vm9 = vcmp.eq.f32.partialorder %v346_v2, 8.507059e+37  ;;  %v3361_v59 = vpop.eup %3360 }
  0x46   :  { %v338_v10 = vmul.f32 %v3359_v58, %v3935_v61  ;;  %vm4222_vm0 = vcmp.eq.f32.partialorder %v361_v30, 8.507059e+37  ;;  %v364_v52 = vor.u32 1.1754944e-38, %v363_v6  ;;  %vm372_vm10 = vweird.f32 %v3944_v4 }
  0x47   :  { %v285_v60 = vsel %vm4200_vm15, %v4133_v47, %v281_v14  ;;  %v311_v21 = vadd.f32 %v4160_v5, %v310_v41  ;;  %v325_v2 = vmul.f32 %v4178_v23, %v324_v13  ;;  %v353_v30 = vmul.f32 %v3361_v59, %v3937_v62  ;;  %vm4246_vm15 = vmor %vm327_vm13, %vm328_vm5 }
  0x48   :  { %v3363_v6 = vpop.eup %3362  ;;  %v300_v8 = vsel %vm4211_vm14, %v4148_v35, %v296_v26  ;;  %v339_v56 = vsub.f32 1.0, %v338_v10  ;;  %vm343_vm11 = vweird.f32 %v3359_v58  ;;  %v376_v14 = vand.u32 2147483647, %v3944_v4 }
  0x49   :  { %v326_v24 = vadd.f32 %v4178_v23, %v325_v2  ;;  %v354_v55 = vsub.f32 1.0, %v353_v30  ;;  %vm358_vm4 = vweird.f32 %v3361_v59  ;;  %v368_v42 = vmul.f32 %v3363_v6, %v3944_v4  ;;  %vm4262_vm13 = vmor %vm342_vm7, %vm343_vm11 }
  0x4a   :  { %v315_v35 = vsel %vm4235_vm2, %v4160_v5, %v311_v21  ;;  %v340_v26 = vmul.f32 %v3359_v58, %v339_v56  ;;  %vm373_vm14 = vweird.f32 %v3363_v6  ;;  %v378_v57 = vand.u32 2147483648, %v3944_v4  ;;  %vm4279_vm7 = vmor %vm357_vm6, %vm358_vm4 }
  0x4b   :  { %v330_v1 = vsel %vm4246_vm15, %v4178_v23, %v326_v24  ;;  %v355_v13 = vmul.f32 %v3361_v59, %v354_v55  ;;  %v369_v10 = vsub.f32 1.0, %v368_v42  ;;  %3364 = vrcp.f32 %v3953_v16 }
  0x4c   :  { %v4270_v5 = vsel %vm4167_vm1, %v4135_v46, %v285_v60  ;;  %v4275_v21 = vsel %vm4171_vm8, %v4150_v54, %v300_v8  ;;  %v341_v23 = vadd.f32 %v3359_v58, %v340_v26  ;;  %vm4283_vm5 = vcmp.eq.f32.partialorder %v376_v14, 8.507059e+37  ;;  %vm4299_vm1 = vmor %vm372_vm10, %vm373_vm14 }
  0x4d   :  { %v356_v2 = vadd.f32 %v3361_v59, %v355_v13  ;;  %v370_v7 = vmul.f32 %v3363_v6, %v369_v10  ;;  %v391_v46 = vand.u32 2147483647, %v3953_v16  ;;  %v393_v60 = vand.u32 2147483648, %v3953_v16 }
  0x4e   :  { %v320_v54 = vsel %vm4186_vm3, %v4158_v20, %v315_v35  ;;  %v335_v62 = vsel %vm4192_vm12, %v334_v12, %v330_v1  ;;  %v345_v0 = vsel %vm4262_vm13, %v3359_v58, %v341_v23  ;;  %3366 = vrcp.f32 %v3968_v51 }
  0x4f   :  { %v360_v8 = vsel %vm4279_vm7, %v3361_v59, %v356_v2  ;;  %v371_v53 = vadd.f32 %v3363_v6, %v370_v7  ;;  %v379_v20 = vor.u32 1.1754944e-38, %v378_v57  ;;  %v406_v19 = vand.u32 2147483647, %v3968_v51 }
  0x50   :  { %v350_v12 = vsel %vm4217_vm9, %v349_v18, %v345_v0  ;;  %vm387_vm8 = vweird.f32 %v3953_v16  ;;  %vm402_vm3 = vweird.f32 %v3968_v51  ;;  %v408_v4 = vand.u32 2147483648, %v3968_v51 }
  0x51   :  { %v3365_v58 = vpop.eup %3364  ;;  %v365_v47 = vsel %vm4222_vm0, %v364_v52, %v360_v8  ;;  %v375_v59 = vsel %vm4299_vm1, %v3363_v6, %v371_v53  ;;  %vm4316_vm12 = vcmp.eq.f32.partialorder %v391_v46, 8.507059e+37  ;;  %v394_v14 = vor.u32 1.1754944e-38, %v393_v60 }
  0x52   :  { %v383_v18 = vmul.f32 %v3365_v58, %v3953_v16  ;;  %v412_v3 = vmax.f32 %v4085_v15, 1e-06  ;;  %v413_v24 = vmax.f32 %v4106_v25, 1e-06  ;;  %v414_v55 = vmax.f32 %v4111_v9, 1e-06 }
  0x53   :  { %v380_v63 = vsel %vm4283_vm5, %v379_v20, %v375_v59  ;;  %vm388_vm6 = vweird.f32 %v3365_v58  ;;  %vm4326_vm9 = vcmp.eq.f32.partialorder %v406_v19, 8.507059e+37  ;;  %v415_v6 = vmax.f32 %v4116_v40, 1e-06 }
  0x54   :  { %v416_v42 = vmax.f32 %v4120_v31, 1e-06  ;;  %v3367_v35 = vpop.eup %3366  ;;  %v384_v26 = vsub.f32 1.0, %v383_v18  ;;  %v409_v57 = vor.u32 1.1754944e-38, %v408_v4  ;;  %v417_v15 = vmax.f32 %v4128_v17, 1e-06  ;;  %vm4340_vm0 = vmor %vm387_vm8, %vm388_vm6 }
  0x55   :  { %v418_v25 = vmax.f32 %v4142_v36, 1e-06  ;;  %v398_v9 = vmul.f32 %v3367_v35, %v3968_v51  ;;  %v419_v1 = vmax.f32 %v4270_v5, 1e-06  ;;  %v420_v41 = vmax.f32 %v4275_v21, 1e-06 }
  0x56   :  { %v421_v13 = vmax.f32 %v320_v54, 1e-06  ;;  %v385_v10 = vmul.f32 %v3365_v58, %v384_v26  ;;  %v422_v23 = vmax.f32 %v335_v62, 1e-06  ;;  %v423_v61 = vmax.f32 %v350_v12, 1e-06 }
  0x57   :  { %v424_v40 = vmax.f32 %v365_v47, 1e-06  ;;  %v399_v17 = vsub.f32 1.0, %v398_v9  ;;  %vm403_vm10 = vweird.f32 %v3367_v35  ;;  %v425_v36 = vmax.f32 %v380_v63, 1e-06 }
  0x58   :  { %v428_v11 = vmin.f32 %v412_v3, 0.999999  ;;  %v386_v2 = vadd.f32 %v3365_v58, %v385_v10  ;;  %v429_v5 = vmin.f32 %v413_v24, 0.999999  ;;  %v430_v7 = vmin.f32 %v414_v55, 0.999999  ;;  %vm4348_vm2 = vmor %vm402_vm3, %vm403_vm10 }
  0x59   :  { %v431_v21 = vmin.f32 %v415_v6, 0.999999  ;;  %v400_v46 = vmul.f32 %v3367_v35, %v399_v17  ;;  %v432_v60 = vmin.f32 %v416_v42, 0.999999  ;;  %v433_v54 = vmin.f32 %v417_v15, 0.999999 }
  0x5a   :  { %v434_v62 = vmin.f32 %v418_v25, 0.999999  ;;  %v390_v0 = vsel %vm4340_vm0, %v3365_v58, %v386_v2  ;;  %v435_v30 = vmin.f32 %v419_v1, 0.999999  ;;  %v436_v8 = vmin.f32 %v420_v41, 0.999999 }
  0x5b   :  { %v437_v53 = vmin.f32 %v421_v13, 0.999999  ;;  %v395_v20 = vsel %vm4316_vm12, %v394_v14, %v390_v0  ;;  %v401_v19 = vadd.f32 %v3367_v35, %v400_v46  ;;  %v438_v12 = vmin.f32 %v422_v23, 0.999999 }
  0x5c   :  { %v439_v4 = vmin.f32 %v423_v61, 0.999999  ;;  %v426_v47 = vmax.f32 %v395_v20, 1e-06  ;;  %v440_v59 = vmin.f32 %v424_v40, 0.999999  ;;  %v444_v3 = vpack.c.bf16 %v429_v5, %v428_v11 }
  0x5d   :  { %v441_v18 = vmin.f32 %v425_v36, 0.999999  ;;  %v405_v51 = vsel %vm4348_vm2, %v3367_v35, %v401_v19  ;;  %v445_v58 = vpack.c.bf16 %v431_v21, %v430_v7  ;;  %v446_v24 = vpack.c.bf16 %v433_v54, %v432_v60 }
  0x5e   :  { %v447_v55 = vpack.c.bf16 %v435_v30, %v434_v62  ;;  %v410_v63 = vsel %vm4326_vm9, %v409_v57, %v405_v51  ;;  %v448_v6 = vpack.c.bf16 %v437_v53, %v436_v8  ;;  %v449_v42 = vpack.c.bf16 %v439_v4, %v438_v12 }
  0x5f   :  { %v427_v56 = vmax.f32 %v410_v63, 1e-06  ;;  %v442_v14 = vmin.f32 %v426_v47, 0.999999  ;;  %v450_v26 = vpack.c.bf16 %v441_v18, %v440_v59 }
  0x61   :  { %v443_v15 = vmin.f32 %v427_v56, 0.999999 }
  0x63   :  { %v451_v25 = vpack.c.bf16 %v443_v15, %v442_v14 }
  0x65   :  { %520 = vmatpush.bf16.msra.mxu0 %v451_v25  ;;  %3281 = vmatpush.bf16.msra.mxu2 %v451_v25 }
  0x66   :  { %3633 = dma.done.wait [#allocation3], 1024 }
  0x67   :  { %3634 = vsyncadd [#allocation3], 4294966272  ;;  %v3640_v9 = vmov 0   ;;  %v5751_v52 = vld [vmem:[#allocation12_spill] sm:$0xff]  ;;  %v5752_v57 = vld [vmem:[#allocation13_spill] sm:$0xff]  ;;  %s2887_s13 = sshll.u32 %s5644_s8, 4  ;;  %s2888_s13 = int_to_ptr.hbm [resolvable:$true] %s2887_s13 }
  0x68   :  { %3368 = vset.pattern.permute.xlu0 %v3640_v9  ;;  %3369 = vset.pattern.permute.xlu1 %v3640_v9  ;;  %v681_v35 = vpack.c.bf16 %v5751_v52, %v5751_v52  ;;  %v682_v1 = vpack.c.bf16 %v5752_v57, %v5752_v57  ;;  %v5753_v23 = vld [vmem:[#allocation14_spill] sm:$0xff]  ;;  %v5754_v40 = vld [vmem:[#allocation15_spill] sm:$0xff]  ;;  %v3230_v7 = vld [vmem:[#allocation4 + $0x28] sm:$0xff]  ;;  %s3642_s14 = smov 128   ;;  %s3643_s2 = smov 8  }
  0x69   :  { %611 = vperm.xlu0 %3368, %v3841_v38   ;;  %621 = vperm.xlu1 %3369, %v3857_v43   ;;  %v3221_v38 = vld [vmem:[#allocation2 + $0x8] sm:$0xff]  ;;  %v683_v61 = vpack.c.bf16 %v5753_v23, %v5753_v23  ;;  %v684_v31 = vpack.c.bf16 %v5754_v40, %v5754_v40  ;;  %v3232_v17 = vld [vmem:[#allocation4 + $0x38] sm:$0xff]  ;;  %v3231_v5 = vld [vmem:[#allocation4 + $0x30] sm:$0xff] }
  0x6a   :  { %3370 = vset.pattern.permute.xlu2 %v3640_v9  ;;  %521 = vmatpush.bf16.msra.mxu0 %v450_v26  ;;  %v3238_v43 = vld [vmem:[#allocation4 + $0x68] sm:$0xff]  ;;  %v761_v41 = vunpack.c.l.b16 %v681_v35  ;;  %v762_v13 = vunpack.c.l.b16 %v682_v1  ;;  %v5755_v21 = vld [vmem:[#allocation16_spill] sm:$0xff]  ;;  %v3228_v8 = vld [vmem:[#allocation4 + $0x18] sm:$0xff] }
  0x6b   :  { %3282 = vmatpush.bf16.msra.mxu2 %v450_v26  ;;  %571 = vperm.xlu2 %3370, %v3773_v22   ;;  %v3217_v22 = vld [vmem:[#allocation2 + $0x30] sm:$0xff]  ;;  %v763_v36 = vunpack.c.l.b16 %v683_v61  ;;  %v764_v11 = vunpack.c.l.b16 %v684_v31  ;;  %v685_v46 = vpack.c.bf16 %v5755_v21, %v5755_v21  ;;  %v5756_v60 = vld [vmem:[#allocation17_spill] sm:$0xff]  ;;  %v3229_v62 = vld [vmem:[#allocation4 + $0x20] sm:$0xff] }
  0x6c   :  { %v777_v10 = vpack.c.b16 %v762_v13, %v761_v41  ;;  %925 = vmatpush.bf16.msra.mxu1 %v3232_v17  ;;  %3289 = vmatpush.bf16.msra.mxu3 %v3232_v17  ;;  %v686_v54 = vpack.c.bf16 %v5756_v60, %v5756_v60  ;;  %v3227_v53 = vld [vmem:[#allocation4 + $0x10] sm:$0xff]  ;;  %v5758_v12 = vld [vmem:[#allocation19_spill] sm:$0xff]  ;;  %v3226_v47 = vld [vmem:[#allocation4 + $0x8] sm:$0xff] }
  0x6d   :  { %v778_v2 = vpack.c.b16 %v764_v11, %v763_v36  ;;  %v765_v0 = vunpack.c.l.b16 %v685_v46  ;;  %v5757_v20 = vld [vmem:[#allocation18_spill] sm:$0xff]  ;;  %v688_v4 = vpack.c.bf16 %v5758_v12, %v5758_v12  ;;  %v5766_v60 = vld [vmem:[#allocation25_spill] sm:$0xff] }
  0x6e   :  { %522 = vmatpush.bf16.msra.mxu0 %v449_v42  ;;  %v766_v16 = vunpack.c.l.b16 %v686_v54  ;;  %v687_v19 = vpack.c.bf16 %v5757_v20, %v5757_v20  ;;  %v694_v54 = vpack.c.bf16 %v5766_v60, %v5766_v60 }
  0x6f   :  { %3283 = vmatpush.bf16.msra.mxu2 %v449_v42  ;;  %v768_v18 = vunpack.c.l.b16 %v688_v4 }
  0x70   :  { %926 = vmatpush.bf16.msra.mxu1 %v3231_v5  ;;  %3290 = vmatpush.bf16.msra.mxu3 %v3231_v5  ;;  %v779_v30 = vpack.c.b16 %v766_v16, %v765_v0  ;;  %v767_v59 = vunpack.c.l.b16 %v687_v19  ;;  %v774_v19 = vunpack.c.l.b16 %v694_v54 }
  0x71   :  { %616 = vperm.xlu0 %3368, %v3846_v39   ;;  %626 = vperm.xlu1 %3369, %v3862_v44   ;;  %v3239_v39 = vld [vmem:[#allocation4 + $0x70] sm:$0xff]  ;;  %v3237_v44 = vld [vmem:[#allocation4 + $0x60] sm:$0xff] }
  0x72   :  { %523 = vmatpush.bf16.msra.mxu0 %v448_v6  ;;  %v780_v51 = vpack.c.b16 %v768_v18, %v767_v59 }
  0x73   :  { %3284 = vmatpush.bf16.msra.mxu2 %v448_v6  ;;  %576 = vperm.xlu2 %3370, %v3794_v27   ;;  %v3240_v27 = vld [vmem:[#allocation4 + $0x78] sm:$0xff] }
  0x74   :  { %927 = vmatpush.bf16.msra.mxu1 %v3230_v7  ;;  %3291 = vmatpush.bf16.msra.mxu3 %v3230_v7  ;;  %v5765_v7 = vld [vmem:[#allocation24_spill] sm:$0xff] }
  0x75   :  { %v693_v21 = vpack.c.bf16 %v5765_v7, %v5765_v7 }
  0x76   :  { %524 = vmatpush.bf16.msra.mxu0 %v447_v55 }
  0x77   :  { %3285 = vmatpush.bf16.msra.mxu2 %v447_v55  ;;  %v5760_v55 = vld [vmem:[#allocation21_spill] sm:$0xff] }
  0x78   :  { %928 = vmatpush.bf16.msra.mxu1 %v3229_v62  ;;  %3292 = vmatpush.bf16.msra.mxu3 %v3229_v62  ;;  %v690_v63 = vpack.c.bf16 %v5760_v55, %v5760_v55 }
  0x79   :  { %631 = vperm.xlu0 %3368, %v3867_v45   ;;  %636 = vperm.xlu1 %3369, %v3873_v48   ;;  %v3236_v45 = vld [vmem:[#allocation4 + $0x58] sm:$0xff] }
  0x7a   :  { %525 = vmatpush.bf16.msra.mxu0 %v446_v24  ;;  %v3219_v48 = vld [vmem:[#allocation2 + $0x18] sm:$0xff]  ;;  %v770_v56 = vunpack.c.l.b16 %v690_v63 }
  0x7b   :  { %3286 = vmatpush.bf16.msra.mxu2 %v446_v24  ;;  %581 = vperm.xlu2 %3370, %v3799_v28   ;;  %v3218_v28 = vld [vmem:[#allocation2] sm:$0xff] }
  0x7c   :  { %929 = vmatpush.bf16.msra.mxu1 %v3228_v8  ;;  %3293 = vmatpush.bf16.msra.mxu3 %v3228_v8 }
  0x7e   :  { %526 = vmatpush.bf16.msra.mxu0 %v445_v58 }
  0x7f   :  { %3287 = vmatpush.bf16.msra.mxu2 %v445_v58  ;;  %v5759_v58 = vld [vmem:[#allocation20_spill] sm:$0xff] }
  0x80   :  { %930 = vmatpush.bf16.msra.mxu1 %v3227_v53  ;;  %3294 = vmatpush.bf16.msra.mxu3 %v3227_v53  ;;  %v689_v24 = vpack.c.bf16 %v5759_v58, %v5759_v58 }
  0x81   :  { %586 = vperm.xlu0 %3368, %v3804_v29   ;;  %641 = vperm.xlu1 %3369, %v3878_v49   ;;  %v3222_v29 = vld [vmem:[#allocation2 + $0x20] sm:$0xff]  ;;  %v3223_v49 = vld [vmem:[#allocation2 + $0x28] sm:$0xff] }
  0x82   :  { %527 = vmatpush.bf16.msra.mxu0 %v444_v3  ;;  %v769_v42 = vunpack.c.l.b16 %v689_v24 }
  0x83   :  { %3288 = vmatpush.bf16.msra.mxu2 %v444_v3  ;;  %646 = vperm.xlu2 %3370, %v3883_v50   ;;  %v3224_v50 = vld [vmem:[#allocation2 + $0x38] sm:$0xff]  ;;  %v3225_v3 = vld [vmem:[#allocation4] sm:$0xff] }
  0x84   :  { %931 = vmatpush.bf16.msra.mxu1 %v3226_v47  ;;  %3295 = vmatpush.bf16.msra.mxu3 %v3226_v47  ;;  %v781_v26 = vpack.c.b16 %v770_v56, %v769_v42 }
  0x85   :  { %528 = vmatmul.bf16.vlgmr.msra.gmra.mxu0 %v3217_v22 }
  0x86   :  { %548 = vmatmul.bf16.vlgmr.msra.gmra.mxu2 %v3221_v38 }
  0x87   :  { %974 = vmatpush.bf16.msrb.mxu2 %v3240_v27  ;;  %v5761_v27 = vld [vmem:[#allocation22_spill] sm:$0xff] }
  0x88   :  { %932 = vmatpush.bf16.msra.mxu1 %v3225_v3  ;;  %3296 = vmatpush.bf16.msra.mxu3 %v3225_v3 }
  0x89   :  { %591 = vperm.xlu0 %3368, %v3815_v32   ;;  %596 = vperm.xlu1 %3369, %v3820_v33   ;;  %v3235_v32 = vld [vmem:[#allocation4 + $0x50] sm:$0xff]  ;;  %v3234_v33 = vld [vmem:[#allocation4 + $0x48] sm:$0xff] }
  0x8b   :  { %601 = vperm.xlu2 %3370, %v3825_v34   ;;  %975 = vmatpush.bf16.msrb.mxu2 %v3239_v39  ;;  %v3233_v34 = vld [vmem:[#allocation4 + $0x40] sm:$0xff]  ;;  %v5762_v39 = vld [vmem:[#allocation23_spill] sm:$0xff] }
  0x8f   :  { %976 = vmatpush.bf16.msrb.mxu2 %v3238_v43  ;;  %v692_v43 = vpack.c.bf16 %v5762_v39, %v5762_v39 }
  0x91   :  { %606 = vperm.xlu0 %3368, %v3836_v37   ;;  %v3220_v37 = vld [vmem:[#allocation2 + $0x10] sm:$0xff] }
  0x93   :  { %977 = vmatpush.bf16.msrb.mxu2 %v3237_v44 }
  0x95   :  { %533 = vmatmul.bf16.gmra.mxu0 %v3218_v28  ;;  %v691_v28 = vpack.c.bf16 %v5761_v27, %v5761_v27  ;;  %v5769_v27 = vld [vmem:[#allocation27_spill] sm:$0xff] }
  0x96   :  { %553 = vmatmul.bf16.gmra.mxu2 %v3222_v29 }
  0x97   :  { %978 = vmatpush.bf16.msrb.mxu2 %v3236_v45 }
  0x9b   :  { %979 = vmatpush.bf16.msrb.mxu2 %v3235_v32  ;;  %v771_v32 = vunpack.c.l.b16 %v691_v28  ;;  %v696_v28 = vpack.c.bf16 %v5769_v27, %v5769_v27  ;;  %v3252_v27 = vld [vmem:[#allocation4 + $0xd8] sm:$0xff] }
  0x9f   :  { %980 = vmatpush.bf16.msrb.mxu2 %v3234_v33 }
  0xa3   :  { %981 = vmatpush.bf16.msrb.mxu2 %v3233_v34 }
  0xa5   :  { %538 = vmatmul.bf16.gmra.mxu0 %v3219_v48 }
  0xa6   :  { %558 = vmatmul.bf16.gmra.mxu2 %v3223_v49 }
  0xb5   :  { %543 = vmatmul.bf16.gmra.mxu0 %v3220_v37 }
  0xb6   :  { %563 = vmatmul.bf16.gmra.mxu2 %v3224_v50  ;;  %v772_v50 = vunpack.c.l.b16 %v692_v43 }
  0xc5   :  { %v4396_v14 = vpop.permute.xlu2 %571 }
  0xc6   :  { %982 = vmatmul.bf16.vlgmr.msrb.gmra.mxu2 %v777_v10  ;;  %v782_v10 = vpack.c.b16 %v772_v50, %v771_v32 }
  0xcd   :  { %v4407_v44 = vpop.permute.xlu2 %576 }
  0xd5   :  { %v4416_v40 = vpop.permute.xlu2 %581 }
  0xd6   :  { %987 = vmatmul.bf16.gmra.mxu2 %v778_v2 }
  0xdb   :  { %v4394_v6 = vpop.permute.xlu0 %611  ;;  %v4398_v15 = vpop.permute.xlu1 %621 }
  0xe3   :  { %v4401_v22 = vpop.permute.xlu0 %616  ;;  %v4410_v49 = vpop.permute.xlu1 %626 }
  0xe6   :  { %992 = vmatmul.bf16.gmra.mxu2 %v779_v30  ;;  %v773_v30 = vunpack.c.l.b16 %v693_v21 }
  0xeb   :  { %v4413_v35 = vpop.permute.xlu0 %631  ;;  %v4419_v11 = vpop.permute.xlu1 %636 }
  0xec   :  { %5763 = vst [vmem:[#allocation12_spill] sm:$0xff] %v4413_v35 }
  0xed   :  { %5764 = vst [vmem:[#allocation13_spill] sm:$0xff] %v4419_v11 }
  0xf3   :  { %v4425_v62 = vpop.permute.xlu0 %586  ;;  %v4429_v4 = vpop.permute.xlu1 %641 }
  0xf4   :  { %5767 = vst [vmem:[#allocation14_spill] sm:$0xff] %v4429_v4 }
  0xf6   :  { %997 = vmatmul.bf16.gmra.mxu2 %v780_v51  ;;  %v783_v51 = vpack.c.b16 %v774_v19, %v773_v30 }
  0xfb   :  { %v4432_v42 = vpop.permute.xlu0 %591 }
 0x102   :  { %v529_v25 = vpop.f32.mrf.mxu0 }
 0x103   :  { %v649_v9 = vmul.f32 %v4396_v14, %v529_v25  ;;  %v4449_v21 = vpop.permute.xlu0 %606 }
 0x105   :  { %v665_v29 = vpack.c.bf16 %v649_v9, %v649_v9  ;;  %v5768_v9 = vld [vmem:[#allocation26_spill] sm:$0xff] }
 0x106   :  { %1002 = vmatmul.bf16.gmra.mxu2 %v781_v26 }
 0x107   :  { %v713_v33 = vunpack.c.l.b16 %v665_v29  ;;  %v4439_v29 = vpop.permute.xlu1 %596 }
 0x109   :  { %v549_v38 = vpop.f32.mrf.mxu2 }
 0x10a   :  { %v531_v45 = vpop.f32.mrf.mxu0  ;;  %v657_v34 = vmul.f32 %v4394_v6, %v549_v38  ;;  %v695_v38 = vpack.c.bf16 %v5768_v9, %v5768_v9  ;;  %v3253_v9 = vld [vmem:[#allocation4 + $0xe0] sm:$0xff] }
 0x10b   :  { %v650_v48 = vmul.f32 %v4407_v44, %v531_v45 }
 0x10c   :  { %v673_v1 = vpack.c.bf16 %v657_v34, %v657_v34  ;;  %v775_v34 = vunpack.c.l.b16 %v695_v38 }
 0x10d   :  { %v666_v37 = vpack.c.bf16 %v650_v48, %v650_v48  ;;  %v4442_v48 = vpop.permute.xlu2 %646 }
 0x10e   :  { %v721_v31 = vunpack.c.l.b16 %v673_v1  ;;  %5770 = vst [vmem:[#allocation15_spill] sm:$0xff] %v4442_v48 }
 0x10f   :  { %v714_v52 = vunpack.c.l.b16 %v666_v37  ;;  %v776_v37 = vunpack.c.l.b16 %v696_v28  ;;  %v3251_v28 = vld [vmem:[#allocation4 + $0xd0] sm:$0xff] }
 0x111   :  { %v551_v57 = vpop.f32.mrf.mxu2  ;;  %v729_v13 = vpack.c.b16 %v714_v52, %v713_v33 }
 0x112   :  { %v658_v41 = vmul.f32 %v4401_v22, %v551_v57  ;;  %v534_v23 = vpop.f32.mrf.mxu0 }
 0x113   :  { %933 = vmatmul.bf16.vlgmr.msra.gmra.mxu1 %v729_v13  ;;  %v651_v36 = vmul.f32 %v4416_v40, %v534_v23 }
 0x114   :  { %v674_v61 = vpack.c.bf16 %v658_v41, %v658_v41 }
 0x115   :  { %v667_v46 = vpack.c.bf16 %v651_v36, %v651_v36  ;;  %v4446_v36 = vpop.permute.xlu2 %601 }
 0x116   :  { %v722_v17 = vunpack.c.l.b16 %v674_v61  ;;  %1007 = vmatmul.bf16.gmra.mxu2 %v782_v10  ;;  %v784_v10 = vpack.c.b16 %v776_v37, %v775_v34 }
 0x117   :  { %v715_v8 = vunpack.c.l.b16 %v667_v46 }
 0x118   :  { %v733_v2 = vpack.c.b16 %v722_v17, %v721_v31 }
 0x119   :  { %v554_v5 = vpop.f32.mrf.mxu2 }
 0x11a   :  { %953 = vmatmul.bf16.vlgmr.msra.gmra.mxu3 %v733_v2  ;;  %v536_v0 = vpop.f32.mrf.mxu0  ;;  %v659_v53 = vmul.f32 %v4398_v15, %v554_v5 }
 0x11b   :  { %v652_v16 = vmul.f32 %v4425_v62, %v536_v0 }
 0x11c   :  { %v675_v59 = vpack.c.bf16 %v659_v53, %v659_v53 }
 0x11d   :  { %v668_v20 = vpack.c.bf16 %v652_v16, %v652_v16 }
 0x11e   :  { %v723_v55 = vunpack.c.l.b16 %v675_v59 }
 0x11f   :  { %v716_v12 = vunpack.c.l.b16 %v668_v20 }
 0x121   :  { %v556_v47 = vpop.f32.mrf.mxu2  ;;  %v730_v3 = vpack.c.b16 %v716_v12, %v715_v8 }
 0x122   :  { %v660_v18 = vmul.f32 %v4410_v49, %v556_v47  ;;  %v539_v58 = vpop.f32.mrf.mxu0 }
 0x123   :  { %938 = vmatmul.bf16.gmra.mxu1 %v730_v3  ;;  %v653_v56 = vmul.f32 %v4432_v42, %v539_v58 }
 0x124   :  { %v676_v24 = vpack.c.bf16 %v660_v18, %v660_v18 }
 0x125   :  { %v669_v43 = vpack.c.bf16 %v653_v56, %v653_v56  ;;  %v3254_v56 = vld [vmem:[#allocation4 + $0xe8] sm:$0xff] }
 0x126   :  { %v724_v63 = vunpack.c.l.b16 %v676_v24  ;;  %1012 = vmatmul.bf16.gmra.mxu2 %v783_v51  ;;  %v3256_v24 = vld [vmem:[#allocation4 + $0xf8] sm:$0xff] }
 0x127   :  { %v717_v50 = vunpack.c.l.b16 %v669_v43  ;;  %1743 = vmatpush.bf16.msrb.mxu1 %v3256_v24 }
 0x128   :  { %v734_v26 = vpack.c.b16 %v724_v63, %v723_v55  ;;  %v3255_v63 = vld [vmem:[#allocation4 + $0xf0] sm:$0xff] }
 0x129   :  { %v559_v25 = vpop.f32.mrf.mxu2 }
 0x12a   :  { %958 = vmatmul.bf16.gmra.mxu3 %v734_v26  ;;  %v541_v39 = vpop.f32.mrf.mxu0  ;;  %v661_v32 = vmul.f32 %v4413_v35, %v559_v25 }
 0x12b   :  { %v654_v45 = vmul.f32 %v4439_v29, %v541_v39  ;;  %1744 = vmatpush.bf16.msrb.mxu1 %v3255_v63  ;;  %v3250_v39 = vld [vmem:[#allocation4 + $0xc8] sm:$0xff] }
 0x12c   :  { %v677_v1 = vpack.c.bf16 %v661_v32, %v661_v32 }
 0x12d   :  { %v670_v33 = vpack.c.bf16 %v654_v45, %v654_v45  ;;  %v3249_v45 = vld [vmem:[#allocation4 + $0xc0] sm:$0xff] }
 0x12e   :  { %v725_v31 = vunpack.c.l.b16 %v677_v1 }
 0x12f   :  { %v718_v52 = vunpack.c.l.b16 %v670_v33  ;;  %1745 = vmatpush.bf16.msrb.mxu1 %v3254_v56  ;;  %v4465_v33 = vld [vmem:[%s5640_s4] ss:$0 sm:$0xff] }
 0x131   :  { %v561_v57 = vpop.f32.mrf.mxu2  ;;  %v731_v13 = vpack.c.b16 %v718_v52, %v717_v50 }
 0x132   :  { %v662_v41 = vmul.f32 %v4419_v11, %v561_v57  ;;  %v544_v23 = vpop.f32.mrf.mxu0 }
 0x133   :  { %943 = vmatmul.bf16.gmra.mxu1 %v731_v13  ;;  %v655_v2 = vmul.f32 %v4446_v36, %v544_v23 }
 0x134   :  { %v678_v61 = vpack.c.bf16 %v662_v41, %v662_v41  ;;  %1746 = vmatpush.bf16.msrb.mxu1 %v3253_v9 }
 0x135   :  { %v671_v60 = vpack.c.bf16 %v655_v2, %v655_v2 }
 0x136   :  { %v726_v17 = vunpack.c.l.b16 %v678_v61  ;;  %1017 = vmatmul.bf16.gmra.mxu2 %v784_v10 }
 0x137   :  { %v719_v30 = vunpack.c.l.b16 %v671_v60 }
 0x138   :  { %v735_v5 = vpack.c.b16 %v726_v17, %v725_v31  ;;  %1747 = vmatpush.bf16.msrb.mxu1 %v3252_v27 }
 0x139   :  { %v564_v7 = vpop.f32.mrf.mxu2 }
 0x13a   :  { %963 = vmatmul.bf16.gmra.mxu3 %v735_v5  ;;  %v546_v46 = vpop.f32.mrf.mxu0  ;;  %v663_v0 = vmul.f32 %v4429_v4, %v564_v7 }
 0x13b   :  { %v656_v54 = vmul.f32 %v4449_v21, %v546_v46 }
 0x13c   :  { %v679_v20 = vpack.c.bf16 %v663_v0, %v663_v0  ;;  %1748 = vmatpush.bf16.msrb.mxu1 %v3251_v28 }
 0x13d   :  { %v672_v16 = vpack.c.bf16 %v656_v54, %v656_v54 }
 0x13e   :  { %v727_v59 = vunpack.c.l.b16 %v679_v20 }
 0x13f   :  { %v720_v8 = vunpack.c.l.b16 %v672_v16 }
 0x140   :  { %1749 = vmatpush.bf16.msrb.mxu1 %v3250_v39 }
 0x141   :  { %v566_v53 = vpop.f32.mrf.mxu2  ;;  %v732_v12 = vpack.c.b16 %v720_v8, %v719_v30 }
 0x142   :  { %v664_v19 = vmul.f32 %v4442_v48, %v566_v53 }
 0x143   :  { %948 = vmatmul.bf16.gmra.mxu1 %v732_v12 }
 0x144   :  { %v680_v47 = vpack.c.bf16 %v664_v19, %v664_v19  ;;  %1750 = vmatpush.bf16.msrb.mxu1 %v3249_v45 }
 0x146   :  { %v728_v18 = vunpack.c.l.b16 %v680_v47 }
 0x148   :  { %v736_v3 = vpack.c.b16 %v728_v18, %v727_v59 }
 0x149   :  { %v983_v51 = vpop.f32.mrf.mxu2 }
 0x14a   :  { %968 = vmatmul.bf16.gmra.mxu3 %v736_v3 }
 0x151   :  { %v985_v58 = vpop.f32.mrf.mxu2 }
 0x159   :  { %v988_v55 = vpop.f32.mrf.mxu2 }
 0x161   :  { %v990_v26 = vpop.f32.mrf.mxu2 }
 0x169   :  { %v4454_v25 = vpop.f32.mrf.mxu2 }
 0x171   :  { %v4456_v38 = vpop.f32.mrf.mxu2 }
 0x179   :  { %v4458_v43 = vpop.f32.mrf.mxu2 }
 0x181   :  { %v4460_v32 = vpop.f32.mrf.mxu2 }
 0x189   :  { %v1003_v37 = vpop.f32.mrf.mxu2 }
 0x190   :  { %v934_v34 = vpop.f32.mrf.mxu1 }
 0x191   :  { %v935_v50 = vadd.f32 %v4465_v33, %v934_v34  ;;  %v1005_v41 = vpop.f32.mrf.mxu2 }
 0x193   :  { %v984_v52 = vadd.f32 %v983_v51, %v935_v50 }
 0x195   :  { %v1448_v13 = vpack.c.bf16 %v984_v52, %v984_v52  ;;  %v3022_v59 = vmul.f32 -1.442695, %v984_v52 }
 0x197   :  { %v1528_v17 = vunpack.c.l.b16 %v1448_v13 }
 0x198   :  { %v936_v57 = vpop.f32.mrf.mxu1 }
 0x199   :  { %v937_v1 = vadd.f32 %v4465_v33, %v936_v57  ;;  %v1008_v16 = vpop.f32.mrf.mxu2 }
 0x19b   :  { %v986_v10 = vadd.f32 %v985_v58, %v937_v1 }
 0x19d   :  { %v954_v23 = vpop.f32.mrf.mxu3  ;;  %v1449_v61 = vpack.c.bf16 %v986_v10, %v986_v10  ;;  %v3023_v56 = vmul.f32 -1.442695, %v986_v10 }
 0x19e   :  { %v955_v31 = vadd.f32 %v4465_v33, %v954_v23 }
 0x19f   :  { %v1529_v5 = vunpack.c.l.b16 %v1449_v61 }
 0x1a0   :  { %v4470_v2 = vadd.f32 %v1003_v37, %v955_v31  ;;  %v939_v7 = vpop.f32.mrf.mxu1 }
 0x1a1   :  { %v1544_v60 = vpack.c.b16 %v1529_v5, %v1528_v17  ;;  %v940_v54 = vadd.f32 %v4465_v33, %v939_v7  ;;  %v1010_v9 = vpop.f32.mrf.mxu2 }
 0x1a2   :  { %v3030_v46 = vmul.f32 -1.442695, %v4470_v2 }
 0x1a3   :  { %1751 = vmatmul.bf16.vlgmr.msrb.gmra.mxu1 %v1544_v60  ;;  %v989_v8 = vadd.f32 %v988_v55, %v940_v54 }
 0x1a4   :  { %3375 = vpow2.f32 %v3030_v46 }
 0x1a5   :  { %v956_v0 = vpop.f32.mrf.mxu3  ;;  %v1450_v3 = vpack.c.bf16 %v989_v8, %v989_v8  ;;  %v3024_v57 = vmul.f32 -1.442695, %v989_v8 }
 0x1a6   :  { %v957_v30 = vadd.f32 %v4465_v33, %v956_v0 }
 0x1a7   :  { %v1530_v27 = vunpack.c.l.b16 %v1450_v3 }
 0x1a8   :  { %v941_v53 = vpop.f32.mrf.mxu1  ;;  %v1006_v19 = vadd.f32 %v1005_v41, %v957_v30  ;;  %v1456_v30 = vpack.c.bf16 %v4470_v2, %v4470_v2 }
 0x1a9   :  { %v942_v12 = vadd.f32 %v4465_v33, %v941_v53  ;;  %v1013_v5 = vpop.f32.mrf.mxu2 }
 0x1aa   :  { %v3376_v20 = vpop.eup %3375  ;;  %v3031_v58 = vmul.f32 -1.442695, %v1006_v19  ;;  %v1457_v0 = vpack.c.bf16 %v1006_v19, %v1006_v19 }
 0x1ab   :  { %v4476_v47 = vadd.f32 1.0, %v3376_v20  ;;  %v991_v18 = vadd.f32 %v990_v26, %v942_v12 }
 0x1ac   :  { %v4508_v3 = vunpack.c.l.b16 %v1457_v0 }
 0x1ad   :  { %v959_v51 = vpop.f32.mrf.mxu3  ;;  %v1451_v63 = vpack.c.bf16 %v991_v18, %v991_v18  ;;  %3377 = vrcp.f32 %v4476_v47  ;;  %v3025_v41 = vmul.f32 -1.442695, %v991_v18  ;;  %vm1212_vm15 = vweird.f32 %v4476_v47 }
 0x1ae   :  { %v960_v24 = vadd.f32 %v4465_v33, %v959_v51  ;;  %3379 = vpow2.f32 %v3022_v59  ;;  %v4511_v51 = vunpack.c.l.b16 %v1456_v30 }
 0x1af   :  { %v1531_v28 = vunpack.c.l.b16 %v1451_v63  ;;  %3381 = vpow2.f32 %v3031_v58 }
 0x1b0   :  { %v4480_v55 = vadd.f32 %v1008_v16, %v960_v24  ;;  %v944_v39 = vpop.f32.mrf.mxu1  ;;  %3383 = vpow2.f32 %v3023_v56 }
 0x1b1   :  { %v1545_v26 = vpack.c.b16 %v1531_v28, %v1530_v27  ;;  %v945_v34 = vadd.f32 %v4465_v33, %v944_v39  ;;  %v1216_v28 = vand.u32 2147483647, %v4476_v47  ;;  %v1218_v39 = vand.u32 2147483648, %v4476_v47 }
 0x1b2   :  { %v3032_v45 = vmul.f32 -1.442695, %v4480_v55 }
 0x1b3   :  { %1756 = vmatmul.bf16.gmra.mxu1 %v1545_v26  ;;  %v4484_v37 = vpop.eup %3377  ;;  %v994_v10 = vadd.f32 %v4454_v25, %v945_v34  ;;  %vm4550_vm4 = vcmp.eq.f32.partialorder %v1216_v28, 8.507059e+37 }
 0x1b4   :  { %3385 = vpow2.f32 %v3032_v45  ;;  %v3380_v52 = vpop.eup %3379  ;;  %v1208_v61 = vmul.f32 %v4484_v37, %v4476_v47  ;;  %vm1213_vm11 = vweird.f32 %v4484_v37 }
 0x1b5   :  { %v961_v50 = vpop.f32.mrf.mxu3  ;;  %v3382_v13 = vpop.eup %3381  ;;  %v4492_v17 = vadd.f32 1.0, %v3380_v52  ;;  %3387 = vpow2.f32 %v3024_v57  ;;  %v1452_v53 = vpack.c.bf16 %v994_v10, %v994_v10  ;;  %v3026_v2 = vmul.f32 -1.442695, %v994_v10  ;;  %vm4564_vm14 = vmor %vm1212_vm15, %vm1213_vm11 }
 0x1b6   :  { %v962_v1 = vadd.f32 %v4465_v33, %v961_v50  ;;  %v3384_v31 = vpop.eup %3383  ;;  %v4496_v16 = vadd.f32 1.0, %v3382_v13  ;;  %3389 = vpow2.f32 %v3025_v41  ;;  %v1209_v20 = vsub.f32 1.0, %v1208_v61  ;;  %v1015_v13 = vpop.f32.mrf.mxu2 }
 0x1b7   :  { %v4503_v12 = vadd.f32 1.0, %v3384_v31  ;;  %v1532_v24 = vunpack.c.l.b16 %v1452_v53  ;;  %v1458_v10 = vpack.c.bf16 %v4480_v55, %v4480_v55 }
 0x1b8   :  { %v4488_v23 = vadd.f32 %v1010_v9, %v962_v1  ;;  %v946_v7 = vpop.f32.mrf.mxu1  ;;  %v1210_v56 = vmul.f32 %v4484_v37, %v1209_v20  ;;  %v1233_v53 = vand.u32 2147483648, %v4496_v16  ;;  %vm1227_vm7 = vweird.f32 %v4496_v16 }
 0x1b9   :  { %v947_v54 = vadd.f32 %v4465_v33, %v946_v7 }
 0x1ba   :  { %v3386_v46 = vpop.eup %3385  ;;  %v3033_v60 = vmul.f32 -1.442695, %v4488_v23  ;;  %v1459_v55 = vpack.c.bf16 %v4488_v23, %v4488_v23 }
 0x1bb   :  { %v4498_v25 = vadd.f32 1.0, %v3386_v46  ;;  %v996_v8 = vadd.f32 %v4456_v38, %v947_v54  ;;  %v3388_v38 = vpop.eup %3387 }
 0x1bc   :  { %3391 = vpow2.f32 %v3033_v60  ;;  %v3390_v9 = vpop.eup %3389  ;;  %v4526_v1 = vadd.f32 1.0, %v3388_v38 }
 0x1bd   :  { %3393 = vrcp.f32 %v4498_v25  ;;  %v964_v59 = vpop.f32.mrf.mxu3  ;;  %v1453_v18 = vpack.c.bf16 %v996_v8, %v996_v8  ;;  %v4541_v46 = vadd.f32 1.0, %v3390_v9  ;;  %vm1242_vm13 = vweird.f32 %v4498_v25 }
 0x1be   :  { %3395 = vrcp.f32 %v4492_v17  ;;  %v965_v19 = vadd.f32 %v4465_v33, %v964_v59  ;;  %v3027_v59 = vmul.f32 -1.442695, %v996_v8  ;;  %v1231_v8 = vand.u32 2147483647, %v4496_v16 }
 0x1bf   :  { %3397 = vrcp.f32 %v4496_v16  ;;  %v1533_v63 = vunpack.c.l.b16 %v1453_v18  ;;  %v1219_v18 = vor.u32 1.1754944e-38, %v1218_v39 }
 0x1c0   :  { %v4513_v58 = vadd.f32 %v1013_v5, %v965_v19  ;;  %3399 = vrcp.f32 %v4503_v12  ;;  %v949_v27 = vpop.f32.mrf.mxu1  ;;  %v1211_v5 = vadd.f32 %v4484_v37, %v1210_v56  ;;  %v4558_v19 = vunpack.c.l.b16 %v1458_v10 }
 0x1c1   :  { %v950_v34 = vadd.f32 %v4465_v33, %v949_v27  ;;  %v1546_v50 = vpack.c.b16 %v1533_v63, %v1532_v24  ;;  %3401 = vpow2.f32 %v3026_v2  ;;  %v4575_v56 = vunpack.c.l.b16 %v1459_v55 }
 0x1c2   :  { %v3392_v45 = vpop.eup %3391  ;;  %v3034_v26 = vmul.f32 -1.442695, %v4513_v58  ;;  %v1215_v38 = vsel %vm4564_vm14, %v4484_v37, %v1211_v5  ;;  %v4582_v37 = vor.u32 1.1754944e-38, %v1233_v53  ;;  %vm4647_vm12 = vcmp.eq.f32.partialorder %v1231_v8, 8.507059e+37 }
 0x1c3   :  { %v4524_v57 = vpop.eup %3393  ;;  %v4528_v41 = vadd.f32 1.0, %v3392_v45  ;;  %v4535_v31 = vadd.f32 %v4458_v43, %v950_v34  ;;  %1761 = vmatmul.bf16.gmra.mxu1 %v1546_v50  ;;  %v1246_v45 = vand.u32 2147483647, %v4498_v25  ;;  %v1248_v50 = vand.u32 2147483648, %v4498_v25 }
 0x1c4   :  { %v4532_v61 = vpop.eup %3395  ;;  %3403 = vpow2.f32 %v3034_v26  ;;  %v1238_v54 = vmul.f32 %v4524_v57, %v4498_v25  ;;  %vm1243_vm1 = vweird.f32 %v4524_v57 }
 0x1c5   :  { %v4539_v7 = vpop.eup %3397  ;;  %3405 = vrcp.f32 %v4528_v41  ;;  %v966_v60 = vpop.f32.mrf.mxu3  ;;  %v3028_v43 = vmul.f32 -1.442695, %v4535_v31  ;;  %v1454_v5 = vpack.c.bf16 %v4535_v31, %v4535_v31  ;;  %vm4613_vm5 = vcmp.eq.f32.partialorder %v1246_v45, 8.507059e+37  ;;  %vm4640_vm3 = vmor %vm1242_vm13, %vm1243_vm1 }
 0x1c6   :  { %v967_v0 = vadd.f32 %v4465_v33, %v966_v60  ;;  %v4555_v20 = vpop.eup %3399  ;;  %3407 = vrcp.f32 %v4526_v1  ;;  %v1239_v47 = vsub.f32 1.0, %v1238_v54  ;;  %v1223_v9 = vmul.f32 %v4539_v7, %v4496_v16  ;;  %v1018_v54 = vpop.f32.mrf.mxu2 }
 0x1c7   :  { %3409 = vpow2.f32 %v3028_v43  ;;  %v3402_v24 = vpop.eup %3401  ;;  %vm1228_vm8 = vweird.f32 %v4539_v7  ;;  %vm1257_vm9 = vweird.f32 %v4528_v41 }
 0x1c8   :  { %v4568_v2 = vadd.f32 %v1015_v13, %v967_v0  ;;  %3411 = vrcp.f32 %v4541_v46  ;;  %v951_v63 = vpop.f32.mrf.mxu1  ;;  %v1220_v13 = vsel %vm4550_vm4, %v1219_v18, %v1215_v38  ;;  %v1240_v30 = vmul.f32 %v4524_v57, %v1239_v47  ;;  %vm4682_vm10 = vmor %vm1227_vm7, %vm1228_vm8 }
 0x1c9   :  { %v952_v39 = vadd.f32 %v4465_v33, %v951_v63  ;;  %3413 = vpow2.f32 %v3027_v59  ;;  %v1224_v53 = vsub.f32 1.0, %v1223_v9  ;;  %v1534_v47 = vunpack.c.l.b16 %v1454_v5 }
 0x1ca   :  { %v3404_v27 = vpop.eup %3403  ;;  %v3035_v28 = vmul.f32 -1.442695, %v4568_v2 }
 0x1cb   :  { %v4584_v26 = vpop.eup %3405  ;;  %v4586_v34 = vadd.f32 1.0, %v3404_v27  ;;  %v1001_v10 = vadd.f32 %v4460_v32, %v952_v39  ;;  %v4603_v32 = vadd.f32 1.0, %v3402_v24  ;;  %v1249_v27 = vor.u32 1.1754944e-38, %v1248_v50 }
 0x1cc   :  { %3415 = vpow2.f32 %v3035_v28  ;;  %v1253_v60 = vmul.f32 %v4584_v26, %v4528_v41  ;;  %v4597_v55 = vpop.eup %3407  ;;  %v1335_v39 = vmax.f32 %v1220_v13, 1e-06  ;;  %v1225_v50 = vmul.f32 %v4539_v7, %v1224_v53 }
 0x1cd   :  { %3417 = vrcp.f32 %v4586_v34  ;;  %v969_v43 = vpop.f32.mrf.mxu3  ;;  %v3410_v59 = vpop.eup %3409  ;;  %v3029_v23 = vmul.f32 -1.442695, %v1001_v10  ;;  %v1455_v18 = vpack.c.bf16 %v1001_v10, %v1001_v10  ;;  %v1241_v10 = vadd.f32 %v4524_v57, %v1240_v30 }
 0x1ce   :  { %v970_v31 = vadd.f32 %v4465_v33, %v969_v43  ;;  %v4606_v38 = vpop.eup %3411  ;;  %v4608_v63 = vadd.f32 1.0, %v3410_v59  ;;  %v1254_v28 = vsub.f32 1.0, %v1253_v60  ;;  %v1460_v30 = vpack.c.bf16 %v4513_v58, %v4513_v58  ;;  %v1020_v4 = vpop.f32.mrf.mxu2 }
 0x1cf   :  { %3419 = vpow2.f32 %v3029_v23  ;;  %v1535_v9 = vunpack.c.l.b16 %v1455_v18  ;;  %v3414_v43 = vpop.eup %3413  ;;  %v1261_v23 = vand.u32 2147483647, %v4528_v41  ;;  %v1226_v25 = vadd.f32 %v4539_v7, %v1225_v50 }
 0x1d0   :  { %v4611_v0 = vadd.f32 %v1018_v54, %v970_v31  ;;  %3421 = vrcp.f32 %v4608_v63  ;;  %v1255_v45 = vmul.f32 %v4584_v26, %v1254_v28  ;;  %v4632_v53 = vadd.f32 1.0, %v3414_v43 }
 0x1d1   :  { %3423 = vrcp.f32 %v4603_v32  ;;  %v1547_v5 = vpack.c.b16 %v1535_v9, %v1534_v47  ;;  %v1263_v28 = vand.u32 2147483648, %v4528_v41  ;;  %v1245_v9 = vsel %vm4640_vm3, %v4524_v57, %v1241_v10 }
 0x1d2   :  { %v3416_v60 = vpop.eup %3415  ;;  %v3036_v13 = vmul.f32 -1.442695, %v4611_v0  ;;  %v4656_v43 = vmin.f32 %v1335_v39, 0.999999  ;;  %v1256_v8 = vadd.f32 %v4584_v26, %v1255_v45  ;;  %vm1258_vm6 = vweird.f32 %v4584_v26 }
 0x1d3   :  { %v4624_v54 = vpop.eup %3417  ;;  %v4626_v59 = vadd.f32 1.0, %v3416_v60  ;;  %1766 = vmatmul.bf16.gmra.mxu1 %v1547_v5  ;;  %vm4666_vm0 = vcmp.eq.f32.partialorder %v1261_v23, 8.507059e+37  ;;  %v1264_v50 = vor.u32 1.1754944e-38, %v1263_v28  ;;  %v1461_v45 = vpack.c.bf16 %v4568_v2, %v4568_v2  ;;  %vm4691_vm2 = vmor %vm1257_vm9, %vm1258_vm6 }
 0x1d4   :  { %3425 = vpow2.f32 %v3036_v13  ;;  %v1268_v31 = vmul.f32 %v4624_v54, %v4586_v34  ;;  %v1250_v23 = vsel %vm4613_vm5, %v1249_v27, %v1245_v9  ;;  %v4695_v2 = vunpack.c.l.b16 %v1460_v30 }
 0x1d5   :  { %3427 = vrcp.f32 %v4626_v59  ;;  %v971_v47 = vpop.f32.mrf.mxu3  ;;  %v3420_v60 = vpop.eup %3419  ;;  %v1230_v16 = vsel %vm4682_vm10, %v4539_v7, %v1226_v25  ;;  %v1260_v27 = vsel %vm4691_vm2, %v4584_v26, %v1256_v8  ;;  %v1276_v9 = vand.u32 2147483647, %v4586_v34 }
 0x1d6   :  { %v972_v13 = vadd.f32 %v4465_v33, %v971_v47  ;;  %v1269_v5 = vsub.f32 1.0, %v1268_v31  ;;  %v4661_v52 = vpop.eup %3421  ;;  %v4663_v48 = vadd.f32 1.0, %v3420_v60  ;;  %3429 = vrcp.f32 %v4632_v53 }
 0x1d7   :  { %v4671_v10 = vpop.eup %3423  ;;  %v1178_v24 = vmul.f32 %v4661_v52, %v4608_v63  ;;  %v1278_v7 = vand.u32 2147483648, %v4586_v34  ;;  %v1337_v26 = vmax.f32 %v1250_v23, 1e-06  ;;  %vm1273_vm15 = vweird.f32 %v4624_v54 }
 0x1d8   :  { %v4674_v33 = vadd.f32 %v1020_v4, %v972_v13  ;;  %3431 = vrcp.f32 %v4663_v48  ;;  %v1270_v28 = vmul.f32 %v4624_v54, %v1269_v5  ;;  %v4715_v25 = vmul.f32 %v4671_v10, %v4603_v32 }
 0x1d9   :  { %v4719_v13 = vunpack.c.l.b16 %v1461_v45  ;;  %v1265_v5 = vsel %vm4666_vm0, %v1264_v50, %v1260_v27  ;;  %v1235_v8 = vsel %vm4647_vm12, %v4582_v37, %v1230_v16  ;;  %v1291_v23 = vand.u32 2147483647, %v4626_v59 }
 0x1da   :  { %v3426_v31 = vpop.eup %3425  ;;  %v3037_v18 = vmul.f32 -1.442695, %v4674_v33  ;;  %v1271_v4 = vadd.f32 %v4624_v54, %v1270_v28  ;;  %v1179_v45 = vsub.f32 1.0, %v1178_v24  ;;  %vm1272_vm11 = vweird.f32 %v4586_v34 }
 0x1db   :  { %v4707_v47 = vpop.eup %3427  ;;  %v4709_v30 = vadd.f32 1.0, %v3426_v31  ;;  %vm4735_vm4 = vcmp.eq.f32.partialorder %v1276_v9, 8.507059e+37  ;;  %v1279_v57 = vor.u32 1.1754944e-38, %v1278_v7  ;;  %v1293_v50 = vand.u32 2147483648, %v4626_v59  ;;  %vm4747_vm13 = vmor %vm1272_vm11, %vm1273_vm15 }
 0x1dc   :  { %3433 = vpow2.f32 %v3037_v18  ;;  %v1283_v60 = vmul.f32 %v4707_v47, %v4626_v59  ;;  %v4728_v41 = vpop.eup %3429  ;;  %v1338_v16 = vmax.f32 %v1265_v5, 1e-06  ;;  %vm1182_vm14 = vweird.f32 %v4608_v63 }
 0x1dd   :  { %3435 = vrcp.f32 %v4709_v30  ;;  %vm1287_vm7 = vweird.f32 %v4626_v59  ;;  %v4752_v27 = vmin.f32 %v1337_v26, 0.999999  ;;  %v1336_v9 = vmax.f32 %v1235_v8, 1e-06 }
 0x1de   :  { %v1284_v31 = vsub.f32 1.0, %v1283_v60  ;;  %v4732_v18 = vpop.eup %3431  ;;  %v1275_v60 = vsel %vm4747_vm13, %v4624_v54, %v1271_v4  ;;  %vm4759_vm5 = vcmp.eq.f32.partialorder %v1291_v23, 8.507059e+37  ;;  %v1186_v58 = vand.u32 2147483647, %v4608_v63 }
 0x1df   :  { %v1193_v28 = vmul.f32 %v4732_v18, %v4663_v48  ;;  %vm1288_vm1 = vweird.f32 %v4707_v47  ;;  %v5793_v54 = vpack.c.b16 %v4508_v3, %v4511_v51  ;;  %v1306_v23 = vand.u32 2147483647, %v4709_v30 }
 0x1e0   :  { %v1285_v37 = vmul.f32 %v4707_v47, %v1284_v31  ;;  %v1180_v31 = vmul.f32 %v4661_v52, %v1179_v45  ;;  %v1294_v45 = vor.u32 1.1754944e-38, %v1293_v50  ;;  %v4777_v34 = vmin.f32 %v1338_v16, 0.999999  ;;  %vm4786_vm8 = vmor %vm1287_vm7, %vm1288_vm1 }
 0x1e1   :  { %v1194_v8 = vsub.f32 1.0, %v1193_v28  ;;  %v1188_v28 = vand.u32 2147483648, %v4608_v63  ;;  %v4790_v51 = vmin.f32 %v1336_v9, 0.999999  ;;  %vm1183_vm3 = vweird.f32 %v4661_v52 }
 0x1e2   :  { %v3434_v7 = vpop.eup %3433  ;;  %v1286_v24 = vadd.f32 %v4707_v47, %v1285_v37  ;;  %v1280_v37 = vsel %vm4735_vm4, %v1279_v57, %v1275_v60  ;;  %v1181_v50 = vadd.f32 %v4661_v52, %v1180_v31  ;;  %vm1302_vm12 = vweird.f32 %v4709_v30  ;;  %vm4813_vm10 = vmor %vm1182_vm14, %vm1183_vm3 }
 0x1e3   :  { %v4765_v11 = vpop.eup %3435  ;;  %v4767_v26 = vadd.f32 1.0, %v3434_v7  ;;  %1771 = vmatmul.bf16.gmra.mxu1 %v5793_v54  ;;  %v1308_v7 = vand.u32 2147483648, %v4709_v30  ;;  %vm4798_vm6 = vcmp.eq.f32.partialorder %v1186_v58, 8.507059e+37  ;;  %v1195_v59 = vmul.f32 %v4732_v18, %v1194_v8 }
 0x1e4   :  { %v1298_v4 = vmul.f32 %v4765_v11, %v4709_v30  ;;  %v1290_v39 = vsel %vm4786_vm8, %v4707_v47, %v1286_v24  ;;  %vm4804_vm9 = vcmp.eq.f32.partialorder %v1306_v23, 8.507059e+37  ;;  %v1339_v60 = vmax.f32 %v1280_v37, 1e-06 }
 0x1e5   :  { %3437 = vrcp.f32 %v4767_v26  ;;  %v1364_v31 = vpack.c.bf16 %v4777_v34, %v4752_v27  ;;  %vm1303_vm0 = vweird.f32 %v4765_v11  ;;  %v1309_v54 = vor.u32 1.1754944e-38, %v1308_v7 }
 0x1e6   :  { %v1299_v35 = vsub.f32 1.0, %v1298_v4  ;;  %v1189_v58 = vor.u32 1.1754944e-38, %v1188_v28  ;;  %v1295_v8 = vsel %vm4759_vm5, %v1294_v45, %v1290_v39  ;;  %v1185_v4 = vsel %vm4813_vm10, %v4661_v52, %v1181_v50  ;;  %vm4834_vm11 = vmor %vm1302_vm12, %vm1303_vm0 }
 0x1e7   :  { %v1203_v23 = vand.u32 2147483648, %v4663_v48  ;;  %vm1153_vm2 = vweird.f32 %v4671_v10  ;;  %v1321_v7 = vand.u32 2147483647, %v4767_v26  ;;  %v1323_v37 = vand.u32 2147483648, %v4767_v26 }
 0x1e8   :  { %v1300_v16 = vmul.f32 %v4765_v11, %v1299_v35  ;;  %v1201_v35 = vand.u32 2147483647, %v4663_v48  ;;  %v1196_v28 = vadd.f32 %v4732_v18, %v1195_v59  ;;  %vm1198_vm15 = vweird.f32 %v4732_v18 }
 0x1e9   :  { %v4839_v45 = vmin.f32 %v1339_v60, 0.999999  ;;  %vm1197_vm4 = vweird.f32 %v4663_v48  ;;  %vm1152_vm14 = vweird.f32 %v4603_v32  ;;  %v1163_v3 = vmul.f32 %v4728_v41, %v4632_v53 }
 0x1ea   :  { %v1301_v24 = vadd.f32 %v4765_v11, %v1300_v16  ;;  %v1340_v30 = vmax.f32 %v1295_v8, 1e-06  ;;  %v4850_v39 = vsel %vm4798_vm6, %v1189_v58, %v1185_v4  ;;  %v5804_v59 = vsub.f32 1.0, %v4715_v25  ;;  %vm4856_vm7 = vmor %vm1197_vm4, %vm1198_vm15 }
 0x1eb   :  { %v3438_v63 = vpop.eup %3437  ;;  %vm1317_vm13 = vweird.f32 %v4767_v26  ;;  %vm1202_vm5 = vcmp.eq.f32.partialorder %v1201_v35, 8.507059e+37  ;;  %v1204_v47 = vor.u32 1.1754944e-38, %v1203_v23  ;;  %vm4860_vm1 = vcmp.eq.f32.partialorder %v1321_v7, 8.507059e+37 }
 0x1ec   :  { %v1313_v52 = vmul.f32 %v3438_v63, %v4767_v26  ;;  %v1305_v50 = vsel %vm4834_vm11, %v4765_v11, %v1301_v24  ;;  %v1150_v16 = vmul.f32 %v4671_v10, %v5804_v59  ;;  %v1324_v57 = vor.u32 1.1754944e-38, %v1323_v37 }
 0x1ed   :  { %v1200_v25 = vsel %vm4856_vm7, %v4732_v18, %v1196_v28  ;;  %v1118_v58 = vmul.f32 %v4597_v55, %v4526_v1  ;;  %v1310_v24 = vsel %vm4804_vm9, %v1309_v54, %v1305_v50  ;;  %vm1318_vm8 = vweird.f32 %v3438_v63  ;;  %vm4898_vm9 = vmor %vm1152_vm14, %vm1153_vm2 }
 0x1ee   :  { %v1314_v60 = vsub.f32 1.0, %v1313_v52  ;;  %v1164_v4 = vsub.f32 1.0, %v1163_v3  ;;  %v4871_v35 = vmin.f32 %v1340_v30, 0.999999  ;;  %v4874_v23 = vadd.f32 %v4671_v10, %v1150_v16  ;;  %vm1319_vm3 = vmor %vm1317_vm13, %vm1318_vm8 }
 0x1ef   :  { %v1158_v7 = vand.u32 2147483648, %v4603_v32  ;;  %v1119_v37 = vsub.f32 1.0, %v1118_v58  ;;  %v4877_v52 = vsel %vm1202_vm5, %v1204_v47, %v1200_v25  ;;  %v1128_v18 = vand.u32 2147483648, %v4526_v1 }
 0x1f0   :  { %v1315_v8 = vmul.f32 %v3438_v63, %v1314_v60  ;;  %v1133_v9 = vmul.f32 %v4606_v38, %v4541_v46  ;;  %v1341_v54 = vmax.f32 %v1310_v24, 1e-06  ;;  %vm1123_vm12 = vweird.f32 %v4597_v55 }
 0x1f1   :  { %v1120_v28 = vmul.f32 %v4597_v55, %v1119_v37  ;;  %v1126_v3 = vand.u32 2147483647, %v4526_v1  ;;  %v5809_v50 = vpack.c.b16 %v4575_v56, %v4558_v19  ;;  %v1165_v59 = vmul.f32 %v4728_v41, %v1164_v4 }
 0x1f2   :  { %v1316_v5 = vadd.f32 %v3438_v63, %v1315_v8  ;;  %vm1122_vm6 = vweird.f32 %v4526_v1  ;;  %v1134_v16 = vsub.f32 1.0, %v1133_v9  ;;  %v1129_v56 = vor.u32 1.1754944e-38, %v1128_v18 }
 0x1f3   :  { %1776 = vmatmul.bf16.gmra.mxu1 %v5809_v50  ;;  %v1121_v19 = vadd.f32 %v4597_v55, %v1120_v28  ;;  %vm1138_vm0 = vweird.f32 %v4606_v38  ;;  %vm1124_vm10 = vmor %vm1122_vm6, %vm1123_vm12  ;;  %v1141_v48 = vand.u32 2147483647, %v4541_v46  ;;  %v1143_v47 = vand.u32 2147483648, %v4541_v46 }
 0x1f4   :  { %v1320_v30 = vsel %vm1319_vm3, %v3438_v63, %v1316_v5  ;;  %v1135_v1 = vmul.f32 %v4606_v38, %v1134_v16  ;;  %v1357_v11 = vmin.f32 %v1341_v54, 0.999999  ;;  %vm1127_vm2 = vcmp.eq.f32.partialorder %v1126_v3, 8.507059e+37 }
 0x1f5   :  { %v1325_v26 = vsel %vm4860_vm1, %v1324_v57, %v1320_v30  ;;  %v1155_v57 = vsel %vm4898_vm9, %v4671_v10, %v4874_v23  ;;  %v1125_v25 = vsel %vm1124_vm10, %v4597_v55, %v1121_v19  ;;  %vm1137_vm15 = vweird.f32 %v4541_v46 }
 0x1f6   :  { %v1342_v63 = vmax.f32 %v1325_v26, 1e-06  ;;  %v1130_v24 = vsel %vm1127_vm2, %v1129_v56, %v1125_v25  ;;  %v1136_v8 = vadd.f32 %v4606_v38, %v1135_v1  ;;  %v1166_v4 = vadd.f32 %v4728_v41, %v1165_v59  ;;  %vm1139_vm4 = vmor %vm1137_vm15, %vm1138_vm0 }
 0x1f7   :  { %vm1168_vm11 = vweird.f32 %v4728_v41  ;;  %v1144_v37 = vor.u32 1.1754944e-38, %v1143_v47  ;;  %v1088_v5 = vmul.f32 %v4532_v61, %v4492_v17  ;;  %vm1142_vm14 = vcmp.eq.f32.partialorder %v1141_v48, 8.507059e+37 }
 0x1f8   :  { %v1358_v58 = vmin.f32 %v1342_v63, 0.999999  ;;  %v1140_v55 = vsel %vm1139_vm4, %v4606_v38, %v1136_v8  ;;  %v1329_v9 = vmax.f32 %v1130_v24, 1e-06  ;;  %v1365_v54 = vpack.c.bf16 %v4871_v35, %v4839_v45  ;;  %v3571_v38 = vld [vmem:[#allocation2 + $0x8] sm:$0xff] }
 0x1f9   :  { %vm1167_vm13 = vweird.f32 %v4632_v53  ;;  %v1145_v46 = vsel %vm1142_vm14, %v1144_v37, %v1140_v55  ;;  %v1089_v28 = vsub.f32 1.0, %v1088_v5  ;;  %v1171_v3 = vand.u32 2147483647, %v4632_v53 }
 0x1fa   :  { %v1366_v18 = vpack.c.bf16 %v1358_v58, %v1357_v11  ;;  %v1330_v50 = vmax.f32 %v1145_v46, 1e-06  ;;  %v1098_v30 = vand.u32 2147483648, %v4492_v17  ;;  %v1103_v59 = vmul.f32 %v4555_v20, %v4503_v12  ;;  %vm4930_vm7 = vmor %vm1167_vm13, %vm1168_vm11 }
 0x1fb   :  { %v1173_v45 = vand.u32 2147483648, %v4632_v53  ;;  %v1090_v35 = vmul.f32 %v4532_v61, %v1089_v28  ;;  %vm1093_vm5 = vweird.f32 %v4532_v61  ;;  %v1096_v16 = vand.u32 2147483647, %v4492_v17 }
 0x1fc   :  { %1367 = vmatpush.bf16.msrb.mxu3 %v1366_v18  ;;  %v1170_v26 = vsel %vm4930_vm7, %v4728_v41, %v1166_v4  ;;  %v1345_v19 = vmin.f32 %v1329_v9, 0.999999  ;;  %v1346_v56 = vmin.f32 %v1330_v50, 0.999999  ;;  %v1104_v63 = vsub.f32 1.0, %v1103_v59  ;;  %v3567_v50 = vld [vmem:[#allocation2 + $0x30] sm:$0xff] }
 0x1fd   :  { %v1091_v1 = vadd.f32 %v4532_v61, %v1090_v35  ;;  %vm1092_vm1 = vweird.f32 %v4492_v17  ;;  %vm1108_vm8 = vweird.f32 %v4555_v20  ;;  %v1113_v53 = vand.u32 2147483648, %v4503_v12  ;;  %v3569_v59 = vld [vmem:[#allocation2 + $0x18] sm:$0xff]  ;;  %v3247_v35 = vld [vmem:[#allocation4 + $0xb0] sm:$0xff] }
 0x1fe   :  { %v1360_v48 = vpack.c.bf16 %v1346_v56, %v1345_v19  ;;  %vm1094_vm3 = vmor %vm1092_vm1, %vm1093_vm5  ;;  %v1099_v47 = vor.u32 1.1754944e-38, %v1098_v30  ;;  %v1105_v11 = vmul.f32 %v4555_v20, %v1104_v63  ;;  %v1111_v25 = vand.u32 2147483647, %v4503_v12  ;;  %v3568_v30 = vld [vmem:[#allocation2] sm:$0xff]  ;;  %v3573_v19 = vld [vmem:[#allocation2 + $0x28] sm:$0xff] }
 0x1ff   :  { %v1334_v41 = vmax.f32 %v4877_v52, 1e-06  ;;  %v1174_v58 = vor.u32 1.1754944e-38, %v1173_v45  ;;  %v1095_v24 = vsel %vm1094_vm3, %v4532_v61, %v1091_v1  ;;  %vm1097_vm12 = vcmp.eq.f32.partialorder %v1096_v16, 8.507059e+37  ;;  %v3572_v45 = vld [vmem:[#allocation2 + $0x20] sm:$0xff]  ;;  %v3246_v16 = vld [vmem:[#allocation4 + $0xa8] sm:$0xff] }
 0x200   :  { %1368 = vmatpush.bf16.msrb.mxu3 %v1365_v54  ;;  %vm1172_vm6 = vcmp.eq.f32.partialorder %v1171_v3, 8.507059e+37  ;;  %v1100_v17 = vsel %vm1097_vm12, %v1099_v47, %v1095_v24  ;;  %v1106_v8 = vadd.f32 %v4555_v20, %v1105_v11  ;;  %vm1107_vm0 = vweird.f32 %v4503_v12  ;;  %v3244_v56 = vld [vmem:[#allocation4 + $0x98] sm:$0xff]  ;;  %v3243_v63 = vld [vmem:[#allocation4 + $0x90] sm:$0xff] }
 0x201   :  { %v1333_v4 = vmax.f32 %v4850_v39, 1e-06  ;;  %v1159_v37 = vor.u32 1.1754944e-38, %v1158_v7  ;;  %v1175_v5 = vsel %vm1172_vm6, %v1174_v58, %v1170_v26  ;;  %vm1109_vm10 = vmor %vm1107_vm0, %vm1108_vm8  ;;  %v1114_v52 = vor.u32 1.1754944e-38, %v1113_v53  ;;  %v3245_v26 = vld [vmem:[#allocation4 + $0xa0] sm:$0xff]  ;;  %v3574_v1 = vld [vmem:[#allocation2 + $0x38] sm:$0xff] }
 0x202   :  { %v5814_v61 = vpack.c.b16 %v4719_v13, %v4695_v2  ;;  %v5815_v12 = vand.u32 2147483647, %v4603_v32  ;;  %v1110_v39 = vsel %vm1109_vm10, %v4555_v20, %v1106_v8  ;;  %vm1112_vm15 = vcmp.eq.f32.partialorder %v1111_v25, 8.507059e+37  ;;  %v3242_v53 = vld [vmem:[#allocation4 + $0x88] sm:$0xff] }
 0x203   :  { %v1327_v7 = vmax.f32 %v1100_v17, 1e-06  ;;  %v1115_v55 = vsel %vm1112_vm15, %v1114_v52, %v1110_v39  ;;  %v1363_v27 = vpack.c.bf16 %v4790_v51, %v4656_v43  ;;  %v1350_v34 = vmin.f32 %v1334_v41, 0.999999 }
 0x204   :  { %1369 = vmatpush.bf16.msrb.mxu3 %v1364_v31  ;;  %1781 = vmatmul.bf16.gmra.mxu1 %v5814_v61  ;;  %vm1157_vm2 = vcmp.eq.f32.partialorder %v5815_v12, 8.507059e+37  ;;  %v1332_v2 = vmax.f32 %v1175_v5, 1e-06  ;;  %v1328_v13 = vmax.f32 %v1115_v55, 1e-06  ;;  %v1463_v60 = vpack.c.bf16 %v4674_v33, %v4674_v33  ;;  %v3570_v33 = vld [vmem:[#allocation2 + $0x10] sm:$0xff] }
 0x205   :  { %v1160_v18 = vsel %vm1157_vm2, %v1159_v37, %v1155_v57  ;;  %v1349_v31 = vmin.f32 %v1333_v4, 0.999999  ;;  %v1343_v9 = vmin.f32 %v1327_v7, 0.999999  ;;  %v1462_v23 = vpack.c.bf16 %v4611_v0, %v4611_v0  ;;  %v3248_v0 = vld [vmem:[#allocation4 + $0xb8] sm:$0xff] }
 0x206   :  { %v1331_v32 = vmax.f32 %v1160_v18, 1e-06  ;;  %v1344_v20 = vmin.f32 %v1328_v13, 0.999999  ;;  %v1348_v46 = vmin.f32 %v1332_v2, 0.999999  ;;  %v1543_v51 = vunpack.c.l.b16 %v1463_v60  ;;  %1694 = vmatpush.bf16.msrb.mxu0 %v3248_v0 }
 0x207   :  { %v1362_v54 = vpack.c.bf16 %v1350_v34, %v1349_v31  ;;  %v1542_v57 = vunpack.c.l.b16 %v1462_v23 }
 0x208   :  { %1370 = vmatpush.bf16.msrb.mxu3 %v1363_v27  ;;  %v1359_v28 = vpack.c.bf16 %v1344_v20, %v1343_v9  ;;  %v1347_v10 = vmin.f32 %v1331_v32, 0.999999 }
 0x209   :  { %v1551_v3 = vpack.c.b16 %v1543_v51, %v1542_v57 }
 0x20a   :  { %v1361_v43 = vpack.c.bf16 %v1348_v46, %v1347_v10  ;;  %1695 = vmatpush.bf16.msrb.mxu0 %v3247_v35 }
 0x20c   :  { %1371 = vmatpush.bf16.msrb.mxu3 %v1362_v54 }
 0x20e   :  { %1696 = vmatpush.bf16.msrb.mxu0 %v3246_v16 }
 0x210   :  { %1372 = vmatpush.bf16.msrb.mxu3 %v1361_v43 }
 0x212   :  { %1697 = vmatpush.bf16.msrb.mxu0 %v3245_v26 }
 0x214   :  { %1373 = vmatpush.bf16.msrb.mxu3 %v1360_v48  ;;  %1786 = vmatmul.bf16.gmra.mxu1 %v1551_v3  ;;  %v3241_v48 = vld [vmem:[#allocation4 + $0x80] sm:$0xff] }
 0x216   :  { %1698 = vmatpush.bf16.msrb.mxu0 %v3244_v56 }
 0x218   :  { %1374 = vmatpush.bf16.msrb.mxu3 %v1359_v28 }
 0x21a   :  { %1699 = vmatpush.bf16.msrb.mxu0 %v3243_v63 }
 0x21b   :  { %1375 = vmatmul.bf16.vlgmr.msrb.gmra.mxu3 %v3567_v50 }
 0x21e   :  { %1700 = vmatpush.bf16.msrb.mxu0 %v3242_v53 }
 0x222   :  { %1701 = vmatpush.bf16.msrb.mxu0 %v3241_v48 }
 0x22b   :  { %1380 = vmatmul.bf16.gmra.mxu3 %v3568_v30 }
 0x23b   :  { %1385 = vmatmul.bf16.gmra.mxu3 %v3569_v59 }
 0x24b   :  { %1390 = vmatmul.bf16.gmra.mxu3 %v3570_v33 }
 0x25b   :  { %1395 = vmatmul.bf16.gmra.mxu3 %v3571_v38 }
 0x26b   :  { %1400 = vmatmul.bf16.gmra.mxu3 %v3572_v45 }
 0x27b   :  { %1405 = vmatmul.bf16.gmra.mxu3 %v3573_v19 }
 0x28b   :  { %1410 = vmatmul.bf16.gmra.mxu3 %v3574_v1 }
 0x29e   :  { %v1376_v47 = vpop.f32.mrf.mxu3 }
 0x29f   :  { %v1416_v11 = vmul.f32 %v1376_v47, %v4396_v14 }
 0x2a1   :  { %v1432_v41 = vpack.c.bf16 %v1416_v11, %v1416_v11 }
 0x2a3   :  { %v1480_v17 = vunpack.c.l.b16 %v1432_v41  ;;  %v3272_v41 = vld [vmem:[#allocation4 + $0x178] sm:$0xff] }
 0x2a4   :  { %2512 = vmatpush.bf16.msra.mxu0 %v3272_v41 }
 0x2a6   :  { %v1378_v25 = vpop.f32.mrf.mxu3 }
 0x2a7   :  { %v1417_v58 = vmul.f32 %v1378_v25, %v4407_v44 }
 0x2a9   :  { %v1433_v24 = vpack.c.bf16 %v1417_v58, %v1417_v58  ;;  %v3271_v58 = vld [vmem:[#allocation4 + $0x170] sm:$0xff] }
 0x2aa   :  { %2513 = vmatpush.bf16.msra.mxu0 %v3271_v58 }
 0x2ab   :  { %v1481_v8 = vunpack.c.l.b16 %v1433_v24  ;;  %v5816_v24 = vld [vmem:[#allocation12_spill] sm:$0xff] }
 0x2ad   :  { %v1496_v4 = vpack.c.b16 %v1481_v8, %v1480_v17  ;;  %v3270_v8 = vld [vmem:[#allocation4 + $0x168] sm:$0xff] }
 0x2ae   :  { %v1381_v37 = vpop.f32.mrf.mxu3  ;;  %2514 = vmatpush.bf16.msra.mxu0 %v3270_v8 }
 0x2af   :  { %1702 = vmatmul.bf16.vlgmr.msrb.gmra.mxu0 %v1496_v4  ;;  %v1418_v5 = vmul.f32 %v1381_v37, %v4416_v40 }
 0x2b1   :  { %v1434_v61 = vpack.c.bf16 %v1418_v5, %v1418_v5  ;;  %v5817_v5 = vld [vmem:[#allocation13_spill] sm:$0xff] }
 0x2b3   :  { %v1482_v7 = vunpack.c.l.b16 %v1434_v61 }
 0x2b6   :  { %v1383_v52 = vpop.f32.mrf.mxu3 }
 0x2b7   :  { %v1419_v12 = vmul.f32 %v1383_v52, %v4425_v62 }
 0x2b9   :  { %v1435_v39 = vpack.c.bf16 %v1419_v12, %v1419_v12 }
 0x2bb   :  { %v1483_v18 = vunpack.c.l.b16 %v1435_v39 }
 0x2bd   :  { %v1497_v55 = vpack.c.b16 %v1483_v18, %v1482_v7 }
 0x2be   :  { %v1386_v27 = vpop.f32.mrf.mxu3 }
 0x2bf   :  { %1707 = vmatmul.bf16.gmra.mxu0 %v1497_v55  ;;  %v1420_v34 = vmul.f32 %v1386_v27, %v4432_v42  ;;  %v1752_v55 = vpop.f32.mrf.mxu1  ;;  %v5818_v27 = vld [vmem:[#allocation14_spill] sm:$0xff] }
 0x2c1   :  { %v1436_v13 = vpack.c.bf16 %v1420_v34, %v1420_v34 }
 0x2c3   :  { %v1484_v9 = vunpack.c.l.b16 %v1436_v13 }
 0x2c6   :  { %v1388_v2 = vpop.f32.mrf.mxu3 }
 0x2c7   :  { %v1421_v31 = vmul.f32 %v1388_v2, %v4439_v29 }
 0x2c9   :  { %v1437_v32 = vpack.c.bf16 %v1421_v31, %v1421_v31  ;;  %v5819_v31 = vld [vmem:[#allocation15_spill] sm:$0xff] }
 0x2cb   :  { %v1485_v20 = vunpack.c.l.b16 %v1437_v32 }
 0x2cd   :  { %v1498_v54 = vpack.c.b16 %v1485_v20, %v1484_v9  ;;  %v1754_v20 = vpop.f32.mrf.mxu1 }
 0x2ce   :  { %v1391_v46 = vpop.f32.mrf.mxu3 }
 0x2cf   :  { %1712 = vmatmul.bf16.gmra.mxu0 %v1498_v54  ;;  %v1422_v60 = vmul.f32 %v1391_v46, %v4446_v36 }
 0x2d1   :  { %v1438_v10 = vpack.c.bf16 %v1422_v60, %v1422_v60  ;;  %v3269_v60 = vld [vmem:[#allocation4 + $0x160] sm:$0xff] }
 0x2d2   :  { %2515 = vmatpush.bf16.msra.mxu0 %v3269_v60 }
 0x2d3   :  { %v1486_v51 = vunpack.c.l.b16 %v1438_v10  ;;  %v3268_v10 = vld [vmem:[#allocation4 + $0x158] sm:$0xff] }
 0x2d6   :  { %v1393_v28 = vpop.f32.mrf.mxu3  ;;  %2516 = vmatpush.bf16.msra.mxu0 %v3268_v10 }
 0x2d7   :  { %v1423_v23 = vmul.f32 %v1393_v28, %v4449_v21 }
 0x2d9   :  { %v1439_v43 = vpack.c.bf16 %v1423_v23, %v1423_v23  ;;  %v1757_v23 = vpop.f32.mrf.mxu1 }
 0x2db   :  { %v1487_v57 = vunpack.c.l.b16 %v1439_v43  ;;  %v3267_v43 = vld [vmem:[#allocation4 + $0x150] sm:$0xff] }
 0x2dc   :  { %2517 = vmatpush.bf16.msra.mxu0 %v3267_v43 }
 0x2dd   :  { %v1499_v3 = vpack.c.b16 %v1487_v57, %v1486_v51  ;;  %v3266_v51 = vld [vmem:[#allocation4 + $0x148] sm:$0xff]  ;;  %v4995_v57 = vld [vmem:[%s5640_s4 + $0x1] ss:$0 sm:$0xff] }
 0x2de   :  { %v1396_v50 = vpop.f32.mrf.mxu3 }
 0x2df   :  { %1717 = vmatmul.bf16.gmra.mxu0 %v1499_v3  ;;  %v1424_v30 = vmul.f32 %v1396_v50, %v4394_v6  ;;  %v3265_v50 = vld [vmem:[#allocation4 + $0x140] sm:$0xff] }
 0x2e0   :  { %2518 = vmatpush.bf16.msra.mxu0 %v3266_v51 }
 0x2e1   :  { %v1440_v33 = vpack.c.bf16 %v1424_v30, %v1424_v30  ;;  %v1759_v30 = vpop.f32.mrf.mxu1 }
 0x2e3   :  { %v1488_v0 = vunpack.c.l.b16 %v1440_v33 }
 0x2e4   :  { %2519 = vmatpush.bf16.msra.mxu0 %v3265_v50 }
 0x2e6   :  { %v1398_v59 = vpop.f32.mrf.mxu3 }
 0x2e7   :  { %v1425_v38 = vmul.f32 %v1398_v59, %v4401_v22 }
 0x2e9   :  { %v1441_v45 = vpack.c.bf16 %v1425_v38, %v1425_v38 }
 0x2eb   :  { %v1489_v35 = vunpack.c.l.b16 %v1441_v45 }
 0x2ed   :  { %v1500_v16 = vpack.c.b16 %v1489_v35, %v1488_v0 }
 0x2ee   :  { %v1401_v26 = vpop.f32.mrf.mxu3 }
 0x2ef   :  { %1722 = vmatmul.bf16.gmra.mxu0 %v1500_v16  ;;  %v1426_v19 = vmul.f32 %v1401_v26, %v4398_v15  ;;  %v1762_v16 = vpop.f32.mrf.mxu1 }
 0x2f1   :  { %v1442_v63 = vpack.c.bf16 %v1426_v19, %v1426_v19 }
 0x2f3   :  { %v1490_v48 = vunpack.c.l.b16 %v1442_v63 }
 0x2f6   :  { %v1403_v56 = vpop.f32.mrf.mxu3 }
 0x2f7   :  { %v1427_v1 = vmul.f32 %v1403_v56, %v4410_v49 }
 0x2f9   :  { %v1443_v53 = vpack.c.bf16 %v1427_v1, %v1427_v1 }
 0x2fb   :  { %v1491_v47 = vunpack.c.l.b16 %v1443_v53 }
 0x2fd   :  { %v1501_v11 = vpack.c.b16 %v1491_v47, %v1490_v48  ;;  %v1764_v48 = vpop.f32.mrf.mxu1 }
 0x2fe   :  { %v1406_v25 = vpop.f32.mrf.mxu3 }
 0x2ff   :  { %1727 = vmatmul.bf16.gmra.mxu0 %v1501_v11  ;;  %v1428_v17 = vmul.f32 %v1406_v25, %v5816_v24 }
 0x301   :  { %v1444_v37 = vpack.c.bf16 %v1428_v17, %v1428_v17 }
 0x303   :  { %v1492_v12 = vunpack.c.l.b16 %v1444_v37 }
 0x305   :  { %v1767_v37 = vpop.f32.mrf.mxu1 }
 0x306   :  { %v1408_v4 = vpop.f32.mrf.mxu3 }
 0x307   :  { %v1429_v52 = vmul.f32 %v1408_v4, %v5817_v5 }
 0x309   :  { %v1445_v61 = vpack.c.bf16 %v1429_v52, %v1429_v52 }
 0x30b   :  { %v1493_v39 = vunpack.c.l.b16 %v1445_v61 }
 0x30d   :  { %v1502_v7 = vpack.c.b16 %v1493_v39, %v1492_v12 }
 0x30e   :  { %v1411_v18 = vpop.f32.mrf.mxu3 }
 0x30f   :  { %1732 = vmatmul.bf16.gmra.mxu0 %v1502_v7  ;;  %v1430_v34 = vmul.f32 %v1411_v18, %v5818_v27 }
 0x311   :  { %v1446_v13 = vpack.c.bf16 %v1430_v34, %v1430_v34 }
 0x313   :  { %v1494_v54 = vunpack.c.l.b16 %v1446_v13 }
 0x316   :  { %v1413_v2 = vpop.f32.mrf.mxu3 }
 0x317   :  { %v1431_v32 = vmul.f32 %v1413_v2, %v5819_v31 }
 0x319   :  { %v1447_v9 = vpack.c.bf16 %v1431_v32, %v1431_v32 }
 0x31b   :  { %v1495_v46 = vunpack.c.l.b16 %v1447_v9 }
 0x31d   :  { %v1503_v28 = vpack.c.b16 %v1495_v46, %v1494_v54 }
 0x31f   :  { %1737 = vmatmul.bf16.gmra.mxu0 %v1503_v28 }
 0x32c   :  { %v1703_v3 = vpop.f32.mrf.mxu0 }
 0x32d   :  { %v1704_v59 = vadd.f32 %v4995_v57, %v1703_v3 }
 0x32f   :  { %v1753_v33 = vadd.f32 %v1752_v55, %v1704_v59  ;;  %v1769_v55 = vpop.f32.mrf.mxu1 }
 0x331   :  { %v2217_v0 = vpack.c.bf16 %v1753_v33, %v1753_v33  ;;  %v3103_v43 = vmul.f32 -1.442695, %v1753_v33 }
 0x333   :  { %v2297_v19 = vunpack.c.l.b16 %v2217_v0  ;;  %3439 = vpow2.f32 %v3103_v43 }
 0x334   :  { %v1705_v38 = vpop.f32.mrf.mxu0 }
 0x335   :  { %v1706_v45 = vadd.f32 %v4995_v57, %v1705_v38 }
 0x337   :  { %v1755_v35 = vadd.f32 %v1754_v20, %v1706_v45  ;;  %v1772_v60 = vpop.f32.mrf.mxu1 }
 0x339   :  { %v2218_v26 = vpack.c.bf16 %v1755_v35, %v1755_v35 }
 0x33b   :  { %v2298_v56 = vunpack.c.l.b16 %v2218_v26 }
 0x33c   :  { %v1708_v63 = vpop.f32.mrf.mxu0 }
 0x33d   :  { %v2313_v1 = vpack.c.b16 %v2298_v56, %v2297_v19  ;;  %v1709_v53 = vadd.f32 %v4995_v57, %v1708_v63  ;;  %v3440_v19 = vpop.eup %3439 }
 0x33f   :  { %2520 = vmatmul.bf16.vlgmr.msra.gmra.mxu0 %v2313_v1  ;;  %v1758_v47 = vadd.f32 %v1757_v23, %v1709_v53  ;;  %v5006_v1 = vadd.f32 1.0, %v3440_v19 }
 0x341   :  { %v2219_v41 = vpack.c.bf16 %v1758_v47, %v1758_v47  ;;  %vm1861_vm11 = vweird.f32 %v5006_v1 }
 0x343   :  { %v2299_v8 = vunpack.c.l.b16 %v2219_v41 }
 0x344   :  { %v1710_v11 = vpop.f32.mrf.mxu0 }
 0x345   :  { %v1711_v25 = vadd.f32 %v4995_v57, %v1710_v11 }
 0x347   :  { %v1760_v58 = vadd.f32 %v1759_v30, %v1711_v25  ;;  %v1774_v30 = vpop.f32.mrf.mxu1 }
 0x349   :  { %v2220_v17 = vpack.c.bf16 %v1760_v58, %v1760_v58 }
 0x34b   :  { %v2300_v4 = vunpack.c.l.b16 %v2220_v17 }
 0x34c   :  { %v1713_v52 = vpop.f32.mrf.mxu0 }
 0x34d   :  { %v2314_v61 = vpack.c.b16 %v2300_v4, %v2299_v8  ;;  %v1714_v12 = vadd.f32 %v4995_v57, %v1713_v52 }
 0x34f   :  { %2525 = vmatmul.bf16.gmra.mxu0 %v2314_v61  ;;  %v1763_v39 = vadd.f32 %v1762_v16, %v1714_v12  ;;  %v3104_v16 = vmul.f32 -1.442695, %v1755_v35  ;;  %v1777_v63 = vpop.f32.mrf.mxu1 }
 0x351   :  { %v2221_v34 = vpack.c.bf16 %v1763_v39, %v1763_v39  ;;  %3441 = vpow2.f32 %v3104_v16 }
 0x352   :  { %3443 = vrcp.f32 %v5006_v1 }
 0x353   :  { %v2301_v32 = vunpack.c.l.b16 %v2221_v34 }
 0x354   :  { %v1715_v7 = vpop.f32.mrf.mxu0 }
 0x355   :  { %v1716_v18 = vadd.f32 %v4995_v57, %v1715_v7  ;;  %v3107_v7 = vmul.f32 -1.442695, %v1763_v39 }
 0x357   :  { %v1765_v2 = vadd.f32 %v1764_v48, %v1716_v18  ;;  %v3105_v48 = vmul.f32 -1.442695, %v1758_v47  ;;  %v3442_v41 = vpop.eup %3441  ;;  %v1779_v12 = vpop.f32.mrf.mxu1  ;;  %v3106_v47 = vmul.f32 -1.442695, %v1760_v58 }
 0x358   :  { %v5014_v4 = vadd.f32 1.0, %v3442_v41  ;;  %v5016_v61 = vpop.eup %3443 }
 0x359   :  { %v2222_v13 = vpack.c.bf16 %v1765_v2, %v1765_v2  ;;  %3445 = vpow2.f32 %v3105_v48  ;;  %v3108_v34 = vmul.f32 -1.442695, %v1765_v2  ;;  %vm1862_vm9 = vweird.f32 %v5016_v61 }
 0x35a   :  { %3447 = vrcp.f32 %v5014_v4  ;;  %vm5056_vm4 = vmor %vm1861_vm11, %vm1862_vm9  ;;  %vm1876_vm7 = vweird.f32 %v5014_v4 }
 0x35b   :  { %v2302_v9 = vunpack.c.l.b16 %v2222_v13  ;;  %v1857_v13 = vmul.f32 %v5016_v61, %v5006_v1  ;;  %3449 = vpow2.f32 %v3106_v47 }
 0x35c   :  { %v1718_v20 = vpop.f32.mrf.mxu0  ;;  %3451 = vpow2.f32 %v3107_v7 }
 0x35d   :  { %v2315_v54 = vpack.c.b16 %v2302_v9, %v2301_v32  ;;  %v1719_v46 = vadd.f32 %v4995_v57, %v1718_v20  ;;  %v1858_v20 = vsub.f32 1.0, %v1857_v13  ;;  %3453 = vpow2.f32 %v3108_v34 }
 0x35f   :  { %2530 = vmatmul.bf16.gmra.mxu0 %v2315_v54  ;;  %v1768_v28 = vadd.f32 %v1767_v37, %v1719_v46  ;;  %v1782_v43 = vpop.f32.mrf.mxu1 }
 0x361   :  { %v2223_v51 = vpack.c.bf16 %v1768_v28, %v1768_v28  ;;  %v3109_v32 = vmul.f32 -1.442695, %v1768_v28  ;;  %v1859_v28 = vmul.f32 %v5016_v61, %v1858_v20 }
 0x363   :  { %v2303_v59 = vunpack.c.l.b16 %v2223_v51  ;;  %3455 = vpow2.f32 %v3109_v32 }
 0x364   :  { %v1720_v10 = vpop.f32.mrf.mxu0 }
 0x365   :  { %v1721_v23 = vadd.f32 %v4995_v57, %v1720_v10 }
 0x367   :  { %v1770_v3 = vadd.f32 %v1769_v55, %v1721_v23  ;;  %v3446_v55 = vpop.eup %3445  ;;  %v1784_v13 = vpop.f32.mrf.mxu1 }
 0x368   :  { %v5024_v54 = vadd.f32 1.0, %v3446_v55 }
 0x369   :  { %v2224_v50 = vpack.c.bf16 %v1770_v3, %v1770_v3  ;;  %v3110_v39 = vmul.f32 -1.442695, %v1770_v3 }
 0x36a   :  { %3457 = vrcp.f32 %v5024_v54  ;;  %vm1891_vm3 = vweird.f32 %v5024_v54 }
 0x36b   :  { %v2304_v38 = vunpack.c.l.b16 %v2224_v50  ;;  %3459 = vpow2.f32 %v3110_v39 }
 0x36c   :  { %v1723_v45 = vpop.f32.mrf.mxu0 }
 0x36d   :  { %v2316_v0 = vpack.c.b16 %v2304_v38, %v2303_v59  ;;  %v1724_v26 = vadd.f32 %v4995_v57, %v1723_v45 }
 0x36f   :  { %2535 = vmatmul.bf16.gmra.mxu0 %v2316_v0  ;;  %v1773_v56 = vadd.f32 %v1772_v60, %v1724_v26  ;;  %v5027_v60 = vpop.eup %3447  ;;  %v1860_v0 = vadd.f32 %v5016_v61, %v1859_v28 }
 0x370   :  { %v3450_v23 = vpop.eup %3449  ;;  %v1872_v50 = vmul.f32 %v5027_v60, %v5014_v4  ;;  %vm1877_vm14 = vweird.f32 %v5027_v60 }
 0x371   :  { %v2225_v11 = vpack.c.bf16 %v1773_v56, %v1773_v56  ;;  %v3452_v51 = vpop.eup %3451  ;;  %v5041_v26 = vadd.f32 1.0, %v3450_v23  ;;  %vm1878_vm5 = vmor %vm1876_vm7, %vm1877_vm14 }
 0x372   :  { %v3454_v59 = vpop.eup %3453  ;;  %v1873_v16 = vsub.f32 1.0, %v1872_v50  ;;  %v5043_v19 = vadd.f32 1.0, %v3452_v51 }
 0x373   :  { %v2305_v17 = vunpack.c.l.b16 %v2225_v11  ;;  %v1865_v11 = vand.u32 2147483647, %v5006_v1  ;;  %vm1906_vm10 = vweird.f32 %v5041_v26 }
 0x374   :  { %v1725_v33 = vpop.f32.mrf.mxu0  ;;  %v1874_v41 = vmul.f32 %v5027_v60, %v1873_v16  ;;  %vm1921_vm11 = vweird.f32 %v5043_v19 }
 0x375   :  { %v1726_v53 = vadd.f32 %v4995_v57, %v1725_v33  ;;  %v1867_v33 = vand.u32 2147483648, %v5006_v1  ;;  %v1864_v1 = vsel %vm5056_vm4, %v5016_v61, %v1860_v0  ;;  %vm1866_vm13 = vcmp.eq.f32.partialorder %v1865_v11, 8.507059e+37 }
 0x376   :  { %v1875_v7 = vadd.f32 %v5027_v60, %v1874_v41  ;;  %v1895_v41 = vand.u32 2147483647, %v5024_v54 }
 0x377   :  { %v5009_v25 = vadd.f32 %v1774_v30, %v1726_v53  ;;  %v3111_v30 = vmul.f32 -1.442695, %v1773_v56  ;;  %v3456_v53 = vpop.eup %3455  ;;  %v1868_v55 = vor.u32 1.1754944e-38, %v1867_v33 }
 0x378   :  { %vm1896_vm6 = vcmp.eq.f32.partialorder %v1895_v41, 8.507059e+37 }
 0x379   :  { %v2226_v35 = vpack.c.bf16 %v5009_v25, %v5009_v25  ;;  %3461 = vpow2.f32 %v3111_v30  ;;  %v1869_v32 = vsel %vm1866_vm13, %v1868_v55, %v1864_v1  ;;  %v1787_v1 = vpop.f32.mrf.mxu1 }
 0x37a   :  { %3463 = vrcp.f32 %v5041_v26 }
 0x37b   :  { %v2306_v8 = vunpack.c.l.b16 %v2226_v35  ;;  %v5050_v35 = vpop.eup %3457  ;;  %3465 = vrcp.f32 %v5043_v19 }
 0x37c   :  { %v1728_v37 = vpop.f32.mrf.mxu0  ;;  %v1887_v34 = vmul.f32 %v5050_v35, %v5024_v54  ;;  %vm1892_vm8 = vweird.f32 %v5050_v35 }
 0x37d   :  { %v2317_v52 = vpack.c.b16 %v2306_v8, %v2305_v17  ;;  %v1729_v18 = vadd.f32 %v4995_v57, %v1728_v37  ;;  %v5052_v17 = vadd.f32 1.0, %v3454_v59  ;;  %v1880_v37 = vand.u32 2147483647, %v5014_v4  ;;  %vm5108_vm12 = vmor %vm1891_vm3, %vm1892_vm8 }
 0x37e   :  { %v1888_v39 = vsub.f32 1.0, %v1887_v34 }
 0x37f   :  { %2540 = vmatmul.bf16.gmra.mxu0 %v2317_v52  ;;  %v5022_v9 = vadd.f32 %v1777_v63, %v1729_v18  ;;  %v1882_v52 = vand.u32 2147483648, %v5014_v4  ;;  %v5068_v18 = vadd.f32 1.0, %v3456_v53  ;;  %3467 = vrcp.f32 %v5052_v17 }
 0x380   :  { %vm1881_vm1 = vcmp.eq.f32.partialorder %v1880_v37, 8.507059e+37  ;;  %v1889_v51 = vmul.f32 %v5050_v35, %v1888_v39  ;;  %v1912_v39 = vand.u32 2147483648, %v5041_v26 }
 0x381   :  { %v2227_v2 = vpack.c.bf16 %v5022_v9, %v5022_v9  ;;  %v1883_v20 = vor.u32 1.1754944e-38, %v1882_v52  ;;  %3469 = vrcp.f32 %v5068_v18  ;;  %v3113_v28 = vmul.f32 -1.442695, %v5022_v9 }
 0x382   :  { %v1890_v16 = vadd.f32 %v5050_v35, %v1889_v51 }
 0x383   :  { %v2307_v38 = vunpack.c.l.b16 %v2227_v2 }
 0x384   :  { %v1730_v58 = vpop.f32.mrf.mxu0 }
 0x385   :  { %v1731_v46 = vadd.f32 %v4995_v57, %v1730_v58 }
 0x387   :  { %v5031_v10 = vadd.f32 %v1779_v12, %v1731_v46  ;;  %v3460_v12 = vpop.eup %3459  ;;  %v1879_v46 = vsel %vm1878_vm5, %v5027_v60, %v1875_v7  ;;  %v3112_v60 = vmul.f32 -1.442695, %v5009_v25  ;;  %v1894_v7 = vsel %vm5108_vm12, %v5050_v35, %v1890_v16 }
 0x388   :  { %v5075_v61 = vadd.f32 1.0, %v3460_v12  ;;  %v3462_v2 = vpop.eup %3461  ;;  %v1884_v4 = vsel %vm1881_vm1, %v1883_v20, %v1879_v46  ;;  %v1927_v12 = vand.u32 2147483648, %v5043_v19 }
 0x389   :  { %v2228_v3 = vpack.c.bf16 %v5031_v10, %v5031_v10  ;;  %v2097_v50 = vmax.f32 %v1884_v4, 1e-06  ;;  %v5082_v30 = vpop.eup %3463  ;;  %v3114_v11 = vmul.f32 -1.442695, %v5031_v10 }
 0x38a   :  { %3471 = vrcp.f32 %v5075_v61  ;;  %v5086_v59 = vpop.eup %3465  ;;  %v1902_v8 = vmul.f32 %v5082_v30, %v5041_v26  ;;  %vm1907_vm0 = vweird.f32 %v5082_v30 }
 0x38b   :  { %v2308_v45 = vunpack.c.l.b16 %v2228_v3  ;;  %v2096_v3 = vmax.f32 %v1869_v32, 1e-06  ;;  %v5090_v0 = vpop.eup %3467  ;;  %v5095_v33 = vmin.f32 %v2097_v50, 0.999999  ;;  %v1917_v46 = vmul.f32 %v5086_v59, %v5043_v19  ;;  %vm1908_vm2 = vmor %vm1906_vm10, %vm1907_vm0 }
 0x38c   :  { %v1733_v63 = vpop.f32.mrf.mxu0  ;;  %v1903_v34 = vsub.f32 1.0, %v1902_v8  ;;  %vm1922_vm9 = vweird.f32 %v5086_v59 }
 0x38d   :  { %v1734_v56 = vadd.f32 %v4995_v57, %v1733_v63  ;;  %v2318_v48 = vpack.c.b16 %v2308_v45, %v2307_v38  ;;  %v5088_v38 = vadd.f32 1.0, %v3462_v2  ;;  %v1897_v63 = vand.u32 2147483648, %v5024_v54  ;;  %vm5163_vm4 = vmor %vm1921_vm11, %vm1922_vm9 }
 0x38e   :  { %v1904_v2 = vmul.f32 %v5082_v30, %v1903_v34 }
 0x38f   :  { %v1783_v47 = vadd.f32 %v1782_v43, %v1734_v56  ;;  %2545 = vmatmul.bf16.gmra.mxu0 %v2318_v48  ;;  %v5097_v56 = vmin.f32 %v2096_v3, 0.999999  ;;  %v5099_v48 = vpop.eup %3469  ;;  %v1898_v55 = vor.u32 1.1754944e-38, %v1897_v63 }
 0x390   :  { %v5114_v10 = vpop.eup %3471  ;;  %v1905_v51 = vadd.f32 %v5082_v30, %v1904_v2 }
 0x391   :  { %v3115_v58 = vmul.f32 -1.442695, %v1783_v47  ;;  %v2229_v9 = vpack.c.bf16 %v1783_v47, %v1783_v47 }
 0x392   :  { %v1909_v63 = vsel %vm1908_vm2, %v5082_v30, %v1905_v51  ;;  %v1942_v51 = vand.u32 2147483648, %v5052_v17 }
 0x393   :  { %3473 = vpow2.f32 %v3115_v58  ;;  %v2309_v37 = vunpack.c.l.b16 %v2229_v9  ;;  %v1910_v58 = vand.u32 2147483647, %v5041_v26 }
 0x394   :  { %v1735_v23 = vpop.f32.mrf.mxu0  ;;  %3475 = vpow2.f32 %v3113_v28 }
 0x395   :  { %v1736_v43 = vadd.f32 %v4995_v57, %v1735_v23  ;;  %v1899_v23 = vsel %vm1896_vm6, %v1898_v55, %v1894_v7  ;;  %vm1911_vm15 = vcmp.eq.f32.partialorder %v1910_v58, 8.507059e+37 }
 0x397   :  { %v1785_v45 = vadd.f32 %v1784_v13, %v1736_v43  ;;  %v1918_v43 = vsub.f32 1.0, %v1917_v46 }
 0x399   :  { %v3116_v53 = vmul.f32 -1.442695, %v1785_v45  ;;  %v2230_v25 = vpack.c.bf16 %v1785_v45, %v1785_v45  ;;  %v3474_v13 = vpop.eup %3473  ;;  %v1919_v16 = vmul.f32 %v5086_v59, %v1918_v43  ;;  %v1928_v43 = vor.u32 1.1754944e-38, %v1927_v12 }
 0x39a   :  { %v3476_v28 = vpop.eup %3475  ;;  %v5126_v4 = vadd.f32 1.0, %v3474_v13 }
 0x39b   :  { %3477 = vpow2.f32 %v3116_v53  ;;  %v2310_v52 = vunpack.c.l.b16 %v2230_v25  ;;  %v2098_v53 = vmax.f32 %v1899_v23, 1e-06  ;;  %v5135_v25 = vadd.f32 1.0, %v3476_v28 }
 0x39c   :  { %3479 = vpow2.f32 %v3112_v60  ;;  %v1738_v54 = vpop.f32.mrf.mxu0  ;;  %v1913_v60 = vor.u32 1.1754944e-38, %v1912_v39  ;;  %v1920_v30 = vadd.f32 %v5086_v59, %v1919_v16  ;;  %vm2041_vm13 = vweird.f32 %v5126_v4 }
 0x39d   :  { %v1739_v32 = vadd.f32 %v4995_v57, %v1738_v54  ;;  %v2319_v20 = vpack.c.b16 %v2310_v52, %v2309_v37  ;;  %3481 = vpow2.f32 %v3114_v11  ;;  %v5145_v54 = vmin.f32 %v2098_v53, 0.999999 }
 0x39e   :  { %3483 = vrcp.f32 %v5088_v38  ;;  %v1914_v11 = vsel %vm1911_vm15, %v1913_v60, %v1909_v63  ;;  %v1924_v23 = vsel %vm5163_vm4, %v5086_v59, %v1920_v30  ;;  %v1957_v60 = vand.u32 2147483648, %v5068_v18 }
 0x39f   :  { %v1788_v35 = vadd.f32 %v1787_v1, %v1739_v32  ;;  %2550 = vmatmul.bf16.gmra.mxu0 %v2319_v20  ;;  %v2099_v41 = vmax.f32 %v1914_v11, 1e-06  ;;  %v1789_v1 = vpop.f32.mrf.mxu1  ;;  %v1932_v32 = vmul.f32 %v5090_v0, %v5052_v17  ;;  %vm2011_vm2 = vweird.f32 %v5135_v25 }
 0x3a1   :  { %v3478_v3 = vpop.eup %3477  ;;  %v3117_v50 = vmul.f32 -1.442695, %v1788_v35  ;;  %v5147_v7 = vmin.f32 %v2099_v41, 0.999999  ;;  %v2231_v34 = vpack.c.bf16 %v1788_v35, %v1788_v35  ;;  %v1933_v16 = vsub.f32 1.0, %v1932_v32 }
 0x3a2   :  { %v3480_v9 = vpop.eup %3479  ;;  %v5131_v45 = vadd.f32 1.0, %v3478_v3  ;;  %v1955_v41 = vand.u32 2147483647, %v5068_v18 }
 0x3a3   :  { %3485 = vpow2.f32 %v3117_v50  ;;  %v3482_v8 = vpop.eup %3481  ;;  %v5138_v37 = vadd.f32 1.0, %v3480_v9  ;;  %v2311_v3 = vunpack.c.l.b16 %v2231_v34  ;;  %v5201_v32 = vmul.f32 %v5090_v0, %v1933_v16 }
 0x3a4   :  { %3487 = vrcp.f32 %v5126_v4  ;;  %v1740_v26 = vpop.f32.mrf.mxu0  ;;  %v5149_v55 = vpop.eup %3483  ;;  %v5159_v39 = vadd.f32 1.0, %v3482_v8  ;;  %v1940_v8 = vand.u32 2147483647, %v5052_v17  ;;  %vm2056_vm1 = vweird.f32 %v5131_v45 }
 0x3a5   :  { %v1741_v52 = vadd.f32 %v4995_v57, %v1740_v26  ;;  %3489 = vrcp.f32 %v5131_v45  ;;  %v1925_v57 = vand.u32 2147483647, %v5043_v19 }
 0x3a6   :  { %3491 = vrcp.f32 %v5135_v25 }
 0x3a7   :  { %v1790_v13 = vadd.f32 %v1789_v1, %v1741_v52  ;;  %3493 = vrcp.f32 %v5138_v37  ;;  %vm1926_vm14 = vcmp.eq.f32.partialorder %v1925_v57, 8.507059e+37  ;;  %v5189_v52 = vor.u32 1.1754944e-38, %v1942_v51 }
 0x3a8   :  { %v5184_v11 = vsel %vm1926_vm14, %v1928_v43, %v1924_v23  ;;  %v2045_v57 = vand.u32 2147483647, %v5126_v4 }
 0x3a9   :  { %v3486_v58 = vpop.eup %3485  ;;  %v3118_v46 = vmul.f32 -1.442695, %v1790_v13  ;;  %v2232_v2 = vpack.c.bf16 %v1790_v13, %v1790_v13  ;;  %v5196_v13 = vor.u32 1.1754944e-38, %v1957_v60 }
 0x3aa   :  { %v5167_v19 = vpop.eup %3487  ;;  %v5169_v35 = vadd.f32 1.0, %v3486_v58  ;;  %vm5232_vm6 = vcmp.eq.f32.partialorder %v2045_v57, 8.507059e+37  ;;  %v2017_v57 = vand.u32 2147483648, %v5135_v25 }
 0x3ab   :  { %3495 = vpow2.f32 %v3118_v46  ;;  %v2312_v50 = vunpack.c.l.b16 %v2232_v2  ;;  %v5176_v9 = vpop.eup %3489  ;;  %v2037_v59 = vmul.f32 %v5167_v19, %v5126_v4  ;;  %vm2042_vm5 = vweird.f32 %v5167_v19 }
 0x3ac   :  { %3497 = vrcp.f32 %v5169_v35  ;;  %v5179_v63 = vpop.eup %3491  ;;  %v2077_v26 = vand.u32 2147483648, %v5169_v35  ;;  %v2075_v1 = vand.u32 2147483647, %v5169_v35  ;;  %v2052_v34 = vmul.f32 %v5176_v9, %v5131_v45  ;;  %vm5228_vm12 = vmor %vm2041_vm13, %vm2042_vm5 }
 0x3ad   :  { %3499 = vrcp.f32 %v5159_v39  ;;  %v2320_v53 = vpack.c.b16 %v2312_v50, %v2311_v3  ;;  %v5191_v12 = vpop.eup %3493  ;;  %v2038_v30 = vsub.f32 1.0, %v2037_v59  ;;  %vm2071_vm7 = vweird.f32 %v5169_v35 }
 0x3ae   :  { %v2053_v28 = vsub.f32 1.0, %v2052_v34  ;;  %v2007_v23 = vmul.f32 %v5179_v63, %v5135_v25  ;;  %v2078_v3 = vor.u32 1.1754944e-38, %v2077_v26  ;;  %v2047_v50 = vand.u32 2147483648, %v5126_v4 }
 0x3af   :  { %2555 = vmatmul.bf16.gmra.mxu0 %v2320_v53  ;;  %v2039_v2 = vmul.f32 %v5167_v19, %v2038_v30  ;;  %vm5216_vm8 = vcmp.eq.f32.partialorder %v2075_v1, 8.507059e+37  ;;  %vm2057_vm3 = vweird.f32 %v5176_v9  ;;  %v2060_v34 = vand.u32 2147483647, %v5131_v45 }
 0x3b0   :  { %v2054_v30 = vmul.f32 %v5176_v9, %v2053_v28  ;;  %v2008_v4 = vsub.f32 1.0, %v2007_v23  ;;  %v2048_v58 = vor.u32 1.1754944e-38, %v2047_v50  ;;  %vm5245_vm10 = vmor %vm2056_vm1, %vm2057_vm3  ;;  %v2015_v23 = vand.u32 2147483647, %v5135_v25 }
 0x3b1   :  { %v3496_v46 = vpop.eup %3495  ;;  %v2040_v59 = vadd.f32 %v5167_v19, %v2039_v2  ;;  %vm2012_vm15 = vweird.f32 %v5179_v63  ;;  %vm2061_vm9 = vcmp.eq.f32.partialorder %v2060_v34, 8.507059e+37  ;;  %v2030_v25 = vand.u32 2147483647, %v5159_v39 }
 0x3b2   :  { %v3498_v43 = vpop.eup %3497  ;;  %v5209_v51 = vadd.f32 1.0, %v3496_v46  ;;  %v2062_v46 = vand.u32 2147483648, %v5131_v45  ;;  %v2055_v47 = vadd.f32 %v5176_v9, %v2054_v30  ;;  %vm5276_vm13 = vmor %vm2011_vm2, %vm2012_vm15  ;;  %vm2026_vm1 = vweird.f32 %v5159_v39 }
 0x3b3   :  { %v5213_v60 = vpop.eup %3499  ;;  %v2067_v16 = vmul.f32 %v3498_v43, %v5169_v35  ;;  %v2044_v28 = vsel %vm5228_vm12, %v5167_v19, %v2040_v59  ;;  %vm2072_vm0 = vweird.f32 %v3498_v43  ;;  %v2009_v59 = vmul.f32 %v5179_v63, %v2008_v4 }
 0x3b4   :  { %3501 = vrcp.f32 %v5209_v51  ;;  %v2090_v20 = vand.u32 2147483647, %v5209_v51  ;;  %v2059_v19 = vsel %vm5245_vm10, %v5176_v9, %v2055_v47  ;;  %v2049_v50 = vsel %vm5232_vm6, %v2048_v58, %v2044_v28  ;;  %vm2073_vm11 = vmor %vm2071_vm7, %vm2072_vm0 }
 0x3b5   :  { %v2068_v2 = vsub.f32 1.0, %v2067_v16  ;;  %v2063_v30 = vor.u32 1.1754944e-38, %v2062_v46  ;;  %v2022_v45 = vmul.f32 %v5213_v60, %v5159_v39  ;;  %vm2086_vm4 = vweird.f32 %v5209_v51 }
 0x3b6   :  { %v2092_v9 = vand.u32 2147483648, %v5209_v51  ;;  %vm5268_vm14 = vcmp.eq.f32.partialorder %v2090_v20, 8.507059e+37  ;;  %v2108_v4 = vmax.f32 %v2049_v50, 1e-06  ;;  %vm2016_vm7 = vcmp.eq.f32.partialorder %v2015_v23, 8.507059e+37 }
 0x3b7   :  { %v2069_v16 = vmul.f32 %v3498_v43, %v2068_v2  ;;  %v2010_v2 = vadd.f32 %v5179_v63, %v2009_v59  ;;  %v2064_v58 = vsel %vm2061_vm9, %v2063_v30, %v2059_v19  ;;  %v2023_v1 = vsub.f32 1.0, %v2022_v45 }
 0x3b8   :  { %vm2027_vm5 = vweird.f32 %v5213_v60  ;;  %v2109_v59 = vmax.f32 %v2064_v58, 1e-06  ;;  %v2018_v50 = vor.u32 1.1754944e-38, %v2017_v57  ;;  %vm2031_vm12 = vcmp.eq.f32.partialorder %v2030_v25, 8.507059e+37 }
 0x3b9   :  { %v2070_v26 = vadd.f32 %v3498_v43, %v2069_v16  ;;  %v2014_v20 = vsel %vm5276_vm13, %v5179_v63, %v2010_v2  ;;  %vm2028_vm3 = vmor %vm2026_vm1, %vm2027_vm5  ;;  %v1977_v63 = vmul.f32 %v5149_v55, %v5088_v38  ;;  %v5295_v2 = vmin.f32 %v2108_v4, 0.999999 }
 0x3ba   :  { %v3502_v47 = vpop.eup %3501  ;;  %v5291_v23 = vsel %vm2016_vm7, %v2018_v50, %v2014_v20  ;;  %vm1937_vm6 = vweird.f32 %v5090_v0  ;;  %v1985_v20 = vand.u32 2147483647, %v5088_v38  ;;  %vm1936_vm10 = vweird.f32 %v5052_v17 }
 0x3bb   :  { %v2082_v46 = vmul.f32 %v3502_v47, %v5209_v51  ;;  %v2074_v28 = vsel %vm2073_vm11, %v3498_v43, %v2070_v26  ;;  %v2024_v43 = vmul.f32 %v5213_v60, %v2023_v1  ;;  %v2093_v26 = vor.u32 1.1754944e-38, %v2092_v9 }
 0x3bc   :  { %v2079_v16 = vsel %vm5216_vm8, %v2078_v3, %v2074_v28  ;;  %v2032_v3 = vand.u32 2147483648, %v5159_v39  ;;  %vm2087_vm8 = vweird.f32 %v3502_v47  ;;  %v1978_v28 = vsub.f32 1.0, %v1977_v63 }
 0x3bd   :  { %v2083_v19 = vsub.f32 1.0, %v2082_v46  ;;  %v2110_v30 = vmax.f32 %v2079_v16, 1e-06  ;;  %v2025_v45 = vadd.f32 %v5213_v60, %v2024_v43  ;;  %v5298_v46 = vmin.f32 %v2109_v59, 0.999999  ;;  %vm2088_vm0 = vmor %vm2086_vm4, %vm2087_vm8 }
 0x3be   :  { %v2033_v58 = vor.u32 1.1754944e-38, %v2032_v3  ;;  %v2106_v16 = vmax.f32 %v5291_v23, 1e-06  ;;  %v1992_v9 = vmul.f32 %v5191_v12, %v5138_v37  ;;  %v1987_v43 = vand.u32 2147483648, %v5088_v38 }
 0x3bf   :  { %v2084_v53 = vmul.f32 %v3502_v47, %v2083_v19  ;;  %v2029_v57 = vsel %vm2028_vm3, %v5213_v60, %v2025_v45  ;;  %v2126_v39 = vmin.f32 %v2110_v30, 0.999999  ;;  %v1979_v60 = vmul.f32 %v5149_v55, %v1978_v28 }
 0x3c0   :  { %v2034_v35 = vsel %vm2031_vm12, %v2033_v58, %v2029_v57  ;;  %vm1982_vm2 = vweird.f32 %v5149_v55  ;;  %v1993_v59 = vsub.f32 1.0, %v1992_v9  ;;  %vm1951_vm15 = vweird.f32 %v5068_v18 }
 0x3c1   :  { %v2085_v1 = vadd.f32 %v3502_v47, %v2084_v53  ;;  %v2107_v19 = vmax.f32 %v2034_v35, 1e-06  ;;  %v2000_v25 = vand.u32 2147483647, %v5138_v37  ;;  %v2002_v30 = vand.u32 2147483648, %v5138_v37 }
 0x3c2   :  { %vm5319_vm9 = vcmp.eq.f32.partialorder %v1940_v8, 8.507059e+37  ;;  %vm1981_vm11 = vweird.f32 %v5088_v38  ;;  %v1994_v34 = vmul.f32 %v5191_v12, %v1993_v59  ;;  %vm1997_vm4 = vweird.f32 %v5191_v12 }
 0x3c3   :  { %v2089_v4 = vsel %vm2088_vm0, %v3502_v47, %v2085_v1  ;;  %v1980_v47 = vadd.f32 %v5149_v55, %v1979_v60  ;;  %v1947_v3 = vmul.f32 %v5099_v48, %v5068_v18  ;;  %vm5334_vm13 = vmor %vm1981_vm11, %vm1982_vm2  ;;  %vm5338_vm7 = vcmp.eq.f32.partialorder %v1985_v20, 8.507059e+37 }
 0x3c4   :  { %v2094_v51 = vsel %vm5268_vm14, %v2093_v26, %v2089_v4  ;;  %vm5330_vm14 = vcmp.eq.f32.partialorder %v1955_v41, 8.507059e+37  ;;  %v1988_v63 = vor.u32 1.1754944e-38, %v1987_v43  ;;  %vm1996_vm5 = vweird.f32 %v5138_v37  ;;  %vm1938_vm0 = vmor %vm1936_vm10, %vm1937_vm6 }
 0x3c5   :  { %v2111_v50 = vmax.f32 %v2094_v51, 1e-06  ;;  %v1984_v26 = vsel %vm5334_vm13, %v5149_v55, %v1980_v47  ;;  %v1995_v41 = vadd.f32 %v5191_v12, %v1994_v34  ;;  %v1948_v57 = vsub.f32 1.0, %v1947_v3  ;;  %vm1998_vm1 = vmor %vm1996_vm5, %vm1997_vm4 }
 0x3c6   :  { %v1962_v58 = vmul.f32 %v5114_v10, %v5075_v61  ;;  %v2123_v28 = vmin.f32 %v2107_v19, 0.999999  ;;  %vm2001_vm8 = vcmp.eq.f32.partialorder %v2000_v25, 8.507059e+37  ;;  %v2003_v35 = vor.u32 1.1754944e-38, %v2002_v30 }
 0x3c7   :  { %v2127_v23 = vmin.f32 %v2111_v50, 0.999999  ;;  %v1999_v9 = vsel %vm1998_vm1, %v5191_v12, %v1995_v41  ;;  %v1949_v4 = vmul.f32 %v5099_v48, %v1948_v57  ;;  %vm1952_vm3 = vweird.f32 %v5099_v48  ;;  %v3575_v41 = vld [vmem:[#allocation2 + $0x30] sm:$0xff]  ;;  %v3576_v57 = vld [vmem:[#allocation2] sm:$0xff] }
 0x3c8   :  { %v1963_v37 = vsub.f32 1.0, %v1962_v58  ;;  %v1989_v55 = vsel %vm5338_vm7, %v1988_v63, %v1984_v26  ;;  %v2004_v60 = vsel %vm2001_vm8, %v2003_v35, %v1999_v9  ;;  %v1972_v20 = vand.u32 2147483648, %v5075_v61  ;;  %vm1953_vm2 = vmor %vm1951_vm15, %vm1952_vm3  ;;  %v3577_v58 = vld [vmem:[#allocation2 + $0x18] sm:$0xff]  ;;  %v3580_v35 = vld [vmem:[#allocation2 + $0x20] sm:$0xff] }
 0x3c9   :  { %v2135_v1 = vpack.c.bf16 %v2127_v23, %v2126_v39  ;;  %v1935_v39 = vadd.f32 %v5090_v0, %v5201_v32  ;;  %v1950_v43 = vadd.f32 %v5099_v48, %v1949_v4  ;;  %vm1967_vm12 = vweird.f32 %v5114_v10  ;;  %v3264_v9 = vld [vmem:[#allocation4 + $0x138] sm:$0xff] }
 0x3ca   :  { %v1964_v51 = vmul.f32 %v5114_v10, %v1963_v37  ;;  %v1970_v12 = vand.u32 2147483647, %v5075_v61  ;;  %v2134_v19 = vpack.c.bf16 %v5298_v46, %v5295_v2  ;;  %v2122_v59 = vmin.f32 %v2106_v16, 0.999999  ;;  %2463 = vmatpush.bf16.msra.mxu3 %v3264_v9  ;;  %v3260_v4 = vld [vmem:[#allocation4 + $0x118] sm:$0xff]  ;;  %v3259_v37 = vld [vmem:[#allocation4 + $0x110] sm:$0xff] }
 0x3cb   :  { %2136 = vmatpush.bf16.msra.mxu2 %v2135_v1  ;;  %v2105_v50 = vmax.f32 %v2004_v60, 1e-06  ;;  %v1939_v32 = vsel %vm1938_vm0, %v5090_v0, %v1935_v39  ;;  %v1954_v47 = vsel %vm1953_vm2, %v5099_v48, %v1950_v43  ;;  %vm1966_vm11 = vweird.f32 %v5075_v61  ;;  %v3578_v1 = vld [vmem:[#allocation2 + $0x10] sm:$0xff]  ;;  %v3258_v60 = vld [vmem:[#allocation4 + $0x108] sm:$0xff] }
 0x3cc   :  { %v1965_v25 = vadd.f32 %v5114_v10, %v1964_v51  ;;  %v1944_v17 = vsel %vm5319_vm9, %v5189_v52, %v1939_v32  ;;  %v2104_v2 = vmax.f32 %v1989_v55, 1e-06  ;;  %v1959_v46 = vsel %vm5330_vm14, %v5196_v13, %v1954_v47  ;;  %vm1968_vm6 = vmor %vm1966_vm11, %vm1967_vm12  ;;  %v3582_v55 = vld [vmem:[#allocation2 + $0x38] sm:$0xff] }
 0x3cd   :  { %v1973_v18 = vor.u32 1.1754944e-38, %v1972_v20  ;;  %v2101_v0 = vmax.f32 %v1944_v17, 1e-06  ;;  %v2133_v48 = vpack.c.bf16 %v2123_v28, %v2122_v59  ;;  %vm1971_vm10 = vcmp.eq.f32.partialorder %v1970_v12, 8.507059e+37  ;;  %v3579_v28 = vld [vmem:[#allocation2 + $0x8] sm:$0xff]  ;;  %v3257_v20 = vld [vmem:[#allocation4 + $0x100] sm:$0xff] }
 0x3ce   :  { %v1969_v16 = vsel %vm1968_vm6, %v5114_v10, %v1965_v25  ;;  %v2102_v61 = vmax.f32 %v1959_v46, 1e-06  ;;  %v2121_v30 = vmin.f32 %v2105_v50, 0.999999  ;;  %v5846_v52 = vmax.f32 %v5184_v11, 1e-06 }
 0x3cf   :  { %2137 = vmatpush.bf16.msra.mxu2 %v2134_v19  ;;  %v1974_v34 = vsel %vm1971_vm10, %v1973_v18, %v1969_v16  ;;  %v2117_v3 = vmin.f32 %v2101_v0, 0.999999  ;;  %v2120_v53 = vmin.f32 %v2104_v2, 0.999999  ;;  %v5847_v10 = vpack.c.bf16 %v5147_v7, %v5145_v54  ;;  %v3263_v54 = vld [vmem:[#allocation4 + $0x130] sm:$0xff]  ;;  %v3262_v7 = vld [vmem:[#allocation4 + $0x128] sm:$0xff] }
 0x3d0   :  { %v2116_v45 = vmin.f32 %v5846_v52, 0.999999  ;;  %v2103_v23 = vmax.f32 %v1974_v34, 1e-06  ;;  %v2118_v8 = vmin.f32 %v2102_v61, 0.999999  ;;  %v5848_v11 = vpack.c.bf16 %v5095_v33, %v5097_v56  ;;  %2464 = vmatpush.bf16.msra.mxu3 %v3263_v54 }
 0x3d1   :  { %v2132_v63 = vpack.c.bf16 %v2121_v30, %v2120_v53  ;;  %v3261_v33 = vld [vmem:[#allocation4 + $0x120] sm:$0xff]  ;;  %v3581_v56 = vld [vmem:[#allocation2 + $0x28] sm:$0xff] }
 0x3d2   :  { %v2130_v13 = vpack.c.bf16 %v2117_v3, %v2116_v45  ;;  %v2119_v38 = vmin.f32 %v2103_v23, 0.999999 }
 0x3d3   :  { %2138 = vmatpush.bf16.msra.mxu2 %v2133_v48 }
 0x3d4   :  { %v2131_v26 = vpack.c.bf16 %v2119_v38, %v2118_v8  ;;  %2465 = vmatpush.bf16.msra.mxu3 %v3262_v7 }
 0x3d7   :  { %2139 = vmatpush.bf16.msra.mxu2 %v2132_v63 }
 0x3d8   :  { %2466 = vmatpush.bf16.msra.mxu3 %v3261_v33 }
 0x3db   :  { %2140 = vmatpush.bf16.msra.mxu2 %v2131_v26 }
 0x3dc   :  { %2467 = vmatpush.bf16.msra.mxu3 %v3260_v4 }
 0x3df   :  { %2141 = vmatpush.bf16.msra.mxu2 %v2130_v13 }
 0x3e0   :  { %2468 = vmatpush.bf16.msra.mxu3 %v3259_v37 }
 0x3e3   :  { %2142 = vmatpush.bf16.msra.mxu2 %v5847_v10 }
 0x3e4   :  { %2469 = vmatpush.bf16.msra.mxu3 %v3258_v60  ;;  %v3279_v60 = vld [vmem:[%s5641_s5 + $0x30] sm:$0xff] }
 0x3e7   :  { %2143 = vmatpush.bf16.msra.mxu2 %v5848_v11 }
 0x3e8   :  { %2470 = vmatpush.bf16.msra.mxu3 %v3257_v20 }
 0x3ea   :  { %2144 = vmatmul.bf16.vlgmr.msra.gmra.mxu2 %v3575_v41 }
 0x3fa   :  { %2149 = vmatmul.bf16.gmra.mxu2 %v3576_v57 }
 0x40a   :  { %2154 = vmatmul.bf16.gmra.mxu2 %v3577_v58 }
 0x41a   :  { %2159 = vmatmul.bf16.gmra.mxu2 %v3578_v1 }
 0x42a   :  { %2164 = vmatmul.bf16.gmra.mxu2 %v3579_v28 }
 0x43a   :  { %2169 = vmatmul.bf16.gmra.mxu2 %v3580_v35 }
 0x44a   :  { %2174 = vmatmul.bf16.gmra.mxu2 %v3581_v56 }
 0x45a   :  { %2179 = vmatmul.bf16.gmra.mxu2 %v3582_v55 }
 0x46d   :  { %v2145_v39 = vpop.f32.mrf.mxu2 }
 0x46e   :  { %v2185_v43 = vmul.f32 %v2145_v39, %v4396_v14 }
 0x470   :  { %v2201_v12 = vpack.c.bf16 %v2185_v43, %v2185_v43 }
 0x472   :  { %v2249_v50 = vunpack.c.l.b16 %v2201_v12  ;;  %v3277_v12 = vld [vmem:[%s5641_s5 + $0x20] sm:$0xff] }
 0x475   :  { %v2147_v51 = vpop.f32.mrf.mxu2 }
 0x476   :  { %v2186_v19 = vmul.f32 %v2147_v51, %v4407_v44 }
 0x478   :  { %v2202_v59 = vpack.c.bf16 %v2186_v19, %v2186_v19 }
 0x47a   :  { %v2250_v32 = vunpack.c.l.b16 %v2202_v59 }
 0x47c   :  { %v2265_v47 = vpack.c.b16 %v2250_v32, %v2249_v50 }
 0x47d   :  { %v2150_v25 = vpop.f32.mrf.mxu2 }
 0x47e   :  { %2471 = vmatmul.bf16.vlgmr.msra.gmra.mxu3 %v2265_v47  ;;  %v2187_v17 = vmul.f32 %v2150_v25, %v4416_v40  ;;  %v3276_v47 = vld [vmem:[%s5641_s5 + $0x18] sm:$0xff]  ;;  %v2521_v25 = vpop.f32.mrf.mxu0 }
 0x480   :  { %v2203_v46 = vpack.c.bf16 %v2187_v17, %v2187_v17 }
 0x482   :  { %v2251_v48 = vunpack.c.l.b16 %v2203_v46  ;;  %v3275_v46 = vld [vmem:[%s5641_s5 + $0x10] sm:$0xff] }
 0x485   :  { %v2152_v2 = vpop.f32.mrf.mxu2 }
 0x486   :  { %v2188_v18 = vmul.f32 %v2152_v2, %v4425_v62 }
 0x488   :  { %v2204_v0 = vpack.c.bf16 %v2188_v18, %v2188_v18 }
 0x48a   :  { %v2252_v16 = vunpack.c.l.b16 %v2204_v0 }
 0x48c   :  { %v2266_v14 = vpack.c.b16 %v2252_v16, %v2251_v48 }
 0x48d   :  { %v2155_v61 = vpop.f32.mrf.mxu2 }
 0x48e   :  { %2476 = vmatmul.bf16.gmra.mxu3 %v2266_v14  ;;  %v2189_v44 = vmul.f32 %v2155_v61, %v4432_v42  ;;  %v2523_v14 = vpop.f32.mrf.mxu0 }
 0x490   :  { %v2205_v34 = vpack.c.bf16 %v2189_v44, %v2189_v44 }
 0x492   :  { %v2253_v3 = vunpack.c.l.b16 %v2205_v34  ;;  %v5435_v34 = vld [vmem:[%s5640_s4 + $0x2] ss:$0 sm:$0xff] }
 0x495   :  { %v2157_v30 = vpop.f32.mrf.mxu2 }
 0x496   :  { %v2190_v52 = vmul.f32 %v2157_v30, %v4439_v29  ;;  %v2526_v61 = vpop.f32.mrf.mxu0 }
 0x498   :  { %v2206_v45 = vpack.c.bf16 %v2190_v52, %v2190_v52 }
 0x49a   :  { %v2254_v23 = vunpack.c.l.b16 %v2206_v45 }
 0x49c   :  { %v2267_v40 = vpack.c.b16 %v2254_v23, %v2253_v3 }
 0x49d   :  { %v2160_v53 = vpop.f32.mrf.mxu2 }
 0x49e   :  { %2481 = vmatmul.bf16.gmra.mxu3 %v2267_v40  ;;  %v2191_v62 = vmul.f32 %v2160_v53, %v4446_v36  ;;  %v2528_v30 = vpop.f32.mrf.mxu0 }
 0x4a0   :  { %v2207_v8 = vpack.c.bf16 %v2191_v62, %v2191_v62 }
 0x4a2   :  { %v2255_v26 = vunpack.c.l.b16 %v2207_v8 }
 0x4a5   :  { %v2162_v13 = vpop.f32.mrf.mxu2 }
 0x4a6   :  { %v2192_v38 = vmul.f32 %v2162_v13, %v4449_v21  ;;  %v2531_v53 = vpop.f32.mrf.mxu0 }
 0x4a8   :  { %v2208_v63 = vpack.c.bf16 %v2192_v38, %v2192_v38 }
 0x4aa   :  { %v2256_v10 = vunpack.c.l.b16 %v2208_v63 }
 0x4ac   :  { %v2268_v42 = vpack.c.b16 %v2256_v10, %v2255_v26 }
 0x4ad   :  { %v2165_v11 = vpop.f32.mrf.mxu2 }
 0x4ae   :  { %2486 = vmatmul.bf16.gmra.mxu3 %v2268_v42  ;;  %v2193_v29 = vmul.f32 %v2165_v11, %v4394_v6  ;;  %v2533_v8 = vpop.f32.mrf.mxu0 }
 0x4b0   :  { %v2209_v57 = vpack.c.bf16 %v2193_v29, %v2193_v29 }
 0x4b2   :  { %v2257_v28 = vunpack.c.l.b16 %v2209_v57 }
 0x4b5   :  { %v2167_v41 = vpop.f32.mrf.mxu2 }
 0x4b6   :  { %v2194_v58 = vmul.f32 %v2167_v41, %v4401_v22  ;;  %v3280_v22 = vld [vmem:[%s5641_s5 + $0x38] sm:$0xff]  ;;  %v2536_v29 = vpop.f32.mrf.mxu0 }
 0x4b7   :  { %2637 = vmatpush.bf16.msra.mxu1 %v3280_v22 }
 0x4b8   :  { %v2210_v1 = vpack.c.bf16 %v2194_v58, %v2194_v58 }
 0x4ba   :  { %v2258_v35 = vunpack.c.l.b16 %v2210_v1 }
 0x4bb   :  { %2638 = vmatpush.bf16.msra.mxu1 %v3279_v60 }
 0x4bc   :  { %v2269_v36 = vpack.c.b16 %v2258_v35, %v2257_v28 }
 0x4bd   :  { %v2170_v9 = vpop.f32.mrf.mxu2 }
 0x4be   :  { %2491 = vmatmul.bf16.gmra.mxu3 %v2269_v36  ;;  %v2195_v21 = vmul.f32 %v2170_v9, %v4398_v15  ;;  %v2538_v28 = vpop.f32.mrf.mxu0 }
 0x4c0   :  { %v2211_v7 = vpack.c.bf16 %v2195_v21, %v2195_v21 }
 0x4c2   :  { %v2259_v4 = vunpack.c.l.b16 %v2211_v7 }
 0x4c5   :  { %v2172_v54 = vpop.f32.mrf.mxu2 }
 0x4c6   :  { %v2196_v33 = vmul.f32 %v2172_v54, %v4410_v49  ;;  %v3278_v49 = vld [vmem:[%s5641_s5 + $0x28] sm:$0xff]  ;;  %v2541_v54 = vpop.f32.mrf.mxu0 }
 0x4c7   :  { %2639 = vmatpush.bf16.msra.mxu1 %v3278_v49 }
 0x4c8   :  { %v2212_v56 = vpack.c.bf16 %v2196_v33, %v2196_v33 }
 0x4ca   :  { %v2260_v37 = vunpack.c.l.b16 %v2212_v56 }
 0x4cb   :  { %2640 = vmatpush.bf16.msra.mxu1 %v3277_v12 }
 0x4cc   :  { %v2270_v6 = vpack.c.b16 %v2260_v37, %v2259_v4 }
 0x4cd   :  { %v2175_v55 = vpop.f32.mrf.mxu2 }
 0x4ce   :  { %2496 = vmatmul.bf16.gmra.mxu3 %v2270_v6  ;;  %v2197_v15 = vmul.f32 %v2175_v55, %v5816_v24  ;;  %v2543_v55 = vpop.f32.mrf.mxu0 }
 0x4cf   :  { %2641 = vmatpush.bf16.msra.mxu1 %v3276_v47 }
 0x4d0   :  { %v2213_v39 = vpack.c.bf16 %v2197_v15, %v2197_v15 }
 0x4d2   :  { %v2261_v19 = vunpack.c.l.b16 %v2213_v39 }
 0x4d3   :  { %2642 = vmatpush.bf16.msra.mxu1 %v3275_v46 }
 0x4d5   :  { %v2177_v20 = vpop.f32.mrf.mxu2 }
 0x4d6   :  { %v2198_v43 = vmul.f32 %v2177_v20, %v5817_v5  ;;  %v2546_v15 = vpop.f32.mrf.mxu0 }
 0x4d8   :  { %v2214_v51 = vpack.c.bf16 %v2198_v43, %v2198_v43 }
 0x4da   :  { %v2262_v59 = vunpack.c.l.b16 %v2214_v51 }
 0x4dc   :  { %v2271_v50 = vpack.c.b16 %v2262_v59, %v2261_v19 }
 0x4dd   :  { %v2180_v24 = vpop.f32.mrf.mxu2 }
 0x4de   :  { %2501 = vmatmul.bf16.gmra.mxu3 %v2271_v50  ;;  %v2199_v32 = vmul.f32 %v2180_v24, %v5818_v27  ;;  %v3274_v27 = vld [vmem:[%s5641_s5 + $0x8] sm:$0xff]  ;;  %v2548_v19 = vpop.f32.mrf.mxu0 }
 0x4df   :  { %2643 = vmatpush.bf16.msra.mxu1 %v3274_v27 }
 0x4e0   :  { %v2215_v17 = vpack.c.bf16 %v2199_v32, %v2199_v32 }
 0x4e2   :  { %v2263_v0 = vunpack.c.l.b16 %v2215_v17 }
 0x4e5   :  { %v2182_v5 = vpop.f32.mrf.mxu2 }
 0x4e6   :  { %v2200_v2 = vmul.f32 %v2182_v5, %v5819_v31  ;;  %v3273_v31 = vld [vmem:[%s5641_s5] sm:$0xff] }
 0x4e7   :  { %2644 = vmatpush.bf16.msra.mxu1 %v3273_v31 }
 0x4e8   :  { %v2216_v18 = vpack.c.bf16 %v2200_v2, %v2200_v2 }
 0x4ea   :  { %v2264_v48 = vunpack.c.l.b16 %v2216_v18 }
 0x4ec   :  { %v2272_v16 = vpack.c.b16 %v2264_v48, %v2263_v0 }
 0x4ee   :  { %2506 = vmatmul.bf16.gmra.mxu3 %v2272_v16 }
 0x501   :  { %v2472_v44 = vpop.f32.mrf.mxu3 }
 0x502   :  { %v2473_v52 = vadd.f32 %v5435_v34, %v2472_v44 }
 0x504   :  { %v2522_v23 = vadd.f32 %v2521_v25, %v2473_v52  ;;  %v2551_v25 = vpop.f32.mrf.mxu0 }
 0x509   :  { %v2474_v45 = vpop.f32.mrf.mxu3 }
 0x50a   :  { %v2475_v3 = vadd.f32 %v5435_v34, %v2474_v45 }
 0x50c   :  { %v2524_v40 = vadd.f32 %v2523_v14, %v2475_v3  ;;  %v2553_v2 = vpop.f32.mrf.mxu0 }
 0x50e   :  { %v2561_v62 = vpack.c.bf16 %v2524_v40, %v2522_v23  ;;  %v2686_v40 = vlaneseq }
 0x510   :  { %2645 = vmatmul.bf16.vlgmr.msra.gmra.mxu1 %v2561_v62  ;;  %v5458_v62 = vld [vmem:[%s5642_s6] ss:$0 sm:$0xff]  ;;  %s3641_s6 = smov [#allocation7]  }
 0x511   :  { %v2477_v13 = vpop.f32.mrf.mxu3  ;;  %s2885_s10 = sshll.u32 %s3641_s6, 4  ;;  %s2886_s10 = int_to_ptr.vmem [resolvable:$true] %s2885_s10 }
 0x512   :  { %v2478_v38 = vadd.f32 %v5435_v34, %v2477_v13 }
 0x514   :  { %v2527_v10 = vadd.f32 %v2526_v61, %v2478_v38  ;;  %v2556_v14 = vpop.f32.mrf.mxu0 }
 0x519   :  { %v2479_v63 = vpop.f32.mrf.mxu3 }
 0x51a   :  { %v2480_v26 = vadd.f32 %v5435_v34, %v2479_v63 }
 0x51c   :  { %v2529_v42 = vadd.f32 %v2528_v30, %v2480_v26  ;;  %v2558_v52 = vpop.f32.mrf.mxu0 }
 0x51e   :  { %v2562_v11 = vpack.c.bf16 %v2529_v42, %v2527_v10 }
 0x520   :  { %2650 = vmatmul.bf16.gmra.mxu1 %v2562_v11 }
 0x521   :  { %v2482_v41 = vpop.f32.mrf.mxu3 }
 0x522   :  { %v2483_v57 = vadd.f32 %v5435_v34, %v2482_v41 }
 0x524   :  { %v2532_v35 = vadd.f32 %v2531_v53, %v2483_v57  ;;  %v5453_v53 = vand.u32 127, %v2686_v40 }
 0x526   :  { %vm2688_vm15 = vcmp.lt.s32.totalorder %v5453_v53, 8 }
 0x529   :  { %v2484_v58 = vpop.f32.mrf.mxu3 }
 0x52a   :  { %v2485_v1 = vadd.f32 %v5435_v34, %v2484_v58 }
 0x52c   :  { %v2534_v36 = vadd.f32 %v2533_v8, %v2485_v1 }
 0x52e   :  { %v2563_v9 = vpack.c.bf16 %v2534_v36, %v2532_v35 }
 0x530   :  { %2655 = vmatmul.bf16.gmra.mxu1 %v2563_v9 }
 0x531   :  { %v2487_v21 = vpop.f32.mrf.mxu3 }
 0x532   :  { %v2488_v7 = vadd.f32 %v5435_v34, %v2487_v21 }
 0x534   :  { %v2537_v4 = vadd.f32 %v2536_v29, %v2488_v7 }
 0x539   :  { %v2489_v33 = vpop.f32.mrf.mxu3 }
 0x53a   :  { %v2490_v56 = vadd.f32 %v5435_v34, %v2489_v33 }
 0x53c   :  { %v2539_v37 = vadd.f32 %v2538_v28, %v2490_v56 }
 0x53e   :  { %v2564_v6 = vpack.c.bf16 %v2539_v37, %v2537_v4 }
 0x540   :  { %2660 = vmatmul.bf16.gmra.mxu1 %v2564_v6 }
 0x541   :  { %v2492_v22 = vpop.f32.mrf.mxu3 }
 0x542   :  { %v2493_v60 = vadd.f32 %v5435_v34, %v2492_v22 }
 0x544   :  { %v2542_v39 = vadd.f32 %v2541_v54, %v2493_v60 }
 0x549   :  { %v2494_v49 = vpop.f32.mrf.mxu3 }
 0x54a   :  { %v2495_v20 = vadd.f32 %v5435_v34, %v2494_v49 }
 0x54c   :  { %v2544_v43 = vadd.f32 %v2543_v55, %v2495_v20 }
 0x54e   :  { %v2565_v51 = vpack.c.bf16 %v2544_v43, %v2542_v39 }
 0x550   :  { %2665 = vmatmul.bf16.gmra.mxu1 %v2565_v51 }
 0x551   :  { %v2497_v12 = vpop.f32.mrf.mxu3 }
 0x552   :  { %v2498_v59 = vadd.f32 %v5435_v34, %v2497_v12 }
 0x554   :  { %v2547_v32 = vadd.f32 %v2546_v15, %v2498_v59 }
 0x559   :  { %v2499_v50 = vpop.f32.mrf.mxu3 }
 0x55a   :  { %v2500_v24 = vadd.f32 %v5435_v34, %v2499_v50 }
 0x55c   :  { %v2549_v47 = vadd.f32 %v2548_v19, %v2500_v24 }
 0x55e   :  { %v2566_v5 = vpack.c.bf16 %v2549_v47, %v2547_v32 }
 0x560   :  { %2670 = vmatmul.bf16.gmra.mxu1 %v2566_v5 }
 0x561   :  { %v2502_v17 = vpop.f32.mrf.mxu3 }
 0x562   :  { %v2503_v46 = vadd.f32 %v5435_v34, %v2502_v17 }
 0x564   :  { %v2552_v48 = vadd.f32 %v2551_v25, %v2503_v46 }
 0x569   :  { %v2504_v18 = vpop.f32.mrf.mxu3 }
 0x56a   :  { %v2505_v0 = vadd.f32 %v5435_v34, %v2504_v18 }
 0x56c   :  { %v2554_v16 = vadd.f32 %v2553_v2, %v2505_v0 }
 0x56e   :  { %v2567_v27 = vpack.c.bf16 %v2554_v16, %v2552_v48 }
 0x570   :  { %2675 = vmatmul.bf16.gmra.mxu1 %v2567_v27 }
 0x571   :  { %v2507_v31 = vpop.f32.mrf.mxu3 }
 0x572   :  { %v2508_v61 = vadd.f32 %v5435_v34, %v2507_v31 }
 0x574   :  { %v2557_v45 = vadd.f32 %v2556_v14, %v2508_v61 }
 0x579   :  { %v2509_v44 = vpop.f32.mrf.mxu3 }
 0x57a   :  { %v2510_v30 = vadd.f32 %v5435_v34, %v2509_v44 }
 0x57c   :  { %v2559_v3 = vadd.f32 %v2558_v52, %v2510_v30 }
 0x57e   :  { %v2568_v23 = vpack.c.bf16 %v2559_v3, %v2557_v45 }
 0x580   :  { %2680 = vmatmul.bf16.gmra.mxu1 %v2568_v23 }
 0x58d   :  { %v2646_v13 = vpop.f32.mrf.mxu1 }
 0x58e   :  { %v2647_v8 = vadd.f32 %v5458_v62, %v2646_v13 }
 0x590   :  { %v2689_v34 = vsel %vm2688_vm15, %v2647_v8, -1e+30 }
 0x591   :  { %2705 = vmax.xlane.f32.xlu1 %v2689_v34 }
 0x595   :  { %v2648_v38 = vpop.f32.mrf.mxu1 }
 0x596   :  { %v2649_v63 = vadd.f32 %v5458_v62, %v2648_v38 }
 0x598   :  { %v5467_v26 = vsel %vm2688_vm15, %v2649_v63, -1e+30 }
 0x599   :  { %2707 = vmax.xlane.f32.xlu2 %v5467_v26 }
 0x59d   :  { %v2651_v10 = vpop.f32.mrf.mxu1 }
 0x59e   :  { %v2652_v42 = vadd.f32 %v5458_v62, %v2651_v10 }
 0x5a0   :  { %v5473_v11 = vsel %vm2688_vm15, %v2652_v42, -1e+30 }
 0x5a1   :  { %2709 = vmax.xlane.f32.xlu0 %v5473_v11 }
 0x5a5   :  { %v2653_v29 = vpop.f32.mrf.mxu1 }
 0x5a6   :  { %v2654_v41 = vadd.f32 %v5458_v62, %v2653_v29 }
 0x5a8   :  { %v5479_v57 = vsel %vm2688_vm15, %v2654_v41, -1e+30 }
 0x5a9   :  { %2711 = vmax.xlane.f32.xlu2 %v5479_v57 }
 0x5ad   :  { %v2656_v58 = vpop.f32.mrf.mxu1 }
 0x5ae   :  { %v2657_v1 = vadd.f32 %v5458_v62, %v2656_v58 }
 0x5b0   :  { %v5485_v28 = vsel %vm2688_vm15, %v2657_v1, -1e+30 }
 0x5b1   :  { %2713 = vmax.xlane.f32.xlu1 %v5485_v28 }
 0x5b5   :  { %v2658_v35 = vpop.f32.mrf.mxu1 }
 0x5b6   :  { %v2659_v36 = vadd.f32 %v5458_v62, %v2658_v35 }
 0x5b8   :  { %v5491_v9 = vsel %vm2688_vm15, %v2659_v36, -1e+30 }
 0x5b9   :  { %2715 = vmax.xlane.f32.xlu2 %v5491_v9 }
 0x5bd   :  { %v2661_v21 = vpop.f32.mrf.mxu1 }
 0x5be   :  { %v2662_v54 = vadd.f32 %v5458_v62, %v2661_v21 }
 0x5c0   :  { %v5497_v7 = vsel %vm2688_vm15, %v2662_v54, -1e+30 }
 0x5c1   :  { %2717 = vmax.xlane.f32.xlu0 %v5497_v7 }
 0x5c5   :  { %v2663_v33 = vpop.f32.mrf.mxu1 }
 0x5c6   :  { %v2664_v56 = vadd.f32 %v5458_v62, %v2663_v33 }
 0x5c8   :  { %v5503_v4 = vsel %vm2688_vm15, %v2664_v56, -1e+30 }
 0x5c9   :  { %2719 = vmax.xlane.f32.xlu1 %v5503_v4 }
 0x5cd   :  { %v2666_v37 = vpop.f32.mrf.mxu1 }
 0x5ce   :  { %v2667_v6 = vadd.f32 %v5458_v62, %v2666_v37 }
 0x5d0   :  { %v5509_v55 = vsel %vm2688_vm15, %v2667_v6, -1e+30 }
 0x5d1   :  { %2721 = vmax.xlane.f32.xlu2 %v5509_v55 }
 0x5d5   :  { %v2668_v22 = vpop.f32.mrf.mxu1 }
 0x5d6   :  { %v2669_v60 = vadd.f32 %v5458_v62, %v2668_v22 }
 0x5d8   :  { %v5515_v15 = vsel %vm2688_vm15, %v2669_v60, -1e+30 }
 0x5d9   :  { %2723 = vmax.xlane.f32.xlu0 %v5515_v15 }
 0x5dd   :  { %v2671_v49 = vpop.f32.mrf.mxu1 }
 0x5de   :  { %v2672_v20 = vadd.f32 %v5458_v62, %v2671_v49 }
 0x5e0   :  { %v5521_v39 = vsel %vm2688_vm15, %v2672_v20, -1e+30 }
 0x5e1   :  { %2725 = vmax.xlane.f32.xlu1 %v5521_v39 }
 0x5e5   :  { %v2673_v43 = vpop.f32.mrf.mxu1 }
 0x5e6   :  { %v2674_v51 = vadd.f32 %v5458_v62, %v2673_v43 }
 0x5e8   :  { %v5527_v12 = vsel %vm2688_vm15, %v2674_v51, -1e+30 }
 0x5e9   :  { %2727 = vmax.xlane.f32.xlu2 %v5527_v12 }
 0x5ed   :  { %v2676_v19 = vpop.f32.mrf.mxu1 }
 0x5ee   :  { %v2677_v59 = vadd.f32 %v5458_v62, %v2676_v19 }
 0x5f0   :  { %v5533_v50 = vsel %vm2688_vm15, %v2677_v59, -1e+30 }
 0x5f1   :  { %2729 = vmax.xlane.f32.xlu0 %v5533_v50 }
 0x5f5   :  { %v2678_v24 = vpop.f32.mrf.mxu1 }
 0x5f6   :  { %v2679_v32 = vadd.f32 %v5458_v62, %v2678_v24 }
 0x5f8   :  { %v5539_v47 = vsel %vm2688_vm15, %v2679_v32, -1e+30 }
 0x5f9   :  { %2731 = vmax.xlane.f32.xlu1 %v5539_v47 }
 0x5fd   :  { %v2681_v25 = vpop.f32.mrf.mxu1 }
 0x5fe   :  { %v2682_v5 = vadd.f32 %v5458_v62, %v2681_v25 }
 0x600   :  { %v5545_v17 = vsel %vm2688_vm15, %v2682_v5, -1e+30 }
 0x601   :  { %2733 = vmax.xlane.f32.xlu2 %v5545_v17 }
 0x604   :  { %v2706_v2 = vpop.xlane.xlu1 %2705 }
 0x605   :  { %v5548_v46 = vsub.f32 %v2689_v34, %v2706_v2  ;;  %v2683_v18 = vpop.f32.mrf.mxu1 }
 0x606   :  { %v2684_v0 = vadd.f32 %v5458_v62, %v2683_v18 }
 0x607   :  { %v2753_v48 = vmul.f32 1.442695, %v5548_v46 }
 0x608   :  { %v5554_v16 = vsel %vm2688_vm15, %v2684_v0, -1e+30 }
 0x609   :  { %3503 = vpow2.f32 %v2753_v48  ;;  %2735 = vmax.xlane.f32.xlu0 %v5554_v16 }
 0x60c   :  { %v2708_v27 = vpop.xlane.xlu2 %2707 }
 0x60d   :  { %v5558_v14 = vsub.f32 %v5467_v26, %v2708_v27 }
 0x60f   :  { %v3504_v31 = vpop.eup %3503  ;;  %v2755_v61 = vmul.f32 1.442695, %v5558_v14 }
 0x610   :  { %2785 = vadd.xlane.f32.xlu1 %v3504_v31 }
 0x611   :  { %3505 = vpow2.f32 %v2755_v61 }
 0x614   :  { %v2710_v44 = vpop.xlane.xlu0 %2709 }
 0x615   :  { %v5562_v30 = vsub.f32 %v5473_v11, %v2710_v44 }
 0x617   :  { %v3506_v52 = vpop.eup %3505  ;;  %v2757_v45 = vmul.f32 1.442695, %v5562_v30 }
 0x618   :  { %2787 = vadd.xlane.f32.xlu2 %v3506_v52 }
 0x619   :  { %3507 = vpow2.f32 %v2757_v45 }
 0x61c   :  { %v2712_v3 = vpop.xlane.xlu2 %2711 }
 0x61d   :  { %v5566_v23 = vsub.f32 %v5479_v57, %v2712_v3 }
 0x61f   :  { %v3508_v40 = vpop.eup %3507  ;;  %v2759_v53 = vmul.f32 1.442695, %v5566_v23 }
 0x620   :  { %2789 = vadd.xlane.f32.xlu0 %v3508_v40 }
 0x621   :  { %3509 = vpow2.f32 %v2759_v53 }
 0x624   :  { %v2714_v62 = vpop.xlane.xlu1 %2713 }
 0x625   :  { %v5570_v13 = vsub.f32 %v5485_v28, %v2714_v62 }
 0x627   :  { %v3510_v8 = vpop.eup %3509  ;;  %v2761_v34 = vmul.f32 1.442695, %v5570_v13 }
 0x628   :  { %2791 = vadd.xlane.f32.xlu1 %v3510_v8 }
 0x629   :  { %3511 = vpow2.f32 %v2761_v34 }
 0x62c   :  { %v2716_v38 = vpop.xlane.xlu2 %2715 }
 0x62d   :  { %v5574_v63 = vsub.f32 %v5491_v9, %v2716_v38 }
 0x62f   :  { %v3512_v26 = vpop.eup %3511  ;;  %v2763_v10 = vmul.f32 1.442695, %v5574_v63 }
 0x630   :  { %2793 = vadd.xlane.f32.xlu2 %v3512_v26 }
 0x631   :  { %3513 = vpow2.f32 %v2763_v10 }
 0x634   :  { %v2718_v42 = vpop.xlane.xlu0 %2717 }
 0x635   :  { %v5578_v11 = vsub.f32 %v5497_v7, %v2718_v42 }
 0x637   :  { %v3514_v29 = vpop.eup %3513  ;;  %v2765_v41 = vmul.f32 1.442695, %v5578_v11 }
 0x638   :  { %2795 = vadd.xlane.f32.xlu0 %v3514_v29 }
 0x639   :  { %3515 = vpow2.f32 %v2765_v41 }
 0x63c   :  { %v2720_v57 = vpop.xlane.xlu1 %2719 }
 0x63d   :  { %v5582_v58 = vsub.f32 %v5503_v4, %v2720_v57 }
 0x63f   :  { %v3516_v1 = vpop.eup %3515  ;;  %v2767_v28 = vmul.f32 1.442695, %v5582_v58 }
 0x640   :  { %2797 = vadd.xlane.f32.xlu1 %v3516_v1 }
 0x641   :  { %3517 = vpow2.f32 %v2767_v28 }
 0x644   :  { %v2722_v35 = vpop.xlane.xlu2 %2721 }
 0x645   :  { %v5586_v36 = vsub.f32 %v5509_v55, %v2722_v35 }
 0x647   :  { %v3518_v9 = vpop.eup %3517  ;;  %v2769_v21 = vmul.f32 1.442695, %v5586_v36 }
 0x648   :  { %2799 = vadd.xlane.f32.xlu2 %v3518_v9 }
 0x649   :  { %3519 = vpow2.f32 %v2769_v21 }
 0x64c   :  { %v2724_v54 = vpop.xlane.xlu0 %2723 }
 0x64d   :  { %v5590_v7 = vsub.f32 %v5515_v15, %v2724_v54 }
 0x64f   :  { %v3520_v33 = vpop.eup %3519  ;;  %v2771_v56 = vmul.f32 1.442695, %v5590_v7 }
 0x650   :  { %2801 = vadd.xlane.f32.xlu0 %v3520_v33 }
 0x651   :  { %3521 = vpow2.f32 %v2771_v56 }
 0x654   :  { %v2726_v4 = vpop.xlane.xlu1 %2725 }
 0x655   :  { %v5594_v37 = vsub.f32 %v5521_v39, %v2726_v4 }
 0x657   :  { %v3522_v6 = vpop.eup %3521  ;;  %v2773_v55 = vmul.f32 1.442695, %v5594_v37 }
 0x658   :  { %2803 = vadd.xlane.f32.xlu1 %v3522_v6 }
 0x659   :  { %3523 = vpow2.f32 %v2773_v55 }
 0x65c   :  { %v2728_v22 = vpop.xlane.xlu2 %2727 }
 0x65d   :  { %v5598_v60 = vsub.f32 %v5527_v12, %v2728_v22 }
 0x65f   :  { %v3524_v15 = vpop.eup %3523  ;;  %v2775_v49 = vmul.f32 1.442695, %v5598_v60 }
 0x660   :  { %2805 = vadd.xlane.f32.xlu2 %v3524_v15 }
 0x661   :  { %3525 = vpow2.f32 %v2775_v49 }
 0x664   :  { %v2730_v20 = vpop.xlane.xlu0 %2729 }
 0x665   :  { %v5602_v43 = vsub.f32 %v5533_v50, %v2730_v20 }
 0x667   :  { %v3526_v39 = vpop.eup %3525  ;;  %v2777_v51 = vmul.f32 1.442695, %v5602_v43 }
 0x668   :  { %2807 = vadd.xlane.f32.xlu0 %v3526_v39 }
 0x669   :  { %3527 = vpow2.f32 %v2777_v51 }
 0x66c   :  { %v2732_v19 = vpop.xlane.xlu1 %2731 }
 0x66d   :  { %v5606_v59 = vsub.f32 %v5539_v47, %v2732_v19 }
 0x66f   :  { %v3528_v12 = vpop.eup %3527  ;;  %v2779_v24 = vmul.f32 1.442695, %v5606_v59 }
 0x670   :  { %2809 = vadd.xlane.f32.xlu1 %v3528_v12 }
 0x671   :  { %3529 = vpow2.f32 %v2779_v24 }
 0x674   :  { %v2734_v32 = vpop.xlane.xlu2 %2733 }
 0x675   :  { %v5610_v25 = vsub.f32 %v5545_v17, %v2734_v32 }
 0x677   :  { %v3530_v50 = vpop.eup %3529  ;;  %v2781_v5 = vmul.f32 1.442695, %v5610_v25 }
 0x678   :  { %2811 = vadd.xlane.f32.xlu2 %v3530_v50 }
 0x679   :  { %3531 = vpow2.f32 %v2781_v5 }
 0x67c   :  { %v2736_v2 = vpop.xlane.xlu0 %2735 }
 0x67d   :  { %v5614_v18 = vsub.f32 %v5554_v16, %v2736_v2 }
 0x67f   :  { %v3532_v47 = vpop.eup %3531  ;;  %v2783_v0 = vmul.f32 1.442695, %v5614_v18 }
 0x680   :  { %2813 = vadd.xlane.f32.xlu0 %v3532_v47 }
 0x681   :  { %3533 = vpow2.f32 %v2783_v0 }
 0x683   :  { %v2786_v48 = vpop.xlane.xlu1 %2785 }
 0x684   :  { %3535 = vlog2.f32 %v2786_v48 }
 0x687   :  { %v3534_v27 = vpop.eup %3533 }
 0x688   :  { %2815 = vadd.xlane.f32.xlu1 %v3534_v27 }
 0x68a   :  { %v3536_v17 = vpop.eup %3535 }
 0x68b   :  { %v2818_v31 = vmul.f32 0.6931472, %v3536_v17  ;;  %v2788_v61 = vpop.xlane.xlu2 %2787 }
 0x68c   :  { %3537 = vlog2.f32 %v2788_v61 }
 0x68d   :  { %v2849_v44 = vsub.f32 %v5548_v46, %v2818_v31 }
 0x68f   :  { %2865 = vst [vmem:[#allocation7] sm:$0xff] %v2849_v44 }
 0x692   :  { %v3538_v52 = vpop.eup %3537 }
 0x693   :  { %v2820_v45 = vmul.f32 0.6931472, %v3538_v52  ;;  %v2790_v16 = vpop.xlane.xlu0 %2789 }
 0x694   :  { %3539 = vlog2.f32 %v2790_v16 }
 0x695   :  { %v2850_v3 = vsub.f32 %v5558_v14, %v2820_v45 }
 0x697   :  { %2866 = vst [vmem:[#allocation7 + $0x8] sm:$0xff] %v2850_v3 }
 0x69a   :  { %v3540_v40 = vpop.eup %3539 }
 0x69b   :  { %v2822_v53 = vmul.f32 0.6931472, %v3540_v40  ;;  %v2792_v62 = vpop.xlane.xlu1 %2791 }
 0x69c   :  { %3541 = vlog2.f32 %v2792_v62 }
 0x69d   :  { %v2851_v8 = vsub.f32 %v5562_v30, %v2822_v53 }
 0x69f   :  { %2867 = vst [vmem:[#allocation7 + $0x10] sm:$0xff] %v2851_v8 }
 0x6a2   :  { %v3542_v34 = vpop.eup %3541 }
 0x6a3   :  { %v2824_v38 = vmul.f32 0.6931472, %v3542_v34  ;;  %v2794_v26 = vpop.xlane.xlu2 %2793 }
 0x6a4   :  { %3543 = vlog2.f32 %v2794_v26 }
 0x6a5   :  { %v2852_v46 = vsub.f32 %v5566_v23, %v2824_v38 }
 0x6a7   :  { %2868 = vst [vmem:[#allocation7 + $0x18] sm:$0xff] %v2852_v46 }
 0x6aa   :  { %v3544_v10 = vpop.eup %3543 }
 0x6ab   :  { %v2826_v42 = vmul.f32 0.6931472, %v3544_v10  ;;  %v2796_v29 = vpop.xlane.xlu0 %2795 }
 0x6ac   :  { %3545 = vlog2.f32 %v2796_v29 }
 0x6ad   :  { %v2853_v14 = vsub.f32 %v5570_v13, %v2826_v42 }
 0x6af   :  { %2869 = vst [vmem:[#allocation7 + $0x20] sm:$0xff] %v2853_v14 }
 0x6b2   :  { %v3546_v41 = vpop.eup %3545 }
 0x6b3   :  { %v2828_v57 = vmul.f32 0.6931472, %v3546_v41  ;;  %v2798_v1 = vpop.xlane.xlu1 %2797 }
 0x6b4   :  { %3547 = vlog2.f32 %v2798_v1 }
 0x6b5   :  { %v2854_v30 = vsub.f32 %v5574_v63, %v2828_v57 }
 0x6b7   :  { %2870 = vst [vmem:[#allocation7 + $0x28] sm:$0xff] %v2854_v30 }
 0x6ba   :  { %v3548_v28 = vpop.eup %3547 }
 0x6bb   :  { %v2830_v35 = vmul.f32 0.6931472, %v3548_v28  ;;  %v2800_v9 = vpop.xlane.xlu2 %2799 }
 0x6bc   :  { %3549 = vlog2.f32 %v2800_v9 }
 0x6bd   :  { %v2855_v23 = vsub.f32 %v5578_v11, %v2830_v35 }
 0x6bf   :  { %2871 = vst [vmem:[#allocation7 + $0x30] sm:$0xff] %v2855_v23 }
 0x6c2   :  { %v3550_v21 = vpop.eup %3549 }
 0x6c3   :  { %v2832_v54 = vmul.f32 0.6931472, %v3550_v21  ;;  %v2802_v33 = vpop.xlane.xlu0 %2801 }
 0x6c4   :  { %3551 = vlog2.f32 %v2802_v33 }
 0x6c5   :  { %v2856_v13 = vsub.f32 %v5582_v58, %v2832_v54 }
 0x6c7   :  { %2872 = vst [vmem:[#allocation7 + $0x38] sm:$0xff] %v2856_v13 }
 0x6ca   :  { %v3552_v56 = vpop.eup %3551 }
 0x6cb   :  { %v2834_v4 = vmul.f32 0.6931472, %v3552_v56  ;;  %v2804_v6 = vpop.xlane.xlu1 %2803 }
 0x6cc   :  { %3553 = vlog2.f32 %v2804_v6 }
 0x6cd   :  { %v2857_v63 = vsub.f32 %v5586_v36, %v2834_v4 }
 0x6cf   :  { %2873 = vst [vmem:[#allocation7 + $0x40] sm:$0xff] %v2857_v63 }
 0x6d2   :  { %v3554_v55 = vpop.eup %3553 }
 0x6d3   :  { %v2836_v22 = vmul.f32 0.6931472, %v3554_v55  ;;  %v2806_v15 = vpop.xlane.xlu2 %2805 }
 0x6d4   :  { %3555 = vlog2.f32 %v2806_v15 }
 0x6d5   :  { %v2858_v11 = vsub.f32 %v5590_v7, %v2836_v22 }
 0x6d7   :  { %2874 = vst [vmem:[#allocation7 + $0x48] sm:$0xff] %v2858_v11 }
 0x6da   :  { %v3556_v49 = vpop.eup %3555 }
 0x6db   :  { %v2838_v20 = vmul.f32 0.6931472, %v3556_v49  ;;  %v2808_v39 = vpop.xlane.xlu0 %2807 }
 0x6dc   :  { %3557 = vlog2.f32 %v2808_v39 }
 0x6dd   :  { %v2859_v58 = vsub.f32 %v5594_v37, %v2838_v20 }
 0x6df   :  { %2875 = vst [vmem:[#allocation7 + $0x50] sm:$0xff] %v2859_v58 }
 0x6e2   :  { %v3558_v51 = vpop.eup %3557 }
 0x6e3   :  { %v2840_v19 = vmul.f32 0.6931472, %v3558_v51  ;;  %v2810_v12 = vpop.xlane.xlu1 %2809 }
 0x6e4   :  { %3559 = vlog2.f32 %v2810_v12 }
 0x6e5   :  { %v2860_v36 = vsub.f32 %v5598_v60, %v2840_v19 }
 0x6e7   :  { %2876 = vst [vmem:[#allocation7 + $0x58] sm:$0xff] %v2860_v36 }
 0x6ea   :  { %v3560_v24 = vpop.eup %3559 }
 0x6eb   :  { %v2842_v32 = vmul.f32 0.6931472, %v3560_v24  ;;  %v2812_v50 = vpop.xlane.xlu2 %2811 }
 0x6ec   :  { %3561 = vlog2.f32 %v2812_v50 }
 0x6ed   :  { %v2861_v7 = vsub.f32 %v5602_v43, %v2842_v32 }
 0x6ef   :  { %2877 = vst [vmem:[#allocation7 + $0x60] sm:$0xff] %v2861_v7 }
 0x6f2   :  { %v3562_v5 = vpop.eup %3561 }
 0x6f3   :  { %v2844_v2 = vmul.f32 0.6931472, %v3562_v5  ;;  %v2814_v47 = vpop.xlane.xlu0 %2813 }
 0x6f4   :  { %3563 = vlog2.f32 %v2814_v47 }
 0x6f5   :  { %v2862_v37 = vsub.f32 %v5606_v59, %v2844_v2 }
 0x6f7   :  { %2878 = vst [vmem:[#allocation7 + $0x68] sm:$0xff] %v2862_v37 }
 0x6fa   :  { %v3564_v0 = vpop.eup %3563 }
 0x6fb   :  { %v2846_v48 = vmul.f32 0.6931472, %v3564_v0  ;;  %v2816_v27 = vpop.xlane.xlu1 %2815 }
 0x6fc   :  { %3565 = vlog2.f32 %v2816_v27 }
 0x6fd   :  { %v2863_v60 = vsub.f32 %v5610_v25, %v2846_v48 }
 0x6ff   :  { %2879 = vst [vmem:[#allocation7 + $0x70] sm:$0xff] %v2863_v60 }
 0x702   :  { %v3566_v43 = vpop.eup %3565 }
 0x703   :  { %v2848_v17 = vmul.f32 0.6931472, %v3566_v43 }
 0x705   :  { %v2864_v59 = vsub.f32 %v5614_v18, %v2848_v17 }
 0x707   :  { %2880 = vst [vmem:[#allocation7 + $0x78] sm:$0xff] %v2864_v59 }
 0x708   :  { %2893 = dma.vmem_to_hbm [thread:$0]  %s2886_s10, 2048, %s2888_s13, [#allocation6], %s3642_s14, %s3642_s14, %s3643_s2  }
 0x709   :  { %3635 = dma.done.wait [#allocation6], 2048  }
 0x70a   :  { %3636 = vsyncadd [#allocation6], 4294965248 }
 0x70b   :  { %2898 = vsyncpa [#allocation5], 1 }
 0x70c   :  { %2899 = vsyncpa [#allocation6], 1 }
 0x70d   :  { %2900 = vsyncmov [#allocation3] }
 0x710   :  { %s2901_s15 = vpop.sfrf %2900 }
 0x711   :  { %p3216_p0 = scmp.ne.s32.totalorder %s2901_s15, 0 }
 0x713   :  { %2905 = shalt.err (%p3216_p0)  }

</bundles_post_ra>
